<compile_context>
chip_gen: v7x
topology: tpu7x:2x2x1
jax: 0.10.0
libtpu: 0.0.40
codegen_flags: <defaults>
</compile_context>

<pallas_src>
import math

import jax
import jax.numpy as jnp
from jax.experimental import pallas as pl
from jax.experimental.pallas import tpu as pltpu

_HALF_LOG_2PI = 0.5 * math.log(2.0 * math.pi)


def lstm_vae_kernel(x_ref, eps_ref,
                    we_ih_ref, we_hh_ref, be_ref,
                    weh_ref, beh_ref,
                    wd_ih_ref, wd_hh_ref, bd_ref,
                    wdh_ref, bdh_ref,
                    out_ref,
                    hs_scr):
    """Full LSTM-VAE forward for one batch shard.

    Refs (VMEM):
      x_ref:    (T, Bs, F)  f32   input sequence (batch shard, padded to 8k rows)
      eps_ref:  (T, Bs, Z)  f32   std-normal noise for reparameterization
      we_ih_ref:(F, 4H)     bf16  encoder LSTM input weights, gate order [i,f,o,g]
      we_hh_ref:(H, 4H)     bf16  encoder LSTM hidden weights
      be_ref:   (1, 4H)     f32   encoder combined bias b_ih + b_hh
      weh_ref:  (H, 2Z)     bf16  fused encoder heads  [mean | logvar]
      beh_ref:  (1, 2Z)     f32
      wd_ih_ref:(Z, 4H)     bf16  decoder LSTM input weights
      wd_hh_ref:(H, 4H)     bf16  decoder LSTM hidden weights
      bd_ref:   (1, 4H)     f32
      wdh_ref:  (H, 2F)     bf16  fused decoder heads  [mean | sigma]
      bdh_ref:  (1, 2F)     f32
      out_ref:  (T, Bs, 3F+1) f32  packed [mu_x | sigma_x | log_px | kl_row]
      hs_scr:   (T*Bs, H)   f32   scratch holding every h_t (reused by both LSTMs)
    """
    T, Bs, F = x_ref.shape
    Z = eps_ref.shape[-1]
    H = we_hh_ref.shape[0]
    H3 = 3 * H

    x2d = x_ref[...].reshape(T * Bs, F)          # f32, also reused by log_px
    eps2d = eps_ref[...].reshape(T * Bs, Z)

    def run_lstm(xproj, w_hh):
        """xproj: (T*Bs, 4H) f32, gate order [i,f,o,g]; w_hh: (H,4H) bf16.
        Fully unrolled recurrence; h/c stay in registers, h_t -> hs_scr."""
        h = jnp.zeros((Bs, H), jnp.float32)
        c = jnp.zeros((Bs, H), jnp.float32)
        for t in range(T):
            row = t * Bs                          # Bs % 8 == 0 -> sublane aligned
            gates = xproj[row:row + Bs, :] + jnp.dot(
                h.astype(jnp.bfloat16), w_hh,
                preferred_element_type=jnp.float32)            # (Bs, 4H)
            sg = jax.nn.sigmoid(gates[:, :H3])   # [i | f | o]
            gg = jnp.tanh(gates[:, H3:])         # g
            i_g = sg[:, 0:H]
            f_g = sg[:, H:2 * H]
            o_g = sg[:, 2 * H:H3]
            c = f_g * c + i_g * gg
            h = o_g * jnp.tanh(c)
            hs_scr[row:row + Bs, :] = h

    # ------------------------------ Encoder ------------------------------
    xproj = jnp.dot(x2d.astype(jnp.bfloat16), we_ih_ref[...],
                    preferred_element_type=jnp.float32) + be_ref[...]
    run_lstm(xproj, we_hh_ref[...])

    sp_e = jnp.logaddexp(hs_scr[...], 0.0)                       # softplus
    enc_heads = jnp.dot(sp_e.astype(jnp.bfloat16), weh_ref[...],
                        preferred_element_type=jnp.float32) + beh_ref[...]
    z_mean = enc_heads[:, :Z]
    z_logvar = enc_heads[:, Z:]
    z = z_mean + eps2d * jnp.exp(0.5 * z_logvar)                 # reparameterize

    # per-row KL contribution: -0.5 * sum_Z(1 + logvar - exp(logvar) - mean^2)
    kl_row = -0.5 * jnp.sum(1.0 + z_logvar - jnp.exp(z_logvar)
                            - jnp.square(z_mean), axis=1, keepdims=True)

    # ------------------------------ Decoder ------------------------------
    zproj = jnp.dot(z.astype(jnp.bfloat16), wd_ih_ref[...],
                    preferred_element_type=jnp.float32) + bd_ref[...]
    run_lstm(zproj, wd_hh_ref[...])

    sp_d = jnp.logaddexp(hs_scr[...], 0.0)
    dec_heads = jnp.dot(sp_d.astype(jnp.bfloat16), wdh_ref[...],
                        preferred_element_type=jnp.float32) + bdh_ref[...]
    mu_x = dec_heads[:, :F]
    sigma_x = jnp.tanh(dec_heads[:, F:])

    # log_px = -Normal(mu_x, |sigma_x|).log_prob(x)  (reference does not clamp sigma)
    sn = jnp.abs(sigma_x)
    log_px = (0.5 * jnp.square((x2d - mu_x) / sn)
              + jnp.log(sn) + _HALF_LOG_2PI)

    packed = jnp.concatenate([mu_x, sigma_x, log_px, kl_row], axis=1)
    out_ref[...] = packed.reshape(T, Bs, 3 * F + 1)


def lstm_vae_forward(x, eps, params):
    """x: (T, B, F), eps: (T, B, Z) -> (mu_x, sigma_x, log_px) each (T, B, F)
    plus scalar kl_loss, matching LSTMVAE.forward."""
    T, B, F = x.shape
    Z = eps.shape[-1]
    H = params["we_hh_t"].shape[0]
    W = 3 * F + 1

    # Batch sharding: 2 shards only if each shard keeps >= 8 sublane rows
    # (uses both TensorCores on v7x; 1-shard grid is a no-op on v5e/v6e).
    num_shards = 2 if B >= 16 else 1
    pad_to = 8 * num_shards
    b_pad = ((B + pad_to - 1) // pad_to) * pad_to
    rows = b_pad // num_shards

    if b_pad != B:
        pad = ((0, 0), (0, b_pad - B), (0, 0))
        x_p = jnp.pad(x, pad)
        eps_p = jnp.pad(eps, pad)
    else:
        x_p, eps_p = x, eps

    vmem_full = pl.BlockSpec(memory_space=pltpu.MemorySpace.VMEM)
    in_specs = [
        pl.BlockSpec((T, rows, F), lambda s: (0, s, 0)),
        pl.BlockSpec((T, rows, Z), lambda s: (0, s, 0)),
    ] + [vmem_full] * 10
    out_specs = pl.BlockSpec((T, rows, W), lambda s: (0, s, 0))

    out = pl.pallas_call(
        lstm_vae_kernel,
        grid=(num_shards,),
        out_shape=jax.ShapeDtypeStruct((T, b_pad, W), jnp.float32),
        in_specs=in_specs,
        out_specs=out_specs,
        scratch_shapes=[pltpu.VMEM((T * rows, H), jnp.float32)],
        compiler_params=pltpu.CompilerParams(
            dimension_semantics=("parallel",)),
    )(x_p, eps_p,
      params["we_ih_t"], params["we_hh_t"], params["be"],
      params["w_enc_head"], params["b_enc_head"],
      params["wd_ih_t"], params["wd_hh_t"], params["bd"],
      params["w_dec_head"], params["b_dec_head"])

    out = out[:, :B, :]                      # drop padded batch rows
    mu_x = out[..., 0:F]
    sigma_x = out[..., F:2 * F]
    log_px = out[..., 2 * F:3 * F]
    kl_loss = jnp.sum(out[..., 3 * F])       # sum over T and the real batch rows
    return mu_x, sigma_x, log_px, kl_loss


def init_params(key, n_features, lstm_dim, hidden_size):
    """Deterministic synthetic parameters matching nn.LSTM / nn.Linear shapes,
    repacked for the kernel: gate order [i,f,o,g], fused head weights,
    bf16 weight matrices (biases stay f32)."""
    ks = jax.random.split(key, 16)
    H, F, Z = lstm_dim, n_features, hidden_size
    bound = 1.0 / math.sqrt(H)
    u = lambda kk, shape: jax.random.uniform(kk, shape, jnp.float32, -bound, bound)

    def reorder(w):
        """PyTorch LSTM gate layout [i,f,g,o] (axis 0 blocks) -> [i,f,o,g]."""
        return jnp.concatenate([w[:2 * H], w[3 * H:4 * H], w[2 * H:3 * H]], axis=0)

    # ----- encoder: nn.LSTM(F -> H), two nn.Linear(H -> Z) -----
    we_ih = u(ks[0], (4 * H, F))
    we_hh = u(ks[1], (4 * H, H))
    be_ih = u(ks[2], (4 * H,))
    be_hh = u(ks[3], (4 * H,))
    wem = u(ks[4], (Z, H)); bem = u(ks[5], (Z,))
    wes = u(ks[6], (Z, H)); bes = u(ks[7], (Z,))

    # ----- decoder: nn.LSTM(Z -> H), two nn.Linear(H -> F) -----
    wd_ih = u(ks[8], (4 * H, Z))
    wd_hh = u(ks[9], (4 * H, H))
    bd_ih = u(ks[10], (4 * H,))
    bd_hh = u(ks[11], (4 * H,))
    wdm = u(ks[12], (F, H)); bdm = u(ks[13], (F,))
    wds = u(ks[14], (F, H)); bds = u(ks[15], (F,))

    bf16 = jnp.bfloat16
    return {
        "we_ih_t": reorder(we_ih).T.astype(bf16),                     # (F, 4H)
        "we_hh_t": reorder(we_hh).T.astype(bf16),                     # (H, 4H)
        "be": reorder(be_ih + be_hh).reshape(1, 4 * H),               # (1, 4H) f32
        "w_enc_head": jnp.concatenate([wem.T, wes.T], axis=1).astype(bf16),   # (H, 2Z)
        "b_enc_head": jnp.concatenate([bem, bes]).reshape(1, 2 * Z),
        "wd_ih_t": reorder(wd_ih).T.astype(bf16),                     # (Z, 4H)
        "wd_hh_t": reorder(wd_hh).T.astype(bf16),                     # (H, 4H)
        "bd": reorder(bd_ih + bd_hh).reshape(1, 4 * H),
        "w_dec_head": jnp.concatenate([wdm.T, wds.T], axis=1).astype(bf16),   # (H, 2F)
        "b_dec_head": jnp.concatenate([bdm, bds]).reshape(1, 2 * F),
    }


if __name__ == "__main__":
    T, B, F = 8, 2, 4          # seq, batch, n_features
    LSTM_DIM = 32              # lstm_dim
    HIDDEN = 16                # hidden_size (latent dim)

    root = jax.random.PRNGKey(0)
    k_param, k_x, k_eps = jax.random.split(root, 3)

    params = init_params(k_param, F, LSTM_DIM, HIDDEN)
    x = jax.random.normal(k_x, (T, B, F), jnp.float32)
    # torch.randn_like(std) inside reparameterize -> pass std-normal noise explicitly
    eps = jax.random.normal(k_eps, (T, B, HIDDEN), jnp.float32)

    mu_x, sigma_x, log_px, kl_loss = jax.jit(lstm_vae_forward)(x, eps, params)
    jax.block_until_ready((mu_x, sigma_x, log_px, kl_loss))

    assert mu_x.shape == (T, B, F)
    assert sigma_x.shape == (T, B, F)
    assert log_px.shape == (T, B, F)
    assert kl_loss.shape == ()
    ok = (jnp.all(jnp.isfinite(mu_x)) & jnp.all(jnp.isfinite(sigma_x))
          & jnp.all(jnp.isfinite(log_px)) & jnp.isfinite(kl_loss))
    assert bool(ok)
    print("KERNEL_OK")
</pallas_src>

<mosaic_0001>
module attributes {stable_mosaic.version = 11 : i64} {
  func.func @lstm_vae_kernel(%arg0: i32, %arg1: memref<8x8x4xf32, #tpu.memory_space<vmem>>, %arg2: memref<8x8x16xf32, #tpu.memory_space<vmem>>, %arg3: memref<4x128xbf16, #tpu.memory_space<vmem>>, %arg4: memref<32x128xbf16, #tpu.memory_space<vmem>>, %arg5: memref<1x128xf32, #tpu.memory_space<vmem>>, %arg6: memref<32x32xbf16, #tpu.memory_space<vmem>>, %arg7: memref<1x32xf32, #tpu.memory_space<vmem>>, %arg8: memref<16x128xbf16, #tpu.memory_space<vmem>>, %arg9: memref<32x128xbf16, #tpu.memory_space<vmem>>, %arg10: memref<1x128xf32, #tpu.memory_space<vmem>>, %arg11: memref<32x8xbf16, #tpu.memory_space<vmem>>, %arg12: memref<1x8xf32, #tpu.memory_space<vmem>>, %arg13: memref<8x8x13xf32, #tpu.memory_space<vmem>>, %arg14: memref<64x32xf32, #tpu.memory_space<vmem>>) attributes {dimension_semantics = [#tpu.dimension_semantics<parallel>], iteration_bounds = array<i64: 1>, scalar_prefetch = 0 : i64, scratch_operands = 1 : i64, tpu.core_type = #tpu.core_type<tc>, window_params = [{transform_indices = @transform_0, window_bounds = array<i64: 8, 8, 4>}, {transform_indices = @transform_1, window_bounds = array<i64: 8, 8, 16>}, {pipeline_mode = #tpu.pipeline_mode<synchronous>, transform_indices = @transform_2, window_bounds = array<i64: 4, 128>}, {pipeline_mode = #tpu.pipeline_mode<synchronous>, transform_indices = @transform_3, window_bounds = array<i64: 32, 128>}, {pipeline_mode = #tpu.pipeline_mode<synchronous>, transform_indices = @transform_4, window_bounds = array<i64: 1, 128>}, {pipeline_mode = #tpu.pipeline_mode<synchronous>, transform_indices = @transform_5, window_bounds = array<i64: 32, 32>}, {pipeline_mode = #tpu.pipeline_mode<synchronous>, transform_indices = @transform_6, window_bounds = array<i64: 1, 32>}, {pipeline_mode = #tpu.pipeline_mode<synchronous>, transform_indices = @transform_7, window_bounds = array<i64: 16, 128>}, {pipeline_mode = #tpu.pipeline_mode<synchronous>, transform_indices = @transform_8, window_bounds = array<i64: 32, 128>}, {pipeline_mode = #tpu.pipeline_mode<synchronous>, transform_indices = @transform_9, window_bounds = array<i64: 1, 128>}, {pipeline_mode = #tpu.pipeline_mode<synchronous>, transform_indices = @transform_10, window_bounds = array<i64: 32, 8>}, {pipeline_mode = #tpu.pipeline_mode<synchronous>, transform_indices = @transform_11, window_bounds = array<i64: 1, 8>}, {transform_indices = @transform_12, window_bounds = array<i64: 8, 8, 13>}]} {
    %c0 = arith.constant 0 : index
    %c0_0 = arith.constant 0 : index
    %c0_1 = arith.constant 0 : index
    %0 = vector.load %arg1[%c0, %c0_0, %c0_1] : memref<8x8x4xf32, #tpu.memory_space<vmem>>, vector<8x8x4xf32>
    %1 = vector.shape_cast %0 : vector<8x8x4xf32> to vector<64x4xf32>
    %c0_2 = arith.constant 0 : index
    %c0_3 = arith.constant 0 : index
    %c0_4 = arith.constant 0 : index
    %2 = vector.load %arg2[%c0_2, %c0_3, %c0_4] : memref<8x8x16xf32, #tpu.memory_space<vmem>>, vector<8x8x16xf32>
    %3 = vector.shape_cast %2 : vector<8x8x16xf32> to vector<64x16xf32>
    %4 = arith.truncf %1 : vector<64x4xf32> to vector<64x4xbf16>
    %c0_5 = arith.constant 0 : index
    %c0_6 = arith.constant 0 : index
    %5 = vector.load %arg3[%c0_5, %c0_6] : memref<4x128xbf16, #tpu.memory_space<vmem>>, vector<4x128xbf16>
    %cst = arith.constant dense<0.000000e+00> : vector<64x128xf32>
    %6 = tpu.matmul %4, %5, %cst {dimension_numbers = #tpu.dot_dimension_numbers<[1], [0], [0], [1], [0, 0, 1, 1], [], []>} : vector<64x4xbf16>, vector<4x128xbf16>, vector<64x128xf32> -> vector<64x128xf32>
    %c0_7 = arith.constant 0 : index
    %c0_8 = arith.constant 0 : index
    %7 = vector.load %arg5[%c0_7, %c0_8] : memref<1x128xf32, #tpu.memory_space<vmem>>, vector<1x128xf32>
    %8 = vector.broadcast %7 : vector<1x128xf32> to vector<64x128xf32>
    %9 = arith.addf %6, %8 : vector<64x128xf32>
    %c0_9 = arith.constant 0 : index
    %c0_10 = arith.constant 0 : index
    %10 = vector.load %arg4[%c0_9, %c0_10] : memref<32x128xbf16, #tpu.memory_space<vmem>>, vector<32x128xbf16>
    %cst_11 = arith.constant 0.000000e+00 : f32
    %11 = vector.broadcast %cst_11 : f32 to vector<8x32xf32>
    %cst_12 = arith.constant 0.000000e+00 : f32
    %12 = vector.broadcast %cst_12 : f32 to vector<8x32xf32>
    %13 = vector.extract_strided_slice %9 {offsets = [0, 0], sizes = [8, 128], strides = [1, 1]} : vector<64x128xf32> to vector<8x128xf32>
    %14 = arith.truncf %11 : vector<8x32xf32> to vector<8x32xbf16>
    %cst_13 = arith.constant dense<0.000000e+00> : vector<8x128xf32>
    %15 = tpu.matmul %14, %10, %cst_13 {dimension_numbers = #tpu.dot_dimension_numbers<[1], [0], [0], [1], [0, 0, 1, 1], [], []>} : vector<8x32xbf16>, vector<32x128xbf16>, vector<8x128xf32> -> vector<8x128xf32>
    %16 = arith.addf %13, %15 : vector<8x128xf32>
    %17 = vector.extract_strided_slice %16 {offsets = [0, 0], sizes = [8, 96], strides = [1, 1]} : vector<8x128xf32> to vector<8x96xf32>
    %18 = arith.negf %17 : vector<8x96xf32>
    %19 = math.exp %18 : vector<8x96xf32>
    %cst_14 = arith.constant 1.000000e+00 : f32
    %20 = vector.broadcast %cst_14 : f32 to vector<8x96xf32>
    %21 = arith.addf %20, %19 : vector<8x96xf32>
    %22 = arith.divf %20, %21 : vector<8x96xf32>
    %23 = vector.extract_strided_slice %16 {offsets = [0, 96], sizes = [8, 32], strides = [1, 1]} : vector<8x128xf32> to vector<8x32xf32>
    %24 = math.tanh %23 : vector<8x32xf32>
    %25 = vector.extract_strided_slice %22 {offsets = [0, 0], sizes = [8, 32], strides = [1, 1]} : vector<8x96xf32> to vector<8x32xf32>
    %26 = vector.extract_strided_slice %22 {offsets = [0, 32], sizes = [8, 32], strides = [1, 1]} : vector<8x96xf32> to vector<8x32xf32>
    %27 = vector.extract_strided_slice %22 {offsets = [0, 64], sizes = [8, 32], strides = [1, 1]} : vector<8x96xf32> to vector<8x32xf32>
    %28 = arith.mulf %26, %12 : vector<8x32xf32>
    %29 = arith.mulf %25, %24 : vector<8x32xf32>
    %30 = arith.addf %28, %29 : vector<8x32xf32>
    %31 = math.tanh %30 : vector<8x32xf32>
    %32 = arith.mulf %27, %31 : vector<8x32xf32>
    %c0_15 = arith.constant 0 : index
    %c0_16 = arith.constant 0 : index
    %33 = vector.load %arg14[%c0_15, %c0_16] : memref<64x32xf32, #tpu.memory_space<vmem>>, vector<8x32xf32>
    tpu.vector_store %arg14[%c0_15, %c0_16], %32 {strides = array<i32>} : memref<64x32xf32, #tpu.memory_space<vmem>>, vector<8x32xf32>,
    %34 = vector.extract_strided_slice %9 {offsets = [8, 0], sizes = [8, 128], strides = [1, 1]} : vector<64x128xf32> to vector<8x128xf32>
    %35 = arith.truncf %32 : vector<8x32xf32> to vector<8x32xbf16>
    %cst_17 = arith.constant dense<0.000000e+00> : vector<8x128xf32>
    %36 = tpu.matmul %35, %10, %cst_17 {dimension_numbers = #tpu.dot_dimension_numbers<[1], [0], [0], [1], [0, 0, 1, 1], [], []>} : vector<8x32xbf16>, vector<32x128xbf16>, vector<8x128xf32> -> vector<8x128xf32>
    %37 = arith.addf %34, %36 : vector<8x128xf32>
    %38 = vector.extract_strided_slice %37 {offsets = [0, 0], sizes = [8, 96], strides = [1, 1]} : vector<8x128xf32> to vector<8x96xf32>
    %39 = arith.negf %38 : vector<8x96xf32>
    %40 = math.exp %39 : vector<8x96xf32>
    %cst_18 = arith.constant 1.000000e+00 : f32
    %41 = vector.broadcast %cst_18 : f32 to vector<8x96xf32>
    %42 = arith.addf %41, %40 : vector<8x96xf32>
    %43 = arith.divf %41, %42 : vector<8x96xf32>
    %44 = vector.extract_strided_slice %37 {offsets = [0, 96], sizes = [8, 32], strides = [1, 1]} : vector<8x128xf32> to vector<8x32xf32>
    %45 = math.tanh %44 : vector<8x32xf32>
    %46 = vector.extract_strided_slice %43 {offsets = [0, 0], sizes = [8, 32], strides = [1, 1]} : vector<8x96xf32> to vector<8x32xf32>
    %47 = vector.extract_strided_slice %43 {offsets = [0, 32], sizes = [8, 32], strides = [1, 1]} : vector<8x96xf32> to vector<8x32xf32>
    %48 = vector.extract_strided_slice %43 {offsets = [0, 64], sizes = [8, 32], strides = [1, 1]} : vector<8x96xf32> to vector<8x32xf32>
    %49 = arith.mulf %47, %30 : vector<8x32xf32>
    %50 = arith.mulf %46, %45 : vector<8x32xf32>
    %51 = arith.addf %49, %50 : vector<8x32xf32>
    %52 = math.tanh %51 : vector<8x32xf32>
    %53 = arith.mulf %48, %52 : vector<8x32xf32>
    %c8 = arith.constant 8 : index
    %c0_19 = arith.constant 0 : index
    %54 = vector.load %arg14[%c8, %c0_19] : memref<64x32xf32, #tpu.memory_space<vmem>>, vector<8x32xf32>
    tpu.vector_store %arg14[%c8, %c0_19], %53 {strides = array<i32>} : memref<64x32xf32, #tpu.memory_space<vmem>>, vector<8x32xf32>,
    %55 = vector.extract_strided_slice %9 {offsets = [16, 0], sizes = [8, 128], strides = [1, 1]} : vector<64x128xf32> to vector<8x128xf32>
    %56 = arith.truncf %53 : vector<8x32xf32> to vector<8x32xbf16>
    %cst_20 = arith.constant dense<0.000000e+00> : vector<8x128xf32>
    %57 = tpu.matmul %56, %10, %cst_20 {dimension_numbers = #tpu.dot_dimension_numbers<[1], [0], [0], [1], [0, 0, 1, 1], [], []>} : vector<8x32xbf16>, vector<32x128xbf16>, vector<8x128xf32> -> vector<8x128xf32>
    %58 = arith.addf %55, %57 : vector<8x128xf32>
    %59 = vector.extract_strided_slice %58 {offsets = [0, 0], sizes = [8, 96], strides = [1, 1]} : vector<8x128xf32> to vector<8x96xf32>
    %60 = arith.negf %59 : vector<8x96xf32>
    %61 = math.exp %60 : vector<8x96xf32>
    %cst_21 = arith.constant 1.000000e+00 : f32
    %62 = vector.broadcast %cst_21 : f32 to vector<8x96xf32>
    %63 = arith.addf %62, %61 : vector<8x96xf32>
    %64 = arith.divf %62, %63 : vector<8x96xf32>
    %65 = vector.extract_strided_slice %58 {offsets = [0, 96], sizes = [8, 32], strides = [1, 1]} : vector<8x128xf32> to vector<8x32xf32>
    %66 = math.tanh %65 : vector<8x32xf32>
    %67 = vector.extract_strided_slice %64 {offsets = [0, 0], sizes = [8, 32], strides = [1, 1]} : vector<8x96xf32> to vector<8x32xf32>
    %68 = vector.extract_strided_slice %64 {offsets = [0, 32], sizes = [8, 32], strides = [1, 1]} : vector<8x96xf32> to vector<8x32xf32>
    %69 = vector.extract_strided_slice %64 {offsets = [0, 64], sizes = [8, 32], strides = [1, 1]} : vector<8x96xf32> to vector<8x32xf32>
    %70 = arith.mulf %68, %51 : vector<8x32xf32>
    %71 = arith.mulf %67, %66 : vector<8x32xf32>
    %72 = arith.addf %70, %71 : vector<8x32xf32>
    %73 = math.tanh %72 : vector<8x32xf32>
    %74 = arith.mulf %69, %73 : vector<8x32xf32>
    %c16 = arith.constant 16 : index
    %c0_22 = arith.constant 0 : index
    %75 = vector.load %arg14[%c16, %c0_22] : memref<64x32xf32, #tpu.memory_space<vmem>>, vector<8x32xf32>
    tpu.vector_store %arg14[%c16, %c0_22], %74 {strides = array<i32>} : memref<64x32xf32, #tpu.memory_space<vmem>>, vector<8x32xf32>,
    %76 = vector.extract_strided_slice %9 {offsets = [24, 0], sizes = [8, 128], strides = [1, 1]} : vector<64x128xf32> to vector<8x128xf32>
    %77 = arith.truncf %74 : vector<8x32xf32> to vector<8x32xbf16>
    %cst_23 = arith.constant dense<0.000000e+00> : vector<8x128xf32>
    %78 = tpu.matmul %77, %10, %cst_23 {dimension_numbers = #tpu.dot_dimension_numbers<[1], [0], [0], [1], [0, 0, 1, 1], [], []>} : vector<8x32xbf16>, vector<32x128xbf16>, vector<8x128xf32> -> vector<8x128xf32>
    %79 = arith.addf %76, %78 : vector<8x128xf32>
    %80 = vector.extract_strided_slice %79 {offsets = [0, 0], sizes = [8, 96], strides = [1, 1]} : vector<8x128xf32> to vector<8x96xf32>
    %81 = arith.negf %80 : vector<8x96xf32>
    %82 = math.exp %81 : vector<8x96xf32>
    %cst_24 = arith.constant 1.000000e+00 : f32
    %83 = vector.broadcast %cst_24 : f32 to vector<8x96xf32>
    %84 = arith.addf %83, %82 : vector<8x96xf32>
    %85 = arith.divf %83, %84 : vector<8x96xf32>
    %86 = vector.extract_strided_slice %79 {offsets = [0, 96], sizes = [8, 32], strides = [1, 1]} : vector<8x128xf32> to vector<8x32xf32>
    %87 = math.tanh %86 : vector<8x32xf32>
    %88 = vector.extract_strided_slice %85 {offsets = [0, 0], sizes = [8, 32], strides = [1, 1]} : vector<8x96xf32> to vector<8x32xf32>
    %89 = vector.extract_strided_slice %85 {offsets = [0, 32], sizes = [8, 32], strides = [1, 1]} : vector<8x96xf32> to vector<8x32xf32>
    %90 = vector.extract_strided_slice %85 {offsets = [0, 64], sizes = [8, 32], strides = [1, 1]} : vector<8x96xf32> to vector<8x32xf32>
    %91 = arith.mulf %89, %72 : vector<8x32xf32>
    %92 = arith.mulf %88, %87 : vector<8x32xf32>
    %93 = arith.addf %91, %92 : vector<8x32xf32>
    %94 = math.tanh %93 : vector<8x32xf32>
    %95 = arith.mulf %90, %94 : vector<8x32xf32>
    %c24 = arith.constant 24 : index
    %c0_25 = arith.constant 0 : index
    %96 = vector.load %arg14[%c24, %c0_25] : memref<64x32xf32, #tpu.memory_space<vmem>>, vector<8x32xf32>
    tpu.vector_store %arg14[%c24, %c0_25], %95 {strides = array<i32>} : memref<64x32xf32, #tpu.memory_space<vmem>>, vector<8x32xf32>,
    %97 = vector.extract_strided_slice %9 {offsets = [32, 0], sizes = [8, 128], strides = [1, 1]} : vector<64x128xf32> to vector<8x128xf32>
    %98 = arith.truncf %95 : vector<8x32xf32> to vector<8x32xbf16>
    %cst_26 = arith.constant dense<0.000000e+00> : vector<8x128xf32>
    %99 = tpu.matmul %98, %10, %cst_26 {dimension_numbers = #tpu.dot_dimension_numbers<[1], [0], [0], [1], [0, 0, 1, 1], [], []>} : vector<8x32xbf16>, vector<32x128xbf16>, vector<8x128xf32> -> vector<8x128xf32>
    %100 = arith.addf %97, %99 : vector<8x128xf32>
    %101 = vector.extract_strided_slice %100 {offsets = [0, 0], sizes = [8, 96], strides = [1, 1]} : vector<8x128xf32> to vector<8x96xf32>
    %102 = arith.negf %101 : vector<8x96xf32>
    %103 = math.exp %102 : vector<8x96xf32>
    %cst_27 = arith.constant 1.000000e+00 : f32
    %104 = vector.broadcast %cst_27 : f32 to vector<8x96xf32>
    %105 = arith.addf %104, %103 : vector<8x96xf32>
    %106 = arith.divf %104, %105 : vector<8x96xf32>
    %107 = vector.extract_strided_slice %100 {offsets = [0, 96], sizes = [8, 32], strides = [1, 1]} : vector<8x128xf32> to vector<8x32xf32>
    %108 = math.tanh %107 : vector<8x32xf32>
    %109 = vector.extract_strided_slice %106 {offsets = [0, 0], sizes = [8, 32], strides = [1, 1]} : vector<8x96xf32> to vector<8x32xf32>
    %110 = vector.extract_strided_slice %106 {offsets = [0, 32], sizes = [8, 32], strides = [1, 1]} : vector<8x96xf32> to vector<8x32xf32>
    %111 = vector.extract_strided_slice %106 {offsets = [0, 64], sizes = [8, 32], strides = [1, 1]} : vector<8x96xf32> to vector<8x32xf32>
    %112 = arith.mulf %110, %93 : vector<8x32xf32>
    %113 = arith.mulf %109, %108 : vector<8x32xf32>
    %114 = arith.addf %112, %113 : vector<8x32xf32>
    %115 = math.tanh %114 : vector<8x32xf32>
    %116 = arith.mulf %111, %115 : vector<8x32xf32>
    %c32 = arith.constant 32 : index
    %c0_28 = arith.constant 0 : index
    %117 = vector.load %arg14[%c32, %c0_28] : memref<64x32xf32, #tpu.memory_space<vmem>>, vector<8x32xf32>
    tpu.vector_store %arg14[%c32, %c0_28], %116 {strides = array<i32>} : memref<64x32xf32, #tpu.memory_space<vmem>>, vector<8x32xf32>,
    %118 = vector.extract_strided_slice %9 {offsets = [40, 0], sizes = [8, 128], strides = [1, 1]} : vector<64x128xf32> to vector<8x128xf32>
    %119 = arith.truncf %116 : vector<8x32xf32> to vector<8x32xbf16>
    %cst_29 = arith.constant dense<0.000000e+00> : vector<8x128xf32>
    %120 = tpu.matmul %119, %10, %cst_29 {dimension_numbers = #tpu.dot_dimension_numbers<[1], [0], [0], [1], [0, 0, 1, 1], [], []>} : vector<8x32xbf16>, vector<32x128xbf16>, vector<8x128xf32> -> vector<8x128xf32>
    %121 = arith.addf %118, %120 : vector<8x128xf32>
    %122 = vector.extract_strided_slice %121 {offsets = [0, 0], sizes = [8, 96], strides = [1, 1]} : vector<8x128xf32> to vector<8x96xf32>
    %123 = arith.negf %122 : vector<8x96xf32>
    %124 = math.exp %123 : vector<8x96xf32>
    %cst_30 = arith.constant 1.000000e+00 : f32
    %125 = vector.broadcast %cst_30 : f32 to vector<8x96xf32>
    %126 = arith.addf %125, %124 : vector<8x96xf32>
    %127 = arith.divf %125, %126 : vector<8x96xf32>
    %128 = vector.extract_strided_slice %121 {offsets = [0, 96], sizes = [8, 32], strides = [1, 1]} : vector<8x128xf32> to vector<8x32xf32>
    %129 = math.tanh %128 : vector<8x32xf32>
    %130 = vector.extract_strided_slice %127 {offsets = [0, 0], sizes = [8, 32], strides = [1, 1]} : vector<8x96xf32> to vector<8x32xf32>
    %131 = vector.extract_strided_slice %127 {offsets = [0, 32], sizes = [8, 32], strides = [1, 1]} : vector<8x96xf32> to vector<8x32xf32>
    %132 = vector.extract_strided_slice %127 {offsets = [0, 64], sizes = [8, 32], strides = [1, 1]} : vector<8x96xf32> to vector<8x32xf32>
    %133 = arith.mulf %131, %114 : vector<8x32xf32>
    %134 = arith.mulf %130, %129 : vector<8x32xf32>
    %135 = arith.addf %133, %134 : vector<8x32xf32>
    %136 = math.tanh %135 : vector<8x32xf32>
    %137 = arith.mulf %132, %136 : vector<8x32xf32>
    %c40 = arith.constant 40 : index
    %c0_31 = arith.constant 0 : index
    %138 = vector.load %arg14[%c40, %c0_31] : memref<64x32xf32, #tpu.memory_space<vmem>>, vector<8x32xf32>
    tpu.vector_store %arg14[%c40, %c0_31], %137 {strides = array<i32>} : memref<64x32xf32, #tpu.memory_space<vmem>>, vector<8x32xf32>,
    %139 = vector.extract_strided_slice %9 {offsets = [48, 0], sizes = [8, 128], strides = [1, 1]} : vector<64x128xf32> to vector<8x128xf32>
    %140 = arith.truncf %137 : vector<8x32xf32> to vector<8x32xbf16>
    %cst_32 = arith.constant dense<0.000000e+00> : vector<8x128xf32>
    %141 = tpu.matmul %140, %10, %cst_32 {dimension_numbers = #tpu.dot_dimension_numbers<[1], [0], [0], [1], [0, 0, 1, 1], [], []>} : vector<8x32xbf16>, vector<32x128xbf16>, vector<8x128xf32> -> vector<8x128xf32>
    %142 = arith.addf %139, %141 : vector<8x128xf32>
    %143 = vector.extract_strided_slice %142 {offsets = [0, 0], sizes = [8, 96], strides = [1, 1]} : vector<8x128xf32> to vector<8x96xf32>
    %144 = arith.negf %143 : vector<8x96xf32>
    %145 = math.exp %144 : vector<8x96xf32>
    %cst_33 = arith.constant 1.000000e+00 : f32
    %146 = vector.broadcast %cst_33 : f32 to vector<8x96xf32>
    %147 = arith.addf %146, %145 : vector<8x96xf32>
    %148 = arith.divf %146, %147 : vector<8x96xf32>
    %149 = vector.extract_strided_slice %142 {offsets = [0, 96], sizes = [8, 32], strides = [1, 1]} : vector<8x128xf32> to vector<8x32xf32>
    %150 = math.tanh %149 : vector<8x32xf32>
    %151 = vector.extract_strided_slice %148 {offsets = [0, 0], sizes = [8, 32], strides = [1, 1]} : vector<8x96xf32> to vector<8x32xf32>
    %152 = vector.extract_strided_slice %148 {offsets = [0, 32], sizes = [8, 32], strides = [1, 1]} : vector<8x96xf32> to vector<8x32xf32>
    %153 = vector.extract_strided_slice %148 {offsets = [0, 64], sizes = [8, 32], strides = [1, 1]} : vector<8x96xf32> to vector<8x32xf32>
    %154 = arith.mulf %152, %135 : vector<8x32xf32>
    %155 = arith.mulf %151, %150 : vector<8x32xf32>
    %156 = arith.addf %154, %155 : vector<8x32xf32>
    %157 = math.tanh %156 : vector<8x32xf32>
    %158 = arith.mulf %153, %157 : vector<8x32xf32>
    %c48 = arith.constant 48 : index
    %c0_34 = arith.constant 0 : index
    %159 = vector.load %arg14[%c48, %c0_34] : memref<64x32xf32, #tpu.memory_space<vmem>>, vector<8x32xf32>
    tpu.vector_store %arg14[%c48, %c0_34], %158 {strides = array<i32>} : memref<64x32xf32, #tpu.memory_space<vmem>>, vector<8x32xf32>,
    %160 = vector.extract_strided_slice %9 {offsets = [56, 0], sizes = [8, 128], strides = [1, 1]} : vector<64x128xf32> to vector<8x128xf32>
    %161 = arith.truncf %158 : vector<8x32xf32> to vector<8x32xbf16>
    %cst_35 = arith.constant dense<0.000000e+00> : vector<8x128xf32>
    %162 = tpu.matmul %161, %10, %cst_35 {dimension_numbers = #tpu.dot_dimension_numbers<[1], [0], [0], [1], [0, 0, 1, 1], [], []>} : vector<8x32xbf16>, vector<32x128xbf16>, vector<8x128xf32> -> vector<8x128xf32>
    %163 = arith.addf %160, %162 : vector<8x128xf32>
    %164 = vector.extract_strided_slice %163 {offsets = [0, 0], sizes = [8, 96], strides = [1, 1]} : vector<8x128xf32> to vector<8x96xf32>
    %165 = arith.negf %164 : vector<8x96xf32>
    %166 = math.exp %165 : vector<8x96xf32>
    %cst_36 = arith.constant 1.000000e+00 : f32
    %167 = vector.broadcast %cst_36 : f32 to vector<8x96xf32>
    %168 = arith.addf %167, %166 : vector<8x96xf32>
    %169 = arith.divf %167, %168 : vector<8x96xf32>
    %170 = vector.extract_strided_slice %163 {offsets = [0, 96], sizes = [8, 32], strides = [1, 1]} : vector<8x128xf32> to vector<8x32xf32>
    %171 = math.tanh %170 : vector<8x32xf32>
    %172 = vector.extract_strided_slice %169 {offsets = [0, 0], sizes = [8, 32], strides = [1, 1]} : vector<8x96xf32> to vector<8x32xf32>
    %173 = vector.extract_strided_slice %169 {offsets = [0, 32], sizes = [8, 32], strides = [1, 1]} : vector<8x96xf32> to vector<8x32xf32>
    %174 = vector.extract_strided_slice %169 {offsets = [0, 64], sizes = [8, 32], strides = [1, 1]} : vector<8x96xf32> to vector<8x32xf32>
    %175 = arith.mulf %173, %156 : vector<8x32xf32>
    %176 = arith.mulf %172, %171 : vector<8x32xf32>
    %177 = arith.addf %175, %176 : vector<8x32xf32>
    %178 = math.tanh %177 : vector<8x32xf32>
    %179 = arith.mulf %174, %178 : vector<8x32xf32>
    %c56 = arith.constant 56 : index
    %c0_37 = arith.constant 0 : index
    %180 = vector.load %arg14[%c56, %c0_37] : memref<64x32xf32, #tpu.memory_space<vmem>>, vector<8x32xf32>
    tpu.vector_store %arg14[%c56, %c0_37], %179 {strides = array<i32>} : memref<64x32xf32, #tpu.memory_space<vmem>>, vector<8x32xf32>,
    %c0_38 = arith.constant 0 : index
    %c0_39 = arith.constant 0 : index
    %181 = vector.load %arg14[%c0_38, %c0_39] : memref<64x32xf32, #tpu.memory_space<vmem>>, vector<64x32xf32>
    %cst_40 = arith.constant 0.000000e+00 : f32
    %182 = vector.broadcast %cst_40 : f32 to vector<64x32xf32>
    %183 = arith.maximumf %181, %182 : vector<64x32xf32>
    %184 = vector.broadcast %cst_40 : f32 to vector<64x32xf32>
    %185 = arith.subf %181, %184 : vector<64x32xf32>
    %186 = arith.cmpf one, %185, %185 : vector<64x32xf32>
    %187 = vector.broadcast %cst_40 : f32 to vector<64x32xf32>
    %188 = arith.addf %181, %187 : vector<64x32xf32>
    %189 = math.absf %185 : vector<64x32xf32>
    %cst_41 = arith.constant 0.000000e+00 : f32
    %190 = vector.broadcast %cst_41 : f32 to vector<64x32xf32>
    %191 = arith.subf %190, %189 : vector<64x32xf32>
    %192 = math.exp %191 : vector<64x32xf32>
    %193 = math.log1p %192 : vector<64x32xf32>
    %194 = arith.addf %183, %193 : vector<64x32xf32>
    %195 = arith.select %186, %188, %194 : vector<64x32xi1>, vector<64x32xf32>
    %196 = arith.truncf %195 : vector<64x32xf32> to vector<64x32xbf16>
    %c0_42 = arith.constant 0 : index
    %c0_43 = arith.constant 0 : index
    %197 = vector.load %arg6[%c0_42, %c0_43] : memref<32x32xbf16, #tpu.memory_space<vmem>>, vector<32x32xbf16>
    %cst_44 = arith.constant dense<0.000000e+00> : vector<64x32xf32>
    %198 = tpu.matmul %196, %197, %cst_44 {dimension_numbers = #tpu.dot_dimension_numbers<[1], [0], [0], [1], [0, 0, 1, 1], [], []>} : vector<64x32xbf16>, vector<32x32xbf16>, vector<64x32xf32> -> vector<64x32xf32>
    %c0_45 = arith.constant 0 : index
    %c0_46 = arith.constant 0 : index
    %199 = vector.load %arg7[%c0_45, %c0_46] : memref<1x32xf32, #tpu.memory_space<vmem>>, vector<1x32xf32>
    %200 = vector.broadcast %199 : vector<1x32xf32> to vector<64x32xf32>
    %201 = arith.addf %198, %200 : vector<64x32xf32>
    %202 = vector.extract_strided_slice %201 {offsets = [0, 0], sizes = [64, 16], strides = [1, 1]} : vector<64x32xf32> to vector<64x16xf32>
    %203 = vector.extract_strided_slice %201 {offsets = [0, 16], sizes = [64, 16], strides = [1, 1]} : vector<64x32xf32> to vector<64x16xf32>
    %cst_47 = arith.constant 5.000000e-01 : f32
    %204 = vector.broadcast %cst_47 : f32 to vector<64x16xf32>
    %205 = arith.mulf %204, %203 : vector<64x16xf32>
    %206 = math.exp %205 : vector<64x16xf32>
    %207 = arith.mulf %3, %206 : vector<64x16xf32>
    %208 = arith.addf %202, %207 : vector<64x16xf32>
    %cst_48 = arith.constant 1.000000e+00 : f32
    %209 = vector.broadcast %cst_48 : f32 to vector<64x16xf32>
    %210 = arith.addf %209, %203 : vector<64x16xf32>
    %211 = math.exp %203 : vector<64x16xf32>
    %212 = arith.subf %210, %211 : vector<64x16xf32>
    %213 = arith.mulf %202, %202 : vector<64x16xf32>
    %214 = arith.subf %212, %213 : vector<64x16xf32>
    %cst_49 = arith.constant dense<0.000000e+00> : vector<64xf32>
    %215 = vector.multi_reduction <add>, %214, %cst_49 [1] : vector<64x16xf32> to vector<64xf32>
    %216 = vector.shape_cast %215 : vector<64xf32> to vector<64x1xf32>
    %cst_50 = arith.constant -5.000000e-01 : f32
    %217 = vector.broadcast %cst_50 : f32 to vector<64x1xf32>
    %218 = arith.mulf %217, %216 : vector<64x1xf32>
    %219 = arith.truncf %208 : vector<64x16xf32> to vector<64x16xbf16>
    %c0_51 = arith.constant 0 : index
    %c0_52 = arith.constant 0 : index
    %220 = vector.load %arg8[%c0_51, %c0_52] : memref<16x128xbf16, #tpu.memory_space<vmem>>, vector<16x128xbf16>
    %cst_53 = arith.constant dense<0.000000e+00> : vector<64x128xf32>
    %221 = tpu.matmul %219, %220, %cst_53 {dimension_numbers = #tpu.dot_dimension_numbers<[1], [0], [0], [1], [0, 0, 1, 1], [], []>} : vector<64x16xbf16>, vector<16x128xbf16>, vector<64x128xf32> -> vector<64x128xf32>
    %c0_54 = arith.constant 0 : index
    %c0_55 = arith.constant 0 : index
    %222 = vector.load %arg10[%c0_54, %c0_55] : memref<1x128xf32, #tpu.memory_space<vmem>>, vector<1x128xf32>
    %223 = vector.broadcast %222 : vector<1x128xf32> to vector<64x128xf32>
    %224 = arith.addf %221, %223 : vector<64x128xf32>
    %c0_56 = arith.constant 0 : index
    %c0_57 = arith.constant 0 : index
    %225 = vector.load %arg9[%c0_56, %c0_57] : memref<32x128xbf16, #tpu.memory_space<vmem>>, vector<32x128xbf16>
    %cst_58 = arith.constant 0.000000e+00 : f32
    %226 = vector.broadcast %cst_58 : f32 to vector<8x32xf32>
    %cst_59 = arith.constant 0.000000e+00 : f32
    %227 = vector.broadcast %cst_59 : f32 to vector<8x32xf32>
    %228 = vector.extract_strided_slice %224 {offsets = [0, 0], sizes = [8, 128], strides = [1, 1]} : vector<64x128xf32> to vector<8x128xf32>
    %229 = arith.truncf %226 : vector<8x32xf32> to vector<8x32xbf16>
    %cst_60 = arith.constant dense<0.000000e+00> : vector<8x128xf32>
    %230 = tpu.matmul %229, %225, %cst_60 {dimension_numbers = #tpu.dot_dimension_numbers<[1], [0], [0], [1], [0, 0, 1, 1], [], []>} : vector<8x32xbf16>, vector<32x128xbf16>, vector<8x128xf32> -> vector<8x128xf32>
    %231 = arith.addf %228, %230 : vector<8x128xf32>
    %232 = vector.extract_strided_slice %231 {offsets = [0, 0], sizes = [8, 96], strides = [1, 1]} : vector<8x128xf32> to vector<8x96xf32>
    %233 = arith.negf %232 : vector<8x96xf32>
    %234 = math.exp %233 : vector<8x96xf32>
    %cst_61 = arith.constant 1.000000e+00 : f32
    %235 = vector.broadcast %cst_61 : f32 to vector<8x96xf32>
    %236 = arith.addf %235, %234 : vector<8x96xf32>
    %237 = arith.divf %235, %236 : vector<8x96xf32>
    %238 = vector.extract_strided_slice %231 {offsets = [0, 96], sizes = [8, 32], strides = [1, 1]} : vector<8x128xf32> to vector<8x32xf32>
    %239 = math.tanh %238 : vector<8x32xf32>
    %240 = vector.extract_strided_slice %237 {offsets = [0, 0], sizes = [8, 32], strides = [1, 1]} : vector<8x96xf32> to vector<8x32xf32>
    %241 = vector.extract_strided_slice %237 {offsets = [0, 32], sizes = [8, 32], strides = [1, 1]} : vector<8x96xf32> to vector<8x32xf32>
    %242 = vector.extract_strided_slice %237 {offsets = [0, 64], sizes = [8, 32], strides = [1, 1]} : vector<8x96xf32> to vector<8x32xf32>
    %243 = arith.mulf %241, %227 : vector<8x32xf32>
    %244 = arith.mulf %240, %239 : vector<8x32xf32>
    %245 = arith.addf %243, %244 : vector<8x32xf32>
    %246 = math.tanh %245 : vector<8x32xf32>
    %247 = arith.mulf %242, %246 : vector<8x32xf32>
    %c0_62 = arith.constant 0 : index
    %c0_63 = arith.constant 0 : index
    %248 = vector.load %arg14[%c0_62, %c0_63] : memref<64x32xf32, #tpu.memory_space<vmem>>, vector<8x32xf32>
    tpu.vector_store %arg14[%c0_62, %c0_63], %247 {strides = array<i32>} : memref<64x32xf32, #tpu.memory_space<vmem>>, vector<8x32xf32>,
    %249 = vector.extract_strided_slice %224 {offsets = [8, 0], sizes = [8, 128], strides = [1, 1]} : vector<64x128xf32> to vector<8x128xf32>
    %250 = arith.truncf %247 : vector<8x32xf32> to vector<8x32xbf16>
    %cst_64 = arith.constant dense<0.000000e+00> : vector<8x128xf32>
    %251 = tpu.matmul %250, %225, %cst_64 {dimension_numbers = #tpu.dot_dimension_numbers<[1], [0], [0], [1], [0, 0, 1, 1], [], []>} : vector<8x32xbf16>, vector<32x128xbf16>, vector<8x128xf32> -> vector<8x128xf32>
    %252 = arith.addf %249, %251 : vector<8x128xf32>
    %253 = vector.extract_strided_slice %252 {offsets = [0, 0], sizes = [8, 96], strides = [1, 1]} : vector<8x128xf32> to vector<8x96xf32>
    %254 = arith.negf %253 : vector<8x96xf32>
    %255 = math.exp %254 : vector<8x96xf32>
    %cst_65 = arith.constant 1.000000e+00 : f32
    %256 = vector.broadcast %cst_65 : f32 to vector<8x96xf32>
    %257 = arith.addf %256, %255 : vector<8x96xf32>
    %258 = arith.divf %256, %257 : vector<8x96xf32>
    %259 = vector.extract_strided_slice %252 {offsets = [0, 96], sizes = [8, 32], strides = [1, 1]} : vector<8x128xf32> to vector<8x32xf32>
    %260 = math.tanh %259 : vector<8x32xf32>
    %261 = vector.extract_strided_slice %258 {offsets = [0, 0], sizes = [8, 32], strides = [1, 1]} : vector<8x96xf32> to vector<8x32xf32>
    %262 = vector.extract_strided_slice %258 {offsets = [0, 32], sizes = [8, 32], strides = [1, 1]} : vector<8x96xf32> to vector<8x32xf32>
    %263 = vector.extract_strided_slice %258 {offsets = [0, 64], sizes = [8, 32], strides = [1, 1]} : vector<8x96xf32> to vector<8x32xf32>
    %264 = arith.mulf %262, %245 : vector<8x32xf32>
    %265 = arith.mulf %261, %260 : vector<8x32xf32>
    %266 = arith.addf %264, %265 : vector<8x32xf32>
    %267 = math.tanh %266 : vector<8x32xf32>
    %268 = arith.mulf %263, %267 : vector<8x32xf32>
    %c8_66 = arith.constant 8 : index
    %c0_67 = arith.constant 0 : index
    %269 = vector.load %arg14[%c8_66, %c0_67] : memref<64x32xf32, #tpu.memory_space<vmem>>, vector<8x32xf32>
    tpu.vector_store %arg14[%c8_66, %c0_67], %268 {strides = array<i32>} : memref<64x32xf32, #tpu.memory_space<vmem>>, vector<8x32xf32>,
    %270 = vector.extract_strided_slice %224 {offsets = [16, 0], sizes = [8, 128], strides = [1, 1]} : vector<64x128xf32> to vector<8x128xf32>
    %271 = arith.truncf %268 : vector<8x32xf32> to vector<8x32xbf16>
    %cst_68 = arith.constant dense<0.000000e+00> : vector<8x128xf32>
    %272 = tpu.matmul %271, %225, %cst_68 {dimension_numbers = #tpu.dot_dimension_numbers<[1], [0], [0], [1], [0, 0, 1, 1], [], []>} : vector<8x32xbf16>, vector<32x128xbf16>, vector<8x128xf32> -> vector<8x128xf32>
    %273 = arith.addf %270, %272 : vector<8x128xf32>
    %274 = vector.extract_strided_slice %273 {offsets = [0, 0], sizes = [8, 96], strides = [1, 1]} : vector<8x128xf32> to vector<8x96xf32>
    %275 = arith.negf %274 : vector<8x96xf32>
    %276 = math.exp %275 : vector<8x96xf32>
    %cst_69 = arith.constant 1.000000e+00 : f32
    %277 = vector.broadcast %cst_69 : f32 to vector<8x96xf32>
    %278 = arith.addf %277, %276 : vector<8x96xf32>
    %279 = arith.divf %277, %278 : vector<8x96xf32>
    %280 = vector.extract_strided_slice %273 {offsets = [0, 96], sizes = [8, 32], strides = [1, 1]} : vector<8x128xf32> to vector<8x32xf32>
    %281 = math.tanh %280 : vector<8x32xf32>
    %282 = vector.extract_strided_slice %279 {offsets = [0, 0], sizes = [8, 32], strides = [1, 1]} : vector<8x96xf32> to vector<8x32xf32>
    %283 = vector.extract_strided_slice %279 {offsets = [0, 32], sizes = [8, 32], strides = [1, 1]} : vector<8x96xf32> to vector<8x32xf32>
    %284 = vector.extract_strided_slice %279 {offsets = [0, 64], sizes = [8, 32], strides = [1, 1]} : vector<8x96xf32> to vector<8x32xf32>
    %285 = arith.mulf %283, %266 : vector<8x32xf32>
    %286 = arith.mulf %282, %281 : vector<8x32xf32>
    %287 = arith.addf %285, %286 : vector<8x32xf32>
    %288 = math.tanh %287 : vector<8x32xf32>
    %289 = arith.mulf %284, %288 : vector<8x32xf32>
    %c16_70 = arith.constant 16 : index
    %c0_71 = arith.constant 0 : index
    %290 = vector.load %arg14[%c16_70, %c0_71] : memref<64x32xf32, #tpu.memory_space<vmem>>, vector<8x32xf32>
    tpu.vector_store %arg14[%c16_70, %c0_71], %289 {strides = array<i32>} : memref<64x32xf32, #tpu.memory_space<vmem>>, vector<8x32xf32>,
    %291 = vector.extract_strided_slice %224 {offsets = [24, 0], sizes = [8, 128], strides = [1, 1]} : vector<64x128xf32> to vector<8x128xf32>
    %292 = arith.truncf %289 : vector<8x32xf32> to vector<8x32xbf16>
    %cst_72 = arith.constant dense<0.000000e+00> : vector<8x128xf32>
    %293 = tpu.matmul %292, %225, %cst_72 {dimension_numbers = #tpu.dot_dimension_numbers<[1], [0], [0], [1], [0, 0, 1, 1], [], []>} : vector<8x32xbf16>, vector<32x128xbf16>, vector<8x128xf32> -> vector<8x128xf32>
    %294 = arith.addf %291, %293 : vector<8x128xf32>
    %295 = vector.extract_strided_slice %294 {offsets = [0, 0], sizes = [8, 96], strides = [1, 1]} : vector<8x128xf32> to vector<8x96xf32>
    %296 = arith.negf %295 : vector<8x96xf32>
    %297 = math.exp %296 : vector<8x96xf32>
    %cst_73 = arith.constant 1.000000e+00 : f32
    %298 = vector.broadcast %cst_73 : f32 to vector<8x96xf32>
    %299 = arith.addf %298, %297 : vector<8x96xf32>
    %300 = arith.divf %298, %299 : vector<8x96xf32>
    %301 = vector.extract_strided_slice %294 {offsets = [0, 96], sizes = [8, 32], strides = [1, 1]} : vector<8x128xf32> to vector<8x32xf32>
    %302 = math.tanh %301 : vector<8x32xf32>
    %303 = vector.extract_strided_slice %300 {offsets = [0, 0], sizes = [8, 32], strides = [1, 1]} : vector<8x96xf32> to vector<8x32xf32>
    %304 = vector.extract_strided_slice %300 {offsets = [0, 32], sizes = [8, 32], strides = [1, 1]} : vector<8x96xf32> to vector<8x32xf32>
    %305 = vector.extract_strided_slice %300 {offsets = [0, 64], sizes = [8, 32], strides = [1, 1]} : vector<8x96xf32> to vector<8x32xf32>
    %306 = arith.mulf %304, %287 : vector<8x32xf32>
    %307 = arith.mulf %303, %302 : vector<8x32xf32>
    %308 = arith.addf %306, %307 : vector<8x32xf32>
    %309 = math.tanh %308 : vector<8x32xf32>
    %310 = arith.mulf %305, %309 : vector<8x32xf32>
    %c24_74 = arith.constant 24 : index
    %c0_75 = arith.constant 0 : index
    %311 = vector.load %arg14[%c24_74, %c0_75] : memref<64x32xf32, #tpu.memory_space<vmem>>, vector<8x32xf32>
    tpu.vector_store %arg14[%c24_74, %c0_75], %310 {strides = array<i32>} : memref<64x32xf32, #tpu.memory_space<vmem>>, vector<8x32xf32>,
    %312 = vector.extract_strided_slice %224 {offsets = [32, 0], sizes = [8, 128], strides = [1, 1]} : vector<64x128xf32> to vector<8x128xf32>
    %313 = arith.truncf %310 : vector<8x32xf32> to vector<8x32xbf16>
    %cst_76 = arith.constant dense<0.000000e+00> : vector<8x128xf32>
    %314 = tpu.matmul %313, %225, %cst_76 {dimension_numbers = #tpu.dot_dimension_numbers<[1], [0], [0], [1], [0, 0, 1, 1], [], []>} : vector<8x32xbf16>, vector<32x128xbf16>, vector<8x128xf32> -> vector<8x128xf32>
    %315 = arith.addf %312, %314 : vector<8x128xf32>
    %316 = vector.extract_strided_slice %315 {offsets = [0, 0], sizes = [8, 96], strides = [1, 1]} : vector<8x128xf32> to vector<8x96xf32>
    %317 = arith.negf %316 : vector<8x96xf32>
    %318 = math.exp %317 : vector<8x96xf32>
    %cst_77 = arith.constant 1.000000e+00 : f32
    %319 = vector.broadcast %cst_77 : f32 to vector<8x96xf32>
    %320 = arith.addf %319, %318 : vector<8x96xf32>
    %321 = arith.divf %319, %320 : vector<8x96xf32>
    %322 = vector.extract_strided_slice %315 {offsets = [0, 96], sizes = [8, 32], strides = [1, 1]} : vector<8x128xf32> to vector<8x32xf32>
    %323 = math.tanh %322 : vector<8x32xf32>
    %324 = vector.extract_strided_slice %321 {offsets = [0, 0], sizes = [8, 32], strides = [1, 1]} : vector<8x96xf32> to vector<8x32xf32>
    %325 = vector.extract_strided_slice %321 {offsets = [0, 32], sizes = [8, 32], strides = [1, 1]} : vector<8x96xf32> to vector<8x32xf32>
    %326 = vector.extract_strided_slice %321 {offsets = [0, 64], sizes = [8, 32], strides = [1, 1]} : vector<8x96xf32> to vector<8x32xf32>
    %327 = arith.mulf %325, %308 : vector<8x32xf32>
    %328 = arith.mulf %324, %323 : vector<8x32xf32>
    %329 = arith.addf %327, %328 : vector<8x32xf32>
    %330 = math.tanh %329 : vector<8x32xf32>
    %331 = arith.mulf %326, %330 : vector<8x32xf32>
    %c32_78 = arith.constant 32 : index
    %c0_79 = arith.constant 0 : index
    %332 = vector.load %arg14[%c32_78, %c0_79] : memref<64x32xf32, #tpu.memory_space<vmem>>, vector<8x32xf32>
    tpu.vector_store %arg14[%c32_78, %c0_79], %331 {strides = array<i32>} : memref<64x32xf32, #tpu.memory_space<vmem>>, vector<8x32xf32>,
    %333 = vector.extract_strided_slice %224 {offsets = [40, 0], sizes = [8, 128], strides = [1, 1]} : vector<64x128xf32> to vector<8x128xf32>
    %334 = arith.truncf %331 : vector<8x32xf32> to vector<8x32xbf16>
    %cst_80 = arith.constant dense<0.000000e+00> : vector<8x128xf32>
    %335 = tpu.matmul %334, %225, %cst_80 {dimension_numbers = #tpu.dot_dimension_numbers<[1], [0], [0], [1], [0, 0, 1, 1], [], []>} : vector<8x32xbf16>, vector<32x128xbf16>, vector<8x128xf32> -> vector<8x128xf32>
    %336 = arith.addf %333, %335 : vector<8x128xf32>
    %337 = vector.extract_strided_slice %336 {offsets = [0, 0], sizes = [8, 96], strides = [1, 1]} : vector<8x128xf32> to vector<8x96xf32>
    %338 = arith.negf %337 : vector<8x96xf32>
    %339 = math.exp %338 : vector<8x96xf32>
    %cst_81 = arith.constant 1.000000e+00 : f32
    %340 = vector.broadcast %cst_81 : f32 to vector<8x96xf32>
    %341 = arith.addf %340, %339 : vector<8x96xf32>
    %342 = arith.divf %340, %341 : vector<8x96xf32>
    %343 = vector.extract_strided_slice %336 {offsets = [0, 96], sizes = [8, 32], strides = [1, 1]} : vector<8x128xf32> to vector<8x32xf32>
    %344 = math.tanh %343 : vector<8x32xf32>
    %345 = vector.extract_strided_slice %342 {offsets = [0, 0], sizes = [8, 32], strides = [1, 1]} : vector<8x96xf32> to vector<8x32xf32>
    %346 = vector.extract_strided_slice %342 {offsets = [0, 32], sizes = [8, 32], strides = [1, 1]} : vector<8x96xf32> to vector<8x32xf32>
    %347 = vector.extract_strided_slice %342 {offsets = [0, 64], sizes = [8, 32], strides = [1, 1]} : vector<8x96xf32> to vector<8x32xf32>
    %348 = arith.mulf %346, %329 : vector<8x32xf32>
    %349 = arith.mulf %345, %344 : vector<8x32xf32>
    %350 = arith.addf %348, %349 : vector<8x32xf32>
    %351 = math.tanh %350 : vector<8x32xf32>
    %352 = arith.mulf %347, %351 : vector<8x32xf32>
    %c40_82 = arith.constant 40 : index
    %c0_83 = arith.constant 0 : index
    %353 = vector.load %arg14[%c40_82, %c0_83] : memref<64x32xf32, #tpu.memory_space<vmem>>, vector<8x32xf32>
    tpu.vector_store %arg14[%c40_82, %c0_83], %352 {strides = array<i32>} : memref<64x32xf32, #tpu.memory_space<vmem>>, vector<8x32xf32>,
    %354 = vector.extract_strided_slice %224 {offsets = [48, 0], sizes = [8, 128], strides = [1, 1]} : vector<64x128xf32> to vector<8x128xf32>
    %355 = arith.truncf %352 : vector<8x32xf32> to vector<8x32xbf16>
    %cst_84 = arith.constant dense<0.000000e+00> : vector<8x128xf32>
    %356 = tpu.matmul %355, %225, %cst_84 {dimension_numbers = #tpu.dot_dimension_numbers<[1], [0], [0], [1], [0, 0, 1, 1], [], []>} : vector<8x32xbf16>, vector<32x128xbf16>, vector<8x128xf32> -> vector<8x128xf32>
    %357 = arith.addf %354, %356 : vector<8x128xf32>
    %358 = vector.extract_strided_slice %357 {offsets = [0, 0], sizes = [8, 96], strides = [1, 1]} : vector<8x128xf32> to vector<8x96xf32>
    %359 = arith.negf %358 : vector<8x96xf32>
    %360 = math.exp %359 : vector<8x96xf32>
    %cst_85 = arith.constant 1.000000e+00 : f32
    %361 = vector.broadcast %cst_85 : f32 to vector<8x96xf32>
    %362 = arith.addf %361, %360 : vector<8x96xf32>
    %363 = arith.divf %361, %362 : vector<8x96xf32>
    %364 = vector.extract_strided_slice %357 {offsets = [0, 96], sizes = [8, 32], strides = [1, 1]} : vector<8x128xf32> to vector<8x32xf32>
    %365 = math.tanh %364 : vector<8x32xf32>
    %366 = vector.extract_strided_slice %363 {offsets = [0, 0], sizes = [8, 32], strides = [1, 1]} : vector<8x96xf32> to vector<8x32xf32>
    %367 = vector.extract_strided_slice %363 {offsets = [0, 32], sizes = [8, 32], strides = [1, 1]} : vector<8x96xf32> to vector<8x32xf32>
    %368 = vector.extract_strided_slice %363 {offsets = [0, 64], sizes = [8, 32], strides = [1, 1]} : vector<8x96xf32> to vector<8x32xf32>
    %369 = arith.mulf %367, %350 : vector<8x32xf32>
    %370 = arith.mulf %366, %365 : vector<8x32xf32>
    %371 = arith.addf %369, %370 : vector<8x32xf32>
    %372 = math.tanh %371 : vector<8x32xf32>
    %373 = arith.mulf %368, %372 : vector<8x32xf32>
    %c48_86 = arith.constant 48 : index
    %c0_87 = arith.constant 0 : index
    %374 = vector.load %arg14[%c48_86, %c0_87] : memref<64x32xf32, #tpu.memory_space<vmem>>, vector<8x32xf32>
    tpu.vector_store %arg14[%c48_86, %c0_87], %373 {strides = array<i32>} : memref<64x32xf32, #tpu.memory_space<vmem>>, vector<8x32xf32>,
    %375 = vector.extract_strided_slice %224 {offsets = [56, 0], sizes = [8, 128], strides = [1, 1]} : vector<64x128xf32> to vector<8x128xf32>
    %376 = arith.truncf %373 : vector<8x32xf32> to vector<8x32xbf16>
    %cst_88 = arith.constant dense<0.000000e+00> : vector<8x128xf32>
    %377 = tpu.matmul %376, %225, %cst_88 {dimension_numbers = #tpu.dot_dimension_numbers<[1], [0], [0], [1], [0, 0, 1, 1], [], []>} : vector<8x32xbf16>, vector<32x128xbf16>, vector<8x128xf32> -> vector<8x128xf32>
    %378 = arith.addf %375, %377 : vector<8x128xf32>
    %379 = vector.extract_strided_slice %378 {offsets = [0, 0], sizes = [8, 96], strides = [1, 1]} : vector<8x128xf32> to vector<8x96xf32>
    %380 = arith.negf %379 : vector<8x96xf32>
    %381 = math.exp %380 : vector<8x96xf32>
    %cst_89 = arith.constant 1.000000e+00 : f32
    %382 = vector.broadcast %cst_89 : f32 to vector<8x96xf32>
    %383 = arith.addf %382, %381 : vector<8x96xf32>
    %384 = arith.divf %382, %383 : vector<8x96xf32>
    %385 = vector.extract_strided_slice %378 {offsets = [0, 96], sizes = [8, 32], strides = [1, 1]} : vector<8x128xf32> to vector<8x32xf32>
    %386 = math.tanh %385 : vector<8x32xf32>
    %387 = vector.extract_strided_slice %384 {offsets = [0, 0], sizes = [8, 32], strides = [1, 1]} : vector<8x96xf32> to vector<8x32xf32>
    %388 = vector.extract_strided_slice %384 {offsets = [0, 32], sizes = [8, 32], strides = [1, 1]} : vector<8x96xf32> to vector<8x32xf32>
    %389 = vector.extract_strided_slice %384 {offsets = [0, 64], sizes = [8, 32], strides = [1, 1]} : vector<8x96xf32> to vector<8x32xf32>
    %390 = arith.mulf %388, %371 : vector<8x32xf32>
    %391 = arith.mulf %387, %386 : vector<8x32xf32>
    %392 = arith.addf %390, %391 : vector<8x32xf32>
    %393 = math.tanh %392 : vector<8x32xf32>
    %394 = arith.mulf %389, %393 : vector<8x32xf32>
    %c56_90 = arith.constant 56 : index
    %c0_91 = arith.constant 0 : index
    %395 = vector.load %arg14[%c56_90, %c0_91] : memref<64x32xf32, #tpu.memory_space<vmem>>, vector<8x32xf32>
    tpu.vector_store %arg14[%c56_90, %c0_91], %394 {strides = array<i32>} : memref<64x32xf32, #tpu.memory_space<vmem>>, vector<8x32xf32>,
    %c0_92 = arith.constant 0 : index
    %c0_93 = arith.constant 0 : index
    %396 = vector.load %arg14[%c0_92, %c0_93] : memref<64x32xf32, #tpu.memory_space<vmem>>, vector<64x32xf32>
    %cst_94 = arith.constant 0.000000e+00 : f32
    %397 = vector.broadcast %cst_94 : f32 to vector<64x32xf32>
    %398 = arith.maximumf %396, %397 : vector<64x32xf32>
    %399 = vector.broadcast %cst_94 : f32 to vector<64x32xf32>
    %400 = arith.subf %396, %399 : vector<64x32xf32>
    %401 = arith.cmpf one, %400, %400 : vector<64x32xf32>
    %402 = vector.broadcast %cst_94 : f32 to vector<64x32xf32>
    %403 = arith.addf %396, %402 : vector<64x32xf32>
    %404 = math.absf %400 : vector<64x32xf32>
    %cst_95 = arith.constant 0.000000e+00 : f32
    %405 = vector.broadcast %cst_95 : f32 to vector<64x32xf32>
    %406 = arith.subf %405, %404 : vector<64x32xf32>
    %407 = math.exp %406 : vector<64x32xf32>
    %408 = math.log1p %407 : vector<64x32xf32>
    %409 = arith.addf %398, %408 : vector<64x32xf32>
    %410 = arith.select %401, %403, %409 : vector<64x32xi1>, vector<64x32xf32>
    %411 = arith.truncf %410 : vector<64x32xf32> to vector<64x32xbf16>
    %c0_96 = arith.constant 0 : index
    %c0_97 = arith.constant 0 : index
    %412 = vector.load %arg11[%c0_96, %c0_97] : memref<32x8xbf16, #tpu.memory_space<vmem>>, vector<32x8xbf16>
    %cst_98 = arith.constant dense<0.000000e+00> : vector<64x8xf32>
    %413 = tpu.matmul %411, %412, %cst_98 {dimension_numbers = #tpu.dot_dimension_numbers<[1], [0], [0], [1], [0, 0, 1, 1], [], []>} : vector<64x32xbf16>, vector<32x8xbf16>, vector<64x8xf32> -> vector<64x8xf32>
    %c0_99 = arith.constant 0 : index
    %c0_100 = arith.constant 0 : index
    %414 = vector.load %arg12[%c0_99, %c0_100] : memref<1x8xf32, #tpu.memory_space<vmem>>, vector<1x8xf32>
    %415 = vector.broadcast %414 : vector<1x8xf32> to vector<64x8xf32>
    %416 = arith.addf %413, %415 : vector<64x8xf32>
    %417 = vector.extract_strided_slice %416 {offsets = [0, 0], sizes = [64, 4], strides = [1, 1]} : vector<64x8xf32> to vector<64x4xf32>
    %418 = vector.extract_strided_slice %416 {offsets = [0, 4], sizes = [64, 4], strides = [1, 1]} : vector<64x8xf32> to vector<64x4xf32>
    %419 = math.tanh %418 : vector<64x4xf32>
    %420 = math.absf %419 : vector<64x4xf32>
    %421 = arith.subf %1, %417 : vector<64x4xf32>
    %422 = arith.divf %421, %420 : vector<64x4xf32>
    %423 = arith.mulf %422, %422 : vector<64x4xf32>
    %cst_101 = arith.constant 5.000000e-01 : f32
    %424 = vector.broadcast %cst_101 : f32 to vector<64x4xf32>
    %425 = arith.mulf %424, %423 : vector<64x4xf32>
    %426 = math.log %420 : vector<64x4xf32>
    %427 = arith.addf %425, %426 : vector<64x4xf32>
    %cst_102 = arith.constant 0.918938517 : f32
    %428 = vector.broadcast %cst_102 : f32 to vector<64x4xf32>
    %429 = arith.addf %427, %428 : vector<64x4xf32>
    %430 = tpu.concatenate %417, %419, %429, %218 in 1 : vector<64x4xf32>, vector<64x4xf32>, vector<64x4xf32>, vector<64x1xf32> -> vector<64x13xf32>
    %431 = vector.shape_cast %430 : vector<64x13xf32> to vector<8x8x13xf32>
    %c0_103 = arith.constant 0 : index
    %c0_104 = arith.constant 0 : index
    %c0_105 = arith.constant 0 : index
    %432 = vector.load %arg13[%c0_103, %c0_104, %c0_105] : memref<8x8x13xf32, #tpu.memory_space<vmem>>, vector<8x8x13xf32>
    tpu.vector_store %arg13[%c0_103, %c0_104, %c0_105], %431 {strides = array<i32>} : memref<8x8x13xf32, #tpu.memory_space<vmem>>, vector<8x8x13xf32>,
    return
  }
  func.func @transform_0(%arg0: i32) -> (i32, i32, i32) {
    %c0_i32 = arith.constant 0 : i32
    %c0_i32_0 = arith.constant 0 : i32
    %c0_i32_1 = arith.constant 0 : i32
    return %c0_i32, %arg0, %c0_i32_0 : i32, i32, i32
  }
  func.func @transform_1(%arg0: i32) -> (i32, i32, i32) {
    %c0_i32 = arith.constant 0 : i32
    %c0_i32_0 = arith.constant 0 : i32
    %c0_i32_1 = arith.constant 0 : i32
    return %c0_i32, %arg0, %c0_i32_0 : i32, i32, i32
  }
  func.func @transform_2(%arg0: i32) -> (i32, i32) {
    %c0_i32 = arith.constant 0 : i32
    %c0_i32_0 = arith.constant 0 : i32
    %c0_i32_1 = arith.constant 0 : i32
    return %c0_i32, %c0_i32_0 : i32, i32
  }
  func.func @transform_3(%arg0: i32) -> (i32, i32) {
    %c0_i32 = arith.constant 0 : i32
    %c0_i32_0 = arith.constant 0 : i32
    %c0_i32_1 = arith.constant 0 : i32
    return %c0_i32, %c0_i32_0 : i32, i32
  }
  func.func @transform_4(%arg0: i32) -> (i32, i32) {
    %c0_i32 = arith.constant 0 : i32
    %c0_i32_0 = arith.constant 0 : i32
    %c0_i32_1 = arith.constant 0 : i32
    return %c0_i32, %c0_i32_0 : i32, i32
  }
  func.func @transform_5(%arg0: i32) -> (i32, i32) {
    %c0_i32 = arith.constant 0 : i32
    %c0_i32_0 = arith.constant 0 : i32
    %c0_i32_1 = arith.constant 0 : i32
    return %c0_i32, %c0_i32_0 : i32, i32
  }
  func.func @transform_6(%arg0: i32) -> (i32, i32) {
    %c0_i32 = arith.constant 0 : i32
    %c0_i32_0 = arith.constant 0 : i32
    %c0_i32_1 = arith.constant 0 : i32
    return %c0_i32, %c0_i32_0 : i32, i32
  }
  func.func @transform_7(%arg0: i32) -> (i32, i32) {
    %c0_i32 = arith.constant 0 : i32
    %c0_i32_0 = arith.constant 0 : i32
    %c0_i32_1 = arith.constant 0 : i32
    return %c0_i32, %c0_i32_0 : i32, i32
  }
  func.func @transform_8(%arg0: i32) -> (i32, i32) {
    %c0_i32 = arith.constant 0 : i32
    %c0_i32_0 = arith.constant 0 : i32
    %c0_i32_1 = arith.constant 0 : i32
    return %c0_i32, %c0_i32_0 : i32, i32
  }
  func.func @transform_9(%arg0: i32) -> (i32, i32) {
    %c0_i32 = arith.constant 0 : i32
    %c0_i32_0 = arith.constant 0 : i32
    %c0_i32_1 = arith.constant 0 : i32
    return %c0_i32, %c0_i32_0 : i32, i32
  }
  func.func @transform_10(%arg0: i32) -> (i32, i32) {
    %c0_i32 = arith.constant 0 : i32
    %c0_i32_0 = arith.constant 0 : i32
    %c0_i32_1 = arith.constant 0 : i32
    return %c0_i32, %c0_i32_0 : i32, i32
  }
  func.func @transform_11(%arg0: i32) -> (i32, i32) {
    %c0_i32 = arith.constant 0 : i32
    %c0_i32_0 = arith.constant 0 : i32
    %c0_i32_1 = arith.constant 0 : i32
    return %c0_i32, %c0_i32_0 : i32, i32
  }
  func.func @transform_12(%arg0: i32) -> (i32, i32, i32) {
    %c0_i32 = arith.constant 0 : i32
    %c0_i32_0 = arith.constant 0 : i32
    %c0_i32_1 = arith.constant 0 : i32
    return %c0_i32, %arg0, %c0_i32_0 : i32, i32, i32
  }
}

</mosaic_0001>

<bundles_post_ra>
// kernel: lstm_vae_forward.1
= control target key start
LH: loop header
LB: loop body
LE: loop exit
PB: predicated region body
PF: predicated region fallthrough
CT: control target
= control target key end

     0   :  { %vm83_vm0 = vcmask 1041408   ;;  %vm70_vm1 = vcmask 31744   ;;  %v3057_v10 = vmov 0.0   ;;  %vm3058_vm2 = vmmov 0   ;;  %s3061_s25 = smov 64   ;;  %s3065_s21 = smov 8   ;;  %s3958_s2 = inlined_call_operand.vmem [shape: bf16[4,128], index: 2, kind: input, shape index: {}]   ;;  %s3959_s0 = inlined_call_operand.vmem [shape: f32[8,8,4], index: 0, kind: input, shape index: {}]   ;;  %s3960_s3 = inlined_call_operand.vmem [shape: bf16[32,128], index: 3, kind: input, shape index: {}]   ;;  %s3961_s4 = inlined_call_operand.vmem [shape: f32[1,128], index: 4, kind: input, shape index: {}]   ;;  %s3962_s5 = inlined_call_operand.vmem [shape: bf16[32,32], index: 5, kind: input, shape index: {}]   ;;  %s3963_s6 = inlined_call_operand.vmem [shape: f32[1,32], index: 6, kind: input, shape index: {}]   ;;  %s3964_s7 = inlined_call_operand.vmem [shape: bf16[16,128], index: 7, kind: input, shape index: {}]   ;;  %s3965_s8 = inlined_call_operand.vmem [shape: bf16[32,128], index: 8, kind: input, shape index: {}]   ;;  %s3966_s1 = inlined_call_operand.vmem [shape: f32[8,8,16], index: 1, kind: input, shape index: {}]   ;;  %s3967_s9 = inlined_call_operand.vmem [shape: f32[1,128], index: 9, kind: input, shape index: {}]   ;;  %s3968_s10 = inlined_call_operand.vmem [shape: bf16[32,8], index: 10, kind: input, shape index: {}]   ;;  %s3969_s11 = inlined_call_operand.vmem [shape: f32[1,8], index: 11, kind: input, shape index: {}]   ;;  %s3970_s12 = inlined_call_operand.vmem [shape: f32[8,8,13], index: 12, kind: output, shape index: {}]  }
   0x1   :  { %v62_v0 = vld [vmem:[%s3958_s2] sm:$0x3]  ;;  %v47_v2 = vld [vmem:[%s3959_s0 + $0x28] sm:$0xff]  ;;  %v48_v5 = vld [vmem:[%s3959_s0 + $0x30] sm:$0xff]  ;;  %v3059_v17 = vmov 0   ;;  %vm168_vm3 = vcmask 261120  }
   0x2   :  { %v46_v1 = vld [vmem:[%s3959_s0 + $0x20] sm:$0xff]  ;;  %2758 = vmatprep.subr.msk.bf16.mxu1 %vm83_vm0, %v62_v0  ;;  %v85_v3 = vsel %vm83_vm0, %v62_v0, 0  ;;  %2757 = vmatprep.subr.msk.bf16.mxu0 %vm83_vm0, %v62_v0  ;;  %v49_v6 = vld [vmem:[%s3959_s0 + $0x38] sm:$0xff]  ;;  %v43_v11 = vld [vmem:[%s3959_s0 + $0x8] sm:$0xff]  ;;  %vm1221_vm0 = vcmask 130048  }
   0x3   :  { %v60_v4 = vpack.c.bf16 %v47_v2, %v46_v1  ;;  %2756 = vmatpush3.bf16.msra.mxu1 %v85_v3  ;;  %2584 = vmatpush3.bf16.msra.mxu0 %v85_v3  ;;  %v61_v7 = vpack.c.bf16 %v49_v6, %v48_v5  ;;  %v3149_v8 = vld [vmem:[%s3960_s3] sm:$0xff]   ;;  %v44_v12 = vld [vmem:[%s3959_s0 + $0x10] sm:$0xff]  ;;  %v45_v13 = vld [vmem:[%s3959_s0 + $0x18] sm:$0xff] }
   0x4   :  { %v42_v9 = vld [vmem:[%s3959_s0] sm:$0xff]  ;;  %2593 = vmatprep.subr.bf16.mxu1 %v3057_v10  ;;  %v59_v15 = vpack.c.bf16 %v45_v13, %v44_v12  ;;  %2609 = vmatprep.subr.bf16.mxu0 %v3057_v10  ;;  %v3172_v16 = vld [vmem:[%s3960_s3 + $0x8] sm:$0xff]  }
   0x5   :  { %2589 = vmatprep.mubr.msk.bf16.mxu1 %vm70_vm1, %v60_v4  ;;  %v58_v14 = vpack.c.bf16 %v43_v11, %v42_v9  ;;  %v2454_v18 = vld [vmem:[%s3961_s4] ss:$0 sm:$0xff]  ;;  %s3060_s4 = smov 32  }
   0x6   :  { %2590 = vmatmul.mubr.msk.bf16.vlgmr.msra.gmra.mrb[0].mxu1 %vm70_vm1, %v61_v7 }
   0x7   :  { %2594 = vmatpush3.bf16.msra.mxu1 %v3149_v8  ;;  %2585 = vmatprep.mubr.msk.bf16.mxu0 %vm70_vm1, %v58_v14 }
   0x8   :  { %2586 = vmatmul.mubr.msk.bf16.vlgmr.msra.gmra.mrb[0].mxu0 %vm70_vm1, %v59_v15  ;;  %2595 = vmatprep.subr.bf16.mxu1 %v3057_v10 }
   0x9   :  { %2597 = vmatprep.mubr.msk.bf16.mxu1 %vm3058_vm2, %v3057_v10  ;;  %2610 = vmatpush3.bf16.msra.mxu0 %v3149_v8 }
   0xa   :  { %2611 = vmatprep.subr.bf16.mxu0 %v3057_v10  ;;  %2613 = vmatprep.mubr.msk.bf16.mxu0 %vm3058_vm2, %v3057_v10 }
   0xb   :  { %2596 = vmatpush3.bf16.msra.mxu1 %v3172_v16 }
   0xc   :  { %2601 = vmatprep.subr.bf16.mxu1 %v3057_v10 }
   0xd   :  { %2612 = vmatpush3.bf16.msra.mxu0 %v3172_v16 }
   0xe   :  { %2598 = vmatmul.mubr.bf16.vlgmr.msra.gmra.mrb[4].mxu1 %v3059_v17  ;;  %2625 = vmatprep.subr.bf16.mxu0 %v3057_v10 }
   0xf   :  { %2602 = vmatpush3.bf16.msra.mxu1 %v3149_v8  ;;  %2605 = vmatprep.mubr.msk.bf16.mxu1 %vm3058_vm2, %v3057_v10 }
  0x10   :  { %2603 = vmatprep.subr.bf16.mxu1 %v3057_v10 }
  0x13   :  { %2604 = vmatpush3.bf16.msra.mxu1 %v3172_v16 }
  0x14   :  { %2617 = vmatprep.subr.bf16.mxu1 %v3057_v10 }
  0xd9   :  { %v2591_v19 = vpop.f32.mrb[0].mxu1 }
  0xda   :  { %v3196_v20 = vadd.f32 %v2591_v19, %v2454_v18  ;;  %v137_v21 = vpop.f32.mrb[1].mxu1 }
  0xdb   :  { %v3198_v22 = vadd.f32 %v2454_v18, %v137_v21  ;;  %v2592_v23 = vpop.f32.mrb[2].mxu1  ;;  %v2587_v24 = vpop.f32.mrb[0].mxu0 }
  0xdc   :  { %v3200_v25 = vadd.f32 %v2592_v23, %v2454_v18  ;;  %v3202_v26 = vadd.f32 %v2587_v24, %v2454_v18  ;;  %v140_v27 = vpop.f32.mrb[3].mxu1  ;;  %v121_v28 = vpop.f32.mrb[1].mxu0 }
  0xdd   :  { %v3204_v29 = vadd.f32 %v2454_v18, %v140_v27  ;;  %v2588_v30 = vpop.f32.mrb[2].mxu0  ;;  %v122_v31 = vadd.f32 %v2454_v18, %v121_v28 }
  0xde   :  { %v3206_v32 = vadd.f32 %v2588_v30, %v2454_v18  ;;  %v124_v33 = vpop.f32.mrb[3].mxu0 }
  0xdf   :  { %v125_v34 = vadd.f32 %v2454_v18, %v124_v33 }
  0xe1   :  { %v206_v35 = vpop.f32.mrb[4].mxu1 }
  0xe2   :  { %v212_v36 = vadd.f32 %v206_v35, %v122_v31  ;;  %v2599_v37 = vpop.f32.mrb[5].mxu1 }
  0xe3   :  { %v209_v38 = vpop.f32.mrb[6].mxu1 }
  0xe4   :  { %2777 = vtanh.f32 %v212_v36  ;;  %v2600_v39 = vpop.f32.mrb[7].mxu1  ;;  %v2461_v41 = vmul.f32 -1.442695, %v212_v36 }
  0xe6   :  { %2779 = vpow2.f32 %v2461_v41 }
  0xee   :  { %v2778_v40 = vpop.eup %2777 }
  0xef   :  { %222 = vrot.lane.b32.xlu0 %v2778_v40, %s3060_s4 }
  0xf0   :  { %v2780_v42 = vpop.eup %2779 }
  0xf1   :  { %v216_v43 = vadd.f32 1.0, %v2780_v42 }
  0xf3   :  { %2781 = vrcp.f32 %v216_v43 }
  0xfd   :  { %v2782_v44 = vpop.eup %2781 }
  0xfe   :  { %v220_v47 = vmul.f32 0.0, %v2782_v44 }
 0x161   :  { %v223_v45 = vpop.permute.xlu0 %222 }
 0x162   :  { %v225_v46 = vmul.f32 %v2782_v44, %v223_v45 }
 0x164   :  { %227 = vrot.lane.b32.xlu0 %v225_v46, %s3060_s4 }
 0x1d6   :  { %v228_v48 = vpop.permute.xlu0 %227 }
 0x1d7   :  { %v230_v49 = vadd.f32 %v228_v48, %v220_v47 }
 0x1d9   :  { %2783 = vtanh.f32 %v230_v49 }
 0x1e3   :  { %v2784_v50 = vpop.eup %2783 }
 0x1e4   :  { %233 = vrot.lane.b32.xlu1 %v2784_v50, %s3060_s4 }
 0x256   :  { %v234_v51 = vpop.permute.xlu1 %233 }
 0x257   :  { %v3211_v52 = vmul.f32 %v2782_v44, %v234_v51 }
 0x259   :  { %v242_v53 = vpack.c.bf16 %v3211_v52, %v3211_v52 }
 0x25b   :  { %244 = vrot.lane.b32.xlu1 %v242_v53, %s3061_s25 }
 0x2cd   :  { %v245_v54 = vpop.permute.xlu1 %244 }
 0x2ce   :  { %2606 = vmatmul.mubr.msk.bf16.vlgmr.msra.gmra.mrb[8].mxu1 %vm168_vm3, %v245_v54 }
 0x2cf   :  { %2618 = vmatpush3.bf16.msra.mxu1 %v3149_v8  ;;  %2621 = vmatprep.mubr.msk.bf16.mxu1 %vm3058_vm2, %v3057_v10 }
 0x2d0   :  { %2619 = vmatprep.subr.bf16.mxu1 %v3057_v10 }
 0x2d3   :  { %2620 = vmatpush3.bf16.msra.mxu1 %v3172_v16 }
 0x2d4   :  { %2633 = vmatprep.subr.bf16.mxu1 %v3057_v10 }
 0x3a1   :  { %v283_v55 = vpop.f32.mrb[8].mxu1 }
 0x3a2   :  { %v289_v56 = vadd.f32 %v283_v55, %v125_v34  ;;  %v2607_v57 = vpop.f32.mrb[9].mxu1 }
 0x3a3   :  { %v286_v58 = vpop.f32.mrb[10].mxu1 }
 0x3a4   :  { %2785 = vtanh.f32 %v289_v56  ;;  %v2608_v59 = vpop.f32.mrb[11].mxu1  ;;  %v2463_v61 = vmul.f32 -1.442695, %v289_v56 }
 0x3a6   :  { %2787 = vpow2.f32 %v2463_v61 }
 0x3ae   :  { %v2786_v60 = vpop.eup %2785 }
 0x3af   :  { %299 = vrot.lane.b32.xlu0 %v2786_v60, %s3060_s4 }
 0x3b0   :  { %v2788_v62 = vpop.eup %2787 }
 0x3b1   :  { %v293_v63 = vadd.f32 1.0, %v2788_v62 }
 0x3b3   :  { %2789 = vrcp.f32 %v293_v63 }
 0x3bd   :  { %v2790_v0 = vpop.eup %2789 }
 0x3be   :  { %v297_v3 = vmul.f32 %v2790_v0, %v230_v49 }
 0x421   :  { %v300_v1 = vpop.permute.xlu0 %299 }
 0x422   :  { %v302_v2 = vmul.f32 %v2790_v0, %v300_v1 }
 0x424   :  { %304 = vrot.lane.b32.xlu1 %v302_v2, %s3060_s4 }
 0x496   :  { %v305_v4 = vpop.permute.xlu1 %304 }
 0x497   :  { %v307_v5 = vadd.f32 %v305_v4, %v297_v3 }
 0x499   :  { %2791 = vtanh.f32 %v307_v5 }
 0x4a3   :  { %v2792_v6 = vpop.eup %2791 }
 0x4a4   :  { %310 = vrot.lane.b32.xlu0 %v2792_v6, %s3060_s4 }
 0x516   :  { %v311_v7 = vpop.permute.xlu0 %310 }
 0x517   :  { %v3226_v9 = vmul.f32 %v2790_v0, %v311_v7 }
 0x519   :  { %v319_v11 = vpack.c.bf16 %v3226_v9, %v3226_v9 }
 0x51b   :  { %321 = vrot.lane.b32.xlu1 %v319_v11, %s3061_s25 }
 0x58d   :  { %v322_v12 = vpop.permute.xlu1 %321 }
 0x58e   :  { %2614 = vmatmul.mubr.msk.bf16.vlgmr.msra.gmra.mrb[4].mxu0 %vm168_vm3, %v322_v12 }
 0x58f   :  { %2626 = vmatpush3.bf16.msra.mxu0 %v3149_v8  ;;  %2629 = vmatprep.mubr.msk.bf16.mxu0 %vm3058_vm2, %v3057_v10 }
 0x590   :  { %2627 = vmatprep.subr.bf16.mxu0 %v3057_v10 }
 0x593   :  { %2628 = vmatpush3.bf16.msra.mxu0 %v3172_v16 }
 0x594   :  { %2641 = vmatprep.subr.bf16.mxu0 %v3057_v10 }
 0x661   :  { %v360_v13 = vpop.f32.mrb[4].mxu0 }
 0x662   :  { %v366_v14 = vadd.f32 %v360_v13, %v3202_v26  ;;  %v2615_v15 = vpop.f32.mrb[5].mxu0 }
 0x663   :  { %v363_v18 = vpop.f32.mrb[6].mxu0 }
 0x664   :  { %2793 = vtanh.f32 %v366_v14  ;;  %v2616_v19 = vpop.f32.mrb[7].mxu0  ;;  %v2465_v23 = vmul.f32 -1.442695, %v366_v14 }
 0x666   :  { %2795 = vpow2.f32 %v2465_v23 }
 0x66e   :  { %v2794_v21 = vpop.eup %2793 }
 0x66f   :  { %376 = vrot.lane.b32.xlu0 %v2794_v21, %s3060_s4 }
 0x670   :  { %v2796_v24 = vpop.eup %2795 }
 0x671   :  { %v370_v27 = vadd.f32 1.0, %v2796_v24 }
 0x673   :  { %2797 = vrcp.f32 %v370_v27 }
 0x67d   :  { %v2798_v28 = vpop.eup %2797 }
 0x67e   :  { %v374_v33 = vmul.f32 %v2798_v28, %v307_v5 }
 0x6e1   :  { %v377_v30 = vpop.permute.xlu0 %376 }
 0x6e2   :  { %v379_v31 = vmul.f32 %v2798_v28, %v377_v30 }
 0x6e4   :  { %381 = vrot.lane.b32.xlu1 %v379_v31, %s3060_s4 }
 0x756   :  { %v382_v34 = vpop.permute.xlu1 %381 }
 0x757   :  { %v384_v26 = vadd.f32 %v382_v34, %v374_v33 }
 0x759   :  { %2799 = vtanh.f32 %v384_v26 }
 0x763   :  { %v2800_v35 = vpop.eup %2799 }
 0x764   :  { %387 = vrot.lane.b32.xlu0 %v2800_v35, %s3060_s4 }
 0x7d6   :  { %v388_v36 = vpop.permute.xlu0 %387 }
 0x7d7   :  { %v3242_v37 = vmul.f32 %v2798_v28, %v388_v36 }
 0x7d9   :  { %v396_v38 = vpack.c.bf16 %v3242_v37, %v3242_v37 }
 0x7db   :  { %398 = vrot.lane.b32.xlu1 %v396_v38, %s3061_s25 }
 0x84d   :  { %v399_v39 = vpop.permute.xlu1 %398 }
 0x84e   :  { %2622 = vmatmul.mubr.msk.bf16.vlgmr.msra.gmra.mrb[12].mxu1 %vm168_vm3, %v399_v39 }
 0x84f   :  { %2634 = vmatpush3.bf16.msra.mxu1 %v3149_v8  ;;  %2637 = vmatprep.mubr.msk.bf16.mxu1 %vm3058_vm2, %v3057_v10 }
 0x850   :  { %2635 = vmatprep.subr.bf16.mxu1 %v3057_v10 }
 0x853   :  { %2636 = vmatpush3.bf16.msra.mxu1 %v3172_v16 }
 0x854   :  { %2649 = vmatprep.subr.bf16.mxu1 %v3057_v10 }
 0x921   :  { %v437_v40 = vpop.f32.mrb[12].mxu1 }
 0x922   :  { %v443_v41 = vadd.f32 %v437_v40, %v3206_v32  ;;  %v2623_v42 = vpop.f32.mrb[13].mxu1 }
 0x923   :  { %v440_v43 = vpop.f32.mrb[14].mxu1 }
 0x924   :  { %2801 = vtanh.f32 %v443_v41  ;;  %v2624_v44 = vpop.f32.mrb[15].mxu1  ;;  %v2467_v46 = vmul.f32 -1.442695, %v443_v41 }
 0x926   :  { %2803 = vpow2.f32 %v2467_v46 }
 0x92e   :  { %v2802_v45 = vpop.eup %2801 }
 0x92f   :  { %453 = vrot.lane.b32.xlu0 %v2802_v45, %s3060_s4 }
 0x930   :  { %v2804_v47 = vpop.eup %2803 }
 0x931   :  { %v447_v48 = vadd.f32 1.0, %v2804_v47 }
 0x933   :  { %2805 = vrcp.f32 %v447_v48 }
 0x93d   :  { %v2806_v49 = vpop.eup %2805 }
 0x93e   :  { %v451_v53 = vmul.f32 %v2806_v49, %v384_v26 }
 0x9a1   :  { %v454_v50 = vpop.permute.xlu0 %453 }
 0x9a2   :  { %v456_v51 = vmul.f32 %v2806_v49, %v454_v50 }
 0x9a4   :  { %458 = vrot.lane.b32.xlu1 %v456_v51, %s3060_s4 }
 0xa16   :  { %v459_v54 = vpop.permute.xlu1 %458 }
 0xa17   :  { %v461_v32 = vadd.f32 %v459_v54, %v451_v53 }
 0xa19   :  { %2807 = vtanh.f32 %v461_v32 }
 0xa23   :  { %v2808_v55 = vpop.eup %2807 }
 0xa24   :  { %464 = vrot.lane.b32.xlu0 %v2808_v55, %s3060_s4 }
 0xa96   :  { %v465_v56 = vpop.permute.xlu0 %464 }
 0xa97   :  { %v3258_v57 = vmul.f32 %v2806_v49, %v465_v56 }
 0xa99   :  { %v473_v58 = vpack.c.bf16 %v3258_v57, %v3258_v57 }
 0xa9b   :  { %475 = vrot.lane.b32.xlu1 %v473_v58, %s3061_s25 }
 0xb0d   :  { %v476_v59 = vpop.permute.xlu1 %475 }
 0xb0e   :  { %2630 = vmatmul.mubr.msk.bf16.vlgmr.msra.gmra.mrb[8].mxu0 %vm168_vm3, %v476_v59 }
 0xb0f   :  { %2642 = vmatpush3.bf16.msra.mxu0 %v3149_v8  ;;  %2645 = vmatprep.mubr.msk.bf16.mxu0 %vm3058_vm2, %v3057_v10 }
 0xb10   :  { %2643 = vmatprep.subr.bf16.mxu0 %v3057_v10 }
 0xb13   :  { %2644 = vmatpush3.bf16.msra.mxu0 %v3172_v16 }
 0xbe1   :  { %v514_v60 = vpop.f32.mrb[8].mxu0 }
 0xbe2   :  { %v520_v61 = vadd.f32 %v514_v60, %v3198_v22  ;;  %v2631_v62 = vpop.f32.mrb[9].mxu0 }
 0xbe3   :  { %v517_v63 = vpop.f32.mrb[10].mxu0  ;;  %v2771_v62 = vld [vmem:[%s3962_s5 + $0x8] sm:$0xff]  }
 0xbe4   :  { %2809 = vtanh.f32 %v520_v61  ;;  %v2632_v0 = vpop.f32.mrb[11].mxu0  ;;  %v2469_v2 = vmul.f32 -1.442695, %v520_v61  ;;  %v2770_v61 = vld [vmem:[%s3962_s5] sm:$0xff]  }
 0xbe5   :  { %2657 = vmatprep.subr.bf16.mxu0 %v2770_v61 }
 0xbe6   :  { %2811 = vpow2.f32 %v2469_v2 }
 0xbee   :  { %v2810_v1 = vpop.eup %2809 }
 0xbef   :  { %530 = vrot.lane.b32.xlu0 %v2810_v1, %s3060_s4 }
 0xbf0   :  { %v2812_v3 = vpop.eup %2811 }
 0xbf1   :  { %v524_v4 = vadd.f32 1.0, %v2812_v3 }
 0xbf3   :  { %2813 = vrcp.f32 %v524_v4 }
 0xbfd   :  { %v2814_v5 = vpop.eup %2813 }
 0xbfe   :  { %v528_v11 = vmul.f32 %v2814_v5, %v461_v32 }
 0xc61   :  { %v531_v6 = vpop.permute.xlu0 %530 }
 0xc62   :  { %v533_v7 = vmul.f32 %v2814_v5, %v531_v6 }
 0xc64   :  { %535 = vrot.lane.b32.xlu1 %v533_v7, %s3060_s4 }
 0xcd6   :  { %v536_v12 = vpop.permute.xlu1 %535 }
 0xcd7   :  { %v538_v22 = vadd.f32 %v536_v12, %v528_v11 }
 0xcd9   :  { %2815 = vtanh.f32 %v538_v22 }
 0xce3   :  { %v2816_v13 = vpop.eup %2815 }
 0xce4   :  { %541 = vrot.lane.b32.xlu0 %v2816_v13, %s3060_s4 }
 0xd56   :  { %v542_v14 = vpop.permute.xlu0 %541 }
 0xd57   :  { %v3273_v15 = vmul.f32 %v2814_v5, %v542_v14 }
 0xd59   :  { %v550_v18 = vpack.c.bf16 %v3273_v15, %v3273_v15 }
 0xd5b   :  { %552 = vrot.lane.b32.xlu1 %v550_v18, %s3061_s25 }
 0xdcd   :  { %v553_v19 = vpop.permute.xlu1 %552 }
 0xdce   :  { %2638 = vmatmul.mubr.msk.bf16.vlgmr.msra.gmra.mrb[16].mxu1 %vm168_vm3, %v553_v19 }
 0xdcf   :  { %2650 = vmatpush3.bf16.msra.mxu1 %v3149_v8  ;;  %2653 = vmatprep.mubr.msk.bf16.mxu1 %vm3058_vm2, %v3057_v10 }
 0xdd0   :  { %2651 = vmatprep.subr.bf16.mxu1 %v3057_v10 }
 0xdd3   :  { %2652 = vmatpush3.bf16.msra.mxu1 %v3172_v16 }
 0xea1   :  { %v591_v21 = vpop.f32.mrb[16].mxu1 }
 0xea2   :  { %v597_v23 = vadd.f32 %v591_v21, %v3204_v29  ;;  %v2639_v24 = vpop.f32.mrb[17].mxu1 }
 0xea3   :  { %v594_v27 = vpop.f32.mrb[18].mxu1 }
 0xea4   :  { %2817 = vtanh.f32 %v597_v23  ;;  %v2640_v28 = vpop.f32.mrb[19].mxu1  ;;  %v2471_v31 = vmul.f32 -1.442695, %v597_v23 }
 0xea6   :  { %2819 = vpow2.f32 %v2471_v31 }
 0xeae   :  { %v2818_v30 = vpop.eup %2817 }
 0xeaf   :  { %607 = vrot.lane.b32.xlu0 %v2818_v30, %s3060_s4 }
 0xeb0   :  { %v2820_v8 = vpop.eup %2819 }
 0xeb1   :  { %v601_v33 = vadd.f32 1.0, %v2820_v8 }
 0xeb3   :  { %2821 = vrcp.f32 %v601_v33 }
 0xebd   :  { %v2822_v34 = vpop.eup %2821 }
 0xebe   :  { %v605_v16 = vmul.f32 %v2822_v34, %v538_v22 }
 0xf21   :  { %v608_v26 = vpop.permute.xlu0 %607 }
 0xf22   :  { %v610_v35 = vmul.f32 %v2822_v34, %v608_v26 }
 0xf24   :  { %612 = vrot.lane.b32.xlu1 %v610_v35, %s3060_s4 }
 0xf96   :  { %v613_v36 = vpop.permute.xlu1 %612 }
 0xf97   :  { %v615_v29 = vadd.f32 %v613_v36, %v605_v16 }
 0xf99   :  { %2823 = vtanh.f32 %v615_v29 }
 0xfa3   :  { %v2824_v38 = vpop.eup %2823 }
 0xfa4   :  { %618 = vrot.lane.b32.xlu0 %v2824_v38, %s3060_s4 }
0x1016   :  { %v619_v39 = vpop.permute.xlu0 %618 }
0x1017   :  { %v3288_v40 = vmul.f32 %v2822_v34, %v619_v39 }
0x1019   :  { %v627_v41 = vpack.c.bf16 %v3288_v40, %v3288_v40 }
0x101b   :  { %629 = vrot.lane.b32.xlu1 %v627_v41, %s3061_s25 }
0x108d   :  { %v630_v42 = vpop.permute.xlu1 %629 }
0x108e   :  { %2646 = vmatmul.mubr.msk.bf16.vlgmr.msra.gmra.mrb[12].mxu0 %vm168_vm3, %v630_v42 }
0x108f   :  { %2658 = vmatpush3.bf16.msra.mxu0 %v2770_v61 }
0x1090   :  { %2659 = vmatprep.subr.bf16.mxu0 %v2771_v62 }
0x1093   :  { %2660 = vmatpush3.bf16.msra.mxu0 %v2771_v62 }
0x1094   :  { %2679 = vmatprep.subr.bf16.mxu0 %v3057_v10 }
0x1161   :  { %v668_v43 = vpop.f32.mrb[12].mxu0 }
0x1162   :  { %v674_v44 = vadd.f32 %v668_v43, %v3196_v20  ;;  %v2647_v45 = vpop.f32.mrb[13].mxu0 }
0x1163   :  { %v671_v46 = vpop.f32.mrb[14].mxu0 }
0x1164   :  { %2825 = vtanh.f32 %v674_v44  ;;  %v2648_v47 = vpop.f32.mrb[15].mxu0  ;;  %v2473_v49 = vmul.f32 -1.442695, %v674_v44 }
0x1166   :  { %2827 = vpow2.f32 %v2473_v49 }
0x116e   :  { %v2826_v48 = vpop.eup %2825 }
0x116f   :  { %684 = vrot.lane.b32.xlu0 %v2826_v48, %s3060_s4 }
0x1170   :  { %v2828_v50 = vpop.eup %2827 }
0x1171   :  { %v678_v51 = vadd.f32 1.0, %v2828_v50 }
0x1173   :  { %2829 = vrcp.f32 %v678_v51 }
0x117d   :  { %v2830_v53 = vpop.eup %2829 }
0x117e   :  { %v682_v55 = vmul.f32 %v2830_v53, %v615_v29 }
0x11e1   :  { %v685_v54 = vpop.permute.xlu0 %684 }
0x11e2   :  { %v687_v32 = vmul.f32 %v2830_v53, %v685_v54 }
0x11e4   :  { %689 = vrot.lane.b32.xlu1 %v687_v32, %s3060_s4 }
0x1256   :  { %v690_v56 = vpop.permute.xlu1 %689 }
0x1257   :  { %v3297_v20 = vadd.f32 %v690_v56, %v682_v55 }
0x1259   :  { %2831 = vtanh.f32 %v3297_v20 }
0x1263   :  { %v2832_v58 = vpop.eup %2831 }
0x1264   :  { %695 = vrot.lane.b32.xlu0 %v2832_v58, %s3060_s4 }
0x1268   :  { %238 = vrot.lane.b32.xlu0 %v3211_v52, %s3061_s25 }
0x126c   :  { %392 = vrot.lane.b32.xlu0 %v3242_v37, %s3061_s25 }
0x12d6   :  { %v696_v59 = vpop.permute.xlu0 %695 }
0x12d7   :  { %v3305_v60 = vmul.f32 %v2830_v53, %v696_v59 }
0x12d9   :  { %v704_v63 = vpack.c.bf16 %v3305_v60, %v3305_v60 }
0x12da   :  { %v239_v0 = vpop.permute.xlu0 %238 }
0x12db   :  { %241 = vst.msk [vmem:[#allocation2] sm:$0xff] %vm168_vm3, %v239_v0  ;;  %706 = vrot.lane.b32.xlu1 %v704_v63, %s3061_s25 }
0x12de   :  { %v393_v52 = vpop.permute.xlu0 %392 }
0x12df   :  { %395 = vst.msk [vmem:[#allocation2 + $0x10] sm:$0xff] %vm168_vm3, %v393_v52  ;;  %315 = vrot.lane.b32.xlu1 %v3226_v9, %s3061_s25 }
0x12e2   :  { %v3323_v37 = vld [vmem:[#allocation2] sm:$0xff] }
0x12e3   :  { %469 = vrot.lane.b32.xlu1 %v3258_v57, %s3061_s25  ;;  %v813_v1 = vand.u32 2147483647, %v3323_v37  ;;  %v789_v49 = vmax.f32 %v3323_v37, 0.0  ;;  %vm797_vm7 = vcmp.ne.f32.partialorder %v3323_v37, %v3323_v37 }
0x12e5   :  { %v821_v3 = vsub.f32 0.0, %v813_v1 }
0x12e6   :  { %v3326_v2 = vld [vmem:[#allocation2 + $0x10] sm:$0xff] }
0x12e7   :  { %v815_v4 = vand.u32 2147483647, %v3326_v2  ;;  %v829_v6 = vmul.f32 1.442695, %v821_v3  ;;  %v791_v1 = vmax.f32 %v3326_v2, 0.0  ;;  %vm799_vm10 = vcmp.ne.f32.partialorder %v3326_v2, %v3326_v2 }
0x12e9   :  { %v823_v7 = vsub.f32 0.0, %v815_v4  ;;  %2833 = vpow2.f32 %v829_v6 }
0x12eb   :  { %v833_v11 = vmul.f32 1.442695, %v823_v7 }
0x12ed   :  { %2835 = vpow2.f32 %v833_v11 }
0x12f3   :  { %v2834_v13 = vpop.eup %2833 }
0x12f4   :  { %v845_v23 = vadd.f32 1.0, %v2834_v13  ;;  %v848_v8 = vmul.f32 -0.5, %v2834_v13  ;;  %v851_v29 = vand.u32 2147483647, %v2834_v13 }
0x12f6   :  { %v849_v35 = vadd.f32 1.0, %v848_v8  ;;  %vm852_vm4 = vcmp.lt.f32.partialorder %v851_v29, 0.0004427343 }
0x12f7   :  { %v2836_v27 = vpop.eup %2835 }
0x12f8   :  { %v863_v30 = vadd.f32 1.0, %v2836_v27  ;;  %v866_v16 = vmul.f32 -0.5, %v2836_v27  ;;  %v850_v42 = vmul.f32 %v2834_v13, %v849_v35  ;;  %v869_v44 = vand.u32 2147483647, %v2836_v27 }
0x12fa   :  { %v867_v43 = vadd.f32 1.0, %v866_v16  ;;  %vm3336_vm5 = vcmp.lt.f32.partialorder %v869_v44, 0.0004427343 }
0x12fc   :  { %v868_v53 = vmul.f32 %v2836_v27, %v867_v43 }
0x134d   :  { %v707_v5 = vpop.permute.xlu1 %706 }
0x134e   :  { %2654 = vmatmul.mubr.msk.bf16.vlgmr.msra.gmra.mrb[20].mxu1 %vm168_vm3, %v707_v5 }
0x1351   :  { %v316_v9 = vpop.permute.xlu1 %315 }
0x1352   :  { %318 = vst.msk [vmem:[#allocation2 + $0x8] sm:$0xff] %vm168_vm3, %v316_v9 }
0x1355   :  { %v470_v57 = vpop.permute.xlu1 %469 }
0x1356   :  { %472 = vst.msk [vmem:[#allocation2 + $0x18] sm:$0xff] %vm168_vm3, %v470_v57 }
0x1359   :  { %v782_v12 = vld [vmem:[#allocation2 + $0x8] sm:$0xff] }
0x135a   :  { %v814_v22 = vand.u32 2147483647, %v782_v12  ;;  %v790_v59 = vmax.f32 %v782_v12, 0.0  ;;  %vm798_vm8 = vcmp.ne.f32.partialorder %v782_v12, %v782_v12 }
0x135c   :  { %v822_v14 = vsub.f32 0.0, %v814_v22 }
0x135d   :  { %v3332_v18 = vld [vmem:[#allocation2 + $0x18] sm:$0xff] }
0x135e   :  { %v831_v19 = vmul.f32 1.442695, %v822_v14  ;;  %v816_v21 = vand.u32 2147483647, %v3332_v18  ;;  %v792_v7 = vmax.f32 %v3332_v18, 0.0  ;;  %vm800_vm11 = vcmp.ne.f32.partialorder %v3332_v18, %v3332_v18 }
0x1360   :  { %2837 = vpow2.f32 %v831_v19  ;;  %v824_v24 = vsub.f32 0.0, %v816_v21 }
0x1361   :  { %2839 = vlog2.f32 %v845_v23 }
0x1362   :  { %v835_v28 = vmul.f32 1.442695, %v824_v24 }
0x1364   :  { %2841 = vpow2.f32 %v835_v28 }
0x1365   :  { %2843 = vlog2.f32 %v863_v30 }
0x136a   :  { %v2838_v31 = vpop.eup %2837 }
0x136b   :  { %v854_v33 = vadd.f32 1.0, %v2838_v31  ;;  %v2840_v34 = vpop.eup %2839  ;;  %v857_v38 = vmul.f32 -0.5, %v2838_v31  ;;  %v860_v48 = vand.u32 2147483647, %v2838_v31 }
0x136c   :  { %v847_v39 = vmul.f32 0.6931472, %v2840_v34  ;;  %v3360_v34 = vld [vmem:[%s3963_s6] ss:$0 sm:$0xff]  ;;  %s3062_s6 = smov 112  }
0x136d   :  { %2845 = vlog2.f32 %v854_v33  ;;  %v858_v45 = vadd.f32 1.0, %v857_v38  ;;  %vm861_vm6 = vcmp.lt.f32.partialorder %v860_v48, 0.0004427343 }
0x136e   :  { %v2842_v26 = vpop.eup %2841  ;;  %v853_v47 = vsel %vm852_vm4, %v850_v42, %v847_v39 }
0x136f   :  { %v872_v36 = vadd.f32 1.0, %v2842_v26  ;;  %v2844_v41 = vpop.eup %2843  ;;  %v875_v46 = vmul.f32 -0.5, %v2842_v26  ;;  %v859_v55 = vmul.f32 %v2838_v31, %v858_v45  ;;  %v917_v56 = vadd.f32 %v853_v47, %v789_v49 }
0x1370   :  { %v865_v50 = vmul.f32 0.6931472, %v2844_v41  ;;  %v878_v61 = vand.u32 2147483647, %v2842_v26 }
0x1371   :  { %2847 = vlog2.f32 %v872_v36  ;;  %v876_v58 = vadd.f32 1.0, %v875_v46  ;;  %v925_v3 = vsel %vm797_vm7, %v3323_v37, %v917_v56 }
0x1372   :  { %v871_v63 = vsel %vm3336_vm5, %v868_v53, %v865_v50  ;;  %vm879_vm9 = vcmp.lt.f32.partialorder %v878_v61, 0.0004427343 }
0x1373   :  { %v877_v5 = vmul.f32 %v2842_v26, %v876_v58  ;;  %v919_v9 = vadd.f32 %v871_v63, %v791_v1 }
0x1375   :  { %v927_v37 = vsel %vm799_vm10, %v3326_v2, %v919_v9 }
0x1377   :  { %v2846_v51 = vpop.eup %2845 }
0x1378   :  { %v856_v32 = vmul.f32 0.6931472, %v2846_v51 }
0x137a   :  { %v862_v62 = vsel %vm861_vm6, %v859_v55, %v856_v32 }
0x137b   :  { %v2848_v0 = vpop.eup %2847  ;;  %v918_v52 = vadd.f32 %v862_v62, %v790_v59  ;;  %v3403_v62 = vld [vmem:[%s3965_s8] sm:$0xff]  }
0x137c   :  { %v874_v4 = vmul.f32 0.6931472, %v2848_v0 }
0x137d   :  { %v926_v6 = vsel %vm798_vm8, %v782_v12, %v918_v52 }
0x137e   :  { %v933_v11 = vpack.c.bf16 %v926_v6, %v925_v3  ;;  %v880_v57 = vsel %vm879_vm9, %v877_v5, %v874_v4 }
0x137f   :  { %v920_v22 = vadd.f32 %v880_v57, %v792_v7 }
0x1380   :  { %2661 = vmatprep.mubr.msk.bf16.mxu0 %vm168_vm3, %v933_v11 }
0x1381   :  { %v928_v13 = vsel %vm800_vm11, %v3332_v18, %v920_v22 }
0x1382   :  { %v934_v12 = vpack.c.bf16 %v928_v13, %v927_v37 }
0x1384   :  { %2662 = vmatmul.mubr.msk.bf16.vlgmr.msra.gmra.mrb[16].mxu0 %vm168_vm3, %v934_v12 }
0x1385   :  { %2680 = vmatpush3.bf16.msra.mxu0 %v3403_v62 }
0x1386   :  { %2681 = vmatprep.subr.bf16.mxu0 %v3057_v10 }
0x1421   :  { %v745_v14 = vpop.f32.mrb[20].mxu1 }
0x1422   :  { %v751_v19 = vadd.f32 %v745_v14, %v3200_v25  ;;  %v2655_v21 = vpop.f32.mrb[21].mxu1  ;;  %v3412_v14 = vld [vmem:[%s3965_s8 + $0x8] sm:$0xff]  }
0x1423   :  { %v748_v23 = vpop.f32.mrb[22].mxu1  ;;  %2682 = vmatpush3.bf16.msra.mxu0 %v3412_v14 }
0x1424   :  { %2849 = vtanh.f32 %v751_v19  ;;  %v2656_v24 = vpop.f32.mrb[23].mxu1  ;;  %v2475_v2 = vmul.f32 -1.442695, %v751_v19  ;;  %2695 = vmatprep.subr.bf16.mxu0 %v3057_v10 }
0x1426   :  { %2851 = vpow2.f32 %v2475_v2 }
0x142e   :  { %v2850_v27 = vpop.eup %2849 }
0x142f   :  { %761 = vrot.lane.b32.xlu0 %v2850_v27, %s3060_s4 }
0x1430   :  { %v2852_v18 = vpop.eup %2851 }
0x1431   :  { %v755_v33 = vadd.f32 1.0, %v2852_v18 }
0x1433   :  { %2853 = vrcp.f32 %v755_v33 }
0x143d   :  { %v2854_v16 = vpop.eup %2853 }
0x143e   :  { %v759_v44 = vmul.f32 %v2854_v16, %v3297_v20 }
0x1457   :  { %v2663_v28 = vpop.f32.mrb[16].mxu0 }
0x1458   :  { %v1006_v30 = vpop.f32.mrb[17].mxu0  ;;  %v3366_v26 = vadd.f32 %v2663_v28, %v3360_v34 }
0x1459   :  { %v2664_v31 = vpop.f32.mrb[18].mxu0  ;;  %v3363_v25 = vadd.f32 %v3360_v34, %v1006_v30 }
0x145a   :  { %v1009_v8 = vpop.f32.mrb[19].mxu0  ;;  %v1039_v36 = vmul.f32 0.5, %v3366_v26  ;;  %v3387_v20 = vadd.f32 %v2664_v31, %v3360_v34 }
0x145b   :  { %v1037_v35 = vmul.f32 0.5, %v3363_v25 }
0x145c   :  { %v1049_v41 = vmul.f32 1.442695, %v1039_v36  ;;  %v1040_v50 = vmul.f32 0.5, %v3387_v20 }
0x145d   :  { %v1045_v29 = vmul.f32 1.442695, %v1037_v35 }
0x145e   :  { %v1051_v32 = vmul.f32 1.442695, %v1040_v50  ;;  %v53_v50 = vld [vmem:[%s3966_s1 + $0x18] sm:$0xff] }
0x145f   :  { %2855 = vpow2.f32 %v1045_v29 }
0x1460   :  { %2857 = vpow2.f32 %v1049_v41 }
0x1469   :  { %v2856_v42 = vpop.eup %2855 }
0x146a   :  { %v2858_v43 = vpop.eup %2857 }
0x14a1   :  { %v762_v38 = vpop.permute.xlu0 %761 }
0x14a2   :  { %v764_v39 = vmul.f32 %v2854_v16, %v762_v38 }
0x14a4   :  { %766 = vrot.lane.b32.xlu1 %v764_v39, %s3060_s4 }
0x14a8   :  { %546 = vrot.lane.b32.xlu1 %v3273_v15, %s3061_s25 }
0x14ac   :  { %700 = vrot.lane.b32.xlu1 %v3305_v60, %s3061_s25  ;;  %v3384_v60 = vadd.f32 %v3360_v34, %v1009_v8 }
0x14ae   :  { %v1038_v49 = vmul.f32 0.5, %v3384_v60 }
0x14b0   :  { %1069 = vrot.lane.b32.xlu1 %v2856_v42, %s3062_s6  ;;  %v1047_v51 = vmul.f32 1.442695, %v1038_v49  ;;  %v50_v42 = vld [vmem:[%s3966_s1] sm:$0xff] }
0x14b4   :  { %1073 = vrot.lane.b32.xlu1 %v2858_v43, %s3062_s6 }
0x1516   :  { %v767_v45 = vpop.permute.xlu1 %766 }
0x1517   :  { %v769_v46 = vadd.f32 %v767_v45, %v759_v44  ;;  %v51_v45 = vld [vmem:[%s3966_s1 + $0x8] sm:$0xff] }
0x1519   :  { %2859 = vtanh.f32 %v769_v46 }
0x151a   :  { %v547_v47 = vpop.permute.xlu1 %546  ;;  %2861 = vpow2.f32 %v1047_v51 }
0x151b   :  { %549 = vst.msk [vmem:[#allocation2 + $0x20] sm:$0xff] %vm168_vm3, %v547_v47  ;;  %2863 = vpow2.f32 %v1051_v32  ;;  %v52_v47 = vld [vmem:[%s3966_s1 + $0x10] sm:$0xff] }
0x151e   :  { %v701_v15 = vpop.permute.xlu1 %700 }
0x151f   :  { %703 = vst.msk [vmem:[#allocation2 + $0x30] sm:$0xff] %vm168_vm3, %v701_v15 }
0x1522   :  { %v3391_v53 = vld [vmem:[#allocation2 + $0x20] sm:$0xff]  ;;  %v1070_v41 = vpop.permute.xlu1 %1069 }
0x1523   :  { %v2860_v48 = vpop.eup %2859  ;;  %v817_v54 = vand.u32 2147483647, %v3391_v53  ;;  %v793_v28 = vmax.f32 %v3391_v53, 0.0  ;;  %vm801_vm14 = vcmp.ne.f32.partialorder %v3391_v53, %v3391_v53  ;;  %v1093_v46 = vmul.f32 %v1070_v41, %v50_v42  ;;  %v3470_v42 = vld [vmem:[%s3967_s9] ss:$0 sm:$0xff] }
0x1524   :  { %772 = vrot.lane.b32.xlu0 %v2860_v48, %s3060_s4  ;;  %v2862_v63 = vpop.eup %2861 }
0x1525   :  { %v825_v55 = vsub.f32 0.0, %v817_v54  ;;  %v2864_v0 = vpop.eup %2863  ;;  %v1101_v51 = vadd.f32 %v1093_v46, %v3363_v25 }
0x1526   :  { %v3421_v29 = vld [vmem:[#allocation2 + $0x30] sm:$0xff]  ;;  %v1074_v15 = vpop.permute.xlu1 %1073 }
0x1527   :  { %v837_v59 = vmul.f32 1.442695, %v825_v55  ;;  %v819_v38 = vand.u32 2147483647, %v3421_v29  ;;  %vm803_vm6 = vcmp.ne.f32.partialorder %v3421_v29, %v3421_v29 }
0x1528   :  { %623 = vrot.lane.b32.xlu0 %v3288_v40, %s3061_s25  ;;  %v2772_v40 = vld [vmem:[%s3964_s7] sm:$0xff]  }
0x1529   :  { %2669 = vmatprep.subr.bf16.mxu1 %v2772_v40  ;;  %2865 = vpow2.f32 %v837_v59  ;;  %v827_v39 = vsub.f32 0.0, %v819_v38 }
0x152a   :  { %2670 = vmatpush3.bf16.msra.mxu1 %v2772_v40 }
0x152b   :  { %2687 = vmatprep.subr.bf16.mxu1 %v3057_v10  ;;  %v841_v44 = vmul.f32 1.442695, %v827_v39 }
0x1533   :  { %v2866_v4 = vpop.eup %2865 }
0x1534   :  { %v881_v6 = vadd.f32 1.0, %v2866_v4  ;;  %v884_v11 = vmul.f32 -0.5, %v2866_v4  ;;  %v887_v13 = vand.u32 2147483647, %v2866_v4 }
0x1536   :  { %v885_v22 = vadd.f32 1.0, %v884_v11  ;;  %vm888_vm12 = vcmp.lt.f32.partialorder %v887_v13, 0.0004427343 }
0x1538   :  { %v886_v19 = vmul.f32 %v2866_v4, %v885_v22 }
0x1596   :  { %v773_v56 = vpop.permute.xlu0 %772 }
0x1597   :  { %v775_v58 = vmul.f32 %v2854_v16, %v773_v56 }
0x1599   :  { %777 = vrot.lane.b32.xlu0 %v775_v58, %s3061_s25 }
0x159a   :  { %v624_v61 = vpop.permute.xlu0 %623 }
0x159b   :  { %626 = vst.msk [vmem:[#allocation2 + $0x28] sm:$0xff] %vm168_vm3, %v624_v61 }
0x159d   :  { %1071 = vrot.lane.b32.xlu0 %v2862_v63, %s3062_s6 }
0x15a1   :  { %1075 = vrot.lane.b32.xlu0 %v2864_v0, %s3062_s6 }
0x15a2   :  { %v786_v52 = vld [vmem:[#allocation2 + $0x28] sm:$0xff] }
0x15a3   :  { %v818_v1 = vand.u32 2147483647, %v786_v52  ;;  %v794_v8 = vmax.f32 %v786_v52, 0.0  ;;  %vm802_vm15 = vcmp.ne.f32.partialorder %v786_v52, %v786_v52 }
0x15a5   :  { %v826_v3 = vsub.f32 0.0, %v818_v1 }
0x15a7   :  { %v839_v5 = vmul.f32 1.442695, %v826_v3 }
0x15a9   :  { %2867 = vpow2.f32 %v839_v5 }
0x15aa   :  { %2869 = vlog2.f32 %v881_v6 }
0x15b3   :  { %v2868_v7 = vpop.eup %2867 }
0x15b4   :  { %v890_v9 = vadd.f32 1.0, %v2868_v7  ;;  %v2870_v57 = vpop.eup %2869  ;;  %v893_v37 = vmul.f32 -0.5, %v2868_v7  ;;  %v896_v23 = vand.u32 2147483647, %v2868_v7 }
0x15b5   :  { %v883_v12 = vmul.f32 0.6931472, %v2870_v57 }
0x15b6   :  { %2871 = vlog2.f32 %v890_v9  ;;  %v894_v21 = vadd.f32 1.0, %v893_v37  ;;  %vm897_vm13 = vcmp.lt.f32.partialorder %v896_v23, 0.0004427343  ;;  %v795_v23 = vmax.f32 %v3421_v29, 0.0 }
0x15b7   :  { %v889_v24 = vsel %vm888_vm12, %v886_v19, %v883_v12  ;;  %2873 = vpow2.f32 %v841_v44 }
0x15b8   :  { %v895_v31 = vmul.f32 %v2868_v7, %v894_v21  ;;  %v921_v2 = vadd.f32 %v889_v24, %v793_v28 }
0x15ba   :  { %v929_v35 = vsel %vm801_vm14, %v3391_v53, %v921_v2  ;;  %v1095_v53 = vmul.f32 %v1074_v15, %v52_v47 }
0x15bc   :  { %v1103_v59 = vadd.f32 %v1095_v53, %v3366_v26 }
0x15c0   :  { %v2872_v27 = vpop.eup %2871 }
0x15c1   :  { %v892_v30 = vmul.f32 0.6931472, %v2872_v27 }
0x15c3   :  { %v898_v18 = vsel %vm897_vm13, %v895_v31, %v892_v30 }
0x15c4   :  { %v922_v33 = vadd.f32 %v898_v18, %v794_v8 }
0x15c6   :  { %v930_v16 = vsel %vm802_vm15, %v786_v52, %v922_v33  ;;  %v2874_v52 = vpop.eup %2873 }
0x15c7   :  { %v935_v36 = vpack.c.bf16 %v930_v16, %v929_v35  ;;  %v899_v3 = vadd.f32 1.0, %v2874_v52  ;;  %v902_v6 = vmul.f32 -0.5, %v2874_v52  ;;  %v905_v57 = vand.u32 2147483647, %v2874_v52 }
0x15c9   :  { %2665 = vmatprep.mubr.msk.bf16.mxu0 %vm168_vm3, %v935_v36  ;;  %v903_v9 = vadd.f32 1.0, %v902_v6  ;;  %vm906_vm4 = vcmp.lt.f32.partialorder %v905_v57, 0.0004427343 }
0x15cb   :  { %v904_v37 = vmul.f32 %v2874_v52, %v903_v9 }
0x160b   :  { %v778_v43 = vpop.permute.xlu0 %777 }
0x160c   :  { %780 = vst.msk [vmem:[#allocation2 + $0x38] sm:$0xff] %vm168_vm3, %v778_v43 }
0x160f   :  { %v1072_v48 = vpop.permute.xlu0 %1071 }
0x1610   :  { %v1094_v49 = vmul.f32 %v1072_v48, %v51_v45 }
0x1612   :  { %v1102_v54 = vadd.f32 %v1094_v49, %v3384_v60 }
0x1613   :  { %v1076_v32 = vpop.permute.xlu0 %1075  ;;  %v788_v40 = vld [vmem:[#allocation2 + $0x38] sm:$0xff] }
0x1614   :  { %v1254_v55 = vpack.c.bf16 %v1102_v54, %v1101_v51  ;;  %v1096_v56 = vmul.f32 %v1076_v32, %v53_v50  ;;  %v820_v58 = vand.u32 2147483647, %v788_v40  ;;  %v796_v28 = vmax.f32 %v788_v40, 0.0 }
0x1615   :  { %vm804_vm7 = vcmp.ne.f32.partialorder %v788_v40, %v788_v40 }
0x1616   :  { %v1104_v61 = vadd.f32 %v1096_v56, %v3387_v20  ;;  %2671 = vmatprep.mubr.msk.bf16.mxu1 %vm1221_vm0, %v1254_v55  ;;  %v828_v63 = vsub.f32 0.0, %v820_v58 }
0x1618   :  { %v1255_v0 = vpack.c.bf16 %v1104_v61, %v1103_v59  ;;  %v843_v1 = vmul.f32 1.442695, %v828_v63 }
0x161a   :  { %2672 = vmatmul.mubr.msk.bf16.vlgmr.msra.gmra.mrb[24].mxu1 %vm1221_vm0, %v1255_v0  ;;  %2875 = vpow2.f32 %v843_v1 }
0x161b   :  { %2688 = vmatpush3.bf16.msra.mxu1 %v3403_v62  ;;  %2877 = vlog2.f32 %v899_v3 }
0x161c   :  { %2689 = vmatprep.subr.bf16.mxu1 %v3057_v10 }
0x161f   :  { %2690 = vmatpush3.bf16.msra.mxu1 %v3412_v14 }
0x1620   :  { %2703 = vmatprep.subr.bf16.mxu1 %v3057_v10 }
0x1624   :  { %v2876_v4 = vpop.eup %2875 }
0x1625   :  { %v908_v5 = vadd.f32 1.0, %v2876_v4  ;;  %v2878_v7 = vpop.eup %2877  ;;  %v911_v11 = vmul.f32 -0.5, %v2876_v4  ;;  %v914_v12 = vand.u32 2147483647, %v2876_v4 }
0x1626   :  { %v901_v22 = vmul.f32 0.6931472, %v2878_v7 }
0x1627   :  { %2879 = vlog2.f32 %v908_v5  ;;  %v912_v13 = vadd.f32 1.0, %v911_v11  ;;  %vm915_vm5 = vcmp.lt.f32.partialorder %v914_v12, 0.0004427343 }
0x1628   :  { %v907_v19 = vsel %vm906_vm4, %v904_v37, %v901_v22 }
0x1629   :  { %v913_v27 = vmul.f32 %v2876_v4, %v912_v13  ;;  %v923_v30 = vadd.f32 %v907_v19, %v795_v23  ;;  %v54_v13 = vld [vmem:[%s3966_s1 + $0x20] sm:$0xff] }
0x162b   :  { %v931_v2 = vsel %vm803_vm6, %v3421_v29, %v923_v30 }
0x1631   :  { %v2880_v21 = vpop.eup %2879 }
0x1632   :  { %v910_v24 = vmul.f32 0.6931472, %v2880_v21  ;;  %v55_v21 = vld [vmem:[%s3966_s1 + $0x28] sm:$0xff] }
0x1634   :  { %v916_v31 = vsel %vm915_vm5, %v913_v27, %v910_v24  ;;  %v56_v27 = vld [vmem:[%s3966_s1 + $0x30] sm:$0xff] }
0x1635   :  { %v924_v8 = vadd.f32 %v916_v31, %v796_v28 }
0x1637   :  { %v932_v18 = vsel %vm804_vm7, %v788_v40, %v924_v8  ;;  %v57_v8 = vld [vmem:[%s3966_s1 + $0x38] sm:$0xff]  ;;  %s3063_s1 = smov 16  }
0x1638   :  { %v936_v33 = vpack.c.bf16 %v932_v18, %v931_v2 }
0x163a   :  { %2666 = vmatmul.mubr.msk.bf16.gmra.mrb[20].mxu0 %vm168_vm3, %v936_v33 }
0x163b   :  { %2683 = vmatprep.mubr.msk.bf16.mxu0 %vm3058_vm2, %v3057_v10 }
0x1642   :  { %2684 = vmatmul.mubr.bf16.vlgmr.msra.gmra.mrb[24].mxu0 %v3059_v17 }
0x1643   :  { %2696 = vmatpush3.bf16.msra.mxu0 %v3403_v62  ;;  %2699 = vmatprep.mubr.msk.bf16.mxu0 %vm3058_vm2, %v3057_v10 }
0x1644   :  { %2697 = vmatprep.subr.bf16.mxu0 %v3057_v10 }
0x1647   :  { %2698 = vmatpush3.bf16.msra.mxu0 %v3412_v14 }
0x1648   :  { %2711 = vmatprep.subr.bf16.mxu0 %v3057_v10 }
0x16ed   :  { %v3461_v35 = vpop.f32.mrb[24].mxu1 }
0x16ee   :  { %v1319_v16 = vpop.f32.mrb[25].mxu1 }
0x16ef   :  { %v3463_v36 = vpop.f32.mrb[26].mxu1  ;;  %v1320_v43 = vadd.f32 %v3470_v42, %v1319_v16 }
0x16f0   :  { %v3465_v29 = vpop.f32.mrb[27].mxu1 }
0x170d   :  { %v2667_v38 = vpop.f32.mrb[20].mxu0 }
0x170e   :  { %v1022_v17 = vpop.f32.mrb[21].mxu0  ;;  %v3478_v54 = vadd.f32 %v2667_v38, %v3360_v34 }
0x170f   :  { %v2668_v39 = vpop.f32.mrb[22].mxu0  ;;  %v3475_v51 = vadd.f32 %v3360_v34, %v1022_v17 }
0x1710   :  { %v1025_v41 = vpop.f32.mrb[23].mxu0  ;;  %v1043_v40 = vmul.f32 0.5, %v3478_v54  ;;  %v3489_v1 = vadd.f32 %v2668_v39, %v3360_v34 }
0x1711   :  { %v1041_v32 = vmul.f32 0.5, %v3475_v51  ;;  %v3486_v52 = vadd.f32 %v3360_v34, %v1025_v41 }
0x1712   :  { %v1057_v56 = vmul.f32 1.442695, %v1043_v40  ;;  %v1044_v7 = vmul.f32 0.5, %v3489_v1 }
0x1713   :  { %v1053_v55 = vmul.f32 1.442695, %v1041_v32  ;;  %v1042_v3 = vmul.f32 0.5, %v3486_v52 }
0x1714   :  { %v1059_v11 = vmul.f32 1.442695, %v1044_v7 }
0x1715   :  { %v1400_v44 = vpop.f32.mrb[24].mxu0  ;;  %v1055_v9 = vmul.f32 1.442695, %v1042_v3 }
0x1716   :  { %v1406_v45 = vadd.f32 %v1400_v44, %v1320_v43  ;;  %v2685_v46 = vpop.f32.mrb[25].mxu0 }
0x1717   :  { %v1403_v47 = vpop.f32.mrb[26].mxu0 }
0x1718   :  { %2881 = vtanh.f32 %v1406_v45  ;;  %v2686_v15 = vpop.f32.mrb[27].mxu0  ;;  %v2491_v49 = vmul.f32 -1.442695, %v1406_v45 }
0x171a   :  { %2883 = vpow2.f32 %v2491_v49 }
0x1722   :  { %v2882_v48 = vpop.eup %2881 }
0x1723   :  { %1416 = vrot.lane.b32.xlu1 %v2882_v48, %s3060_s4  ;;  %v1323_v48 = vadd.f32 %v3470_v42, %v3465_v29 }
0x1724   :  { %v2884_v50 = vpop.eup %2883 }
0x1725   :  { %v1410_v53 = vadd.f32 1.0, %v2884_v50 }
0x1727   :  { %2885 = vrcp.f32 %v1410_v53 }
0x1728   :  { %2887 = vpow2.f32 %v1053_v55 }
0x1729   :  { %2889 = vpow2.f32 %v1057_v56 }
0x1731   :  { %v2886_v58 = vpop.eup %2885 }
0x1732   :  { %v2888_v63 = vpop.eup %2887  ;;  %v1414_v4 = vmul.f32 0.0, %v2886_v58 }
0x1733   :  { %v2890_v0 = vpop.eup %2889 }
0x1795   :  { %v1417_v59 = vpop.permute.xlu1 %1416 }
0x1796   :  { %v1419_v61 = vmul.f32 %v2886_v58, %v1417_v59 }
0x1798   :  { %1421 = vrot.lane.b32.xlu0 %v1419_v61, %s3060_s4 }
0x179c   :  { %1077 = vrot.lane.b32.xlu0 %v2888_v63, %s3062_s6 }
0x17a0   :  { %1081 = vrot.lane.b32.xlu0 %v2890_v0, %s3062_s6 }
0x180a   :  { %v1422_v5 = vpop.permute.xlu0 %1421 }
0x180b   :  { %v3492_v6 = vadd.f32 %v1422_v5, %v1414_v4 }
0x180d   :  { %2891 = vtanh.f32 %v3492_v6 }
0x180e   :  { %2893 = vpow2.f32 %v1055_v9  ;;  %v1078_v37 = vpop.permute.xlu0 %1077 }
0x180f   :  { %2895 = vpow2.f32 %v1059_v11  ;;  %v1097_v23 = vmul.f32 %v1078_v37, %v54_v13 }
0x1811   :  { %v1105_v2 = vadd.f32 %v1097_v23, %v3475_v51 }
0x1812   :  { %v1082_v28 = vpop.permute.xlu0 %1081 }
0x1813   :  { %v1099_v18 = vmul.f32 %v1082_v28, %v56_v27 }
0x1815   :  { %v1107_v39 = vadd.f32 %v1099_v18, %v3478_v54 }
0x1817   :  { %v2892_v57 = vpop.eup %2891 }
0x1818   :  { %1427 = vrot.lane.b32.xlu1 %v2892_v57, %s3060_s4  ;;  %v2894_v22 = vpop.eup %2893 }
0x1819   :  { %v2896_v34 = vpop.eup %2895 }
0x181c   :  { %1079 = vrot.lane.b32.xlu1 %v2894_v22, %s3062_s6 }
0x1820   :  { %1083 = vrot.lane.b32.xlu1 %v2896_v34, %s3062_s6 }
0x188a   :  { %v1428_v12 = vpop.permute.xlu1 %1427 }
0x188b   :  { %v3502_v19 = vmul.f32 %v2886_v58, %v1428_v12 }
0x188d   :  { %v1436_v24 = vpack.c.bf16 %v3502_v19, %v3502_v19 }
0x188e   :  { %v1080_v30 = vpop.permute.xlu1 %1079 }
0x188f   :  { %v1098_v31 = vmul.f32 %v1080_v30, %v55_v21  ;;  %1438 = vrot.lane.b32.xlu0 %v1436_v24, %s3061_s25 }
0x1891   :  { %v1106_v33 = vadd.f32 %v1098_v31, %v3486_v52 }
0x1892   :  { %v1084_v16 = vpop.permute.xlu1 %1083 }
0x1893   :  { %v1256_v38 = vpack.c.bf16 %v1106_v33, %v1105_v2  ;;  %v1100_v17 = vmul.f32 %v1084_v16, %v57_v8 }
0x1895   :  { %v1108_v41 = vadd.f32 %v1100_v17, %v3489_v1  ;;  %2675 = vmatprep.mubr.msk.bf16.mxu1 %vm1221_vm0, %v1256_v38 }
0x1897   :  { %v1257_v43 = vpack.c.bf16 %v1108_v41, %v1107_v39  ;;  %v1331_v39 = vadd.f32 %v3463_v36, %v3470_v42 }
0x1899   :  { %2676 = vmatmul.mubr.msk.bf16.gmra.mrb[28].mxu1 %vm1221_vm0, %v1257_v43 }
0x189a   :  { %2691 = vmatprep.mubr.msk.bf16.mxu1 %vm3058_vm2, %v3057_v10 }
0x1901   :  { %v1439_v44 = vpop.permute.xlu0 %1438 }
0x1902   :  { %2692 = vmatmul.mubr.msk.bf16.vlgmr.msra.gmra.mrb[32].mxu1 %vm168_vm3, %v1439_v44 }
0x1903   :  { %2704 = vmatpush3.bf16.msra.mxu1 %v3403_v62  ;;  %2707 = vmatprep.mubr.msk.bf16.mxu1 %vm3058_vm2, %v3057_v10 }
0x1904   :  { %2705 = vmatprep.subr.bf16.mxu1 %v3057_v10 }
0x1907   :  { %2706 = vmatpush3.bf16.msra.mxu1 %v3412_v14 }
0x1908   :  { %2719 = vmatprep.subr.bf16.mxu1 %v3057_v10 }
0x196c   :  { %v3531_v45 = vpop.f32.mrb[28].mxu1 }
0x196d   :  { %v3533_v46 = vpop.f32.mrb[29].mxu1 }
0x196e   :  { %v3535_v47 = vpop.f32.mrb[30].mxu1 }
0x196f   :  { %v3537_v15 = vpop.f32.mrb[31].mxu1 }
0x19d5   :  { %v1477_v49 = vpop.f32.mrb[32].mxu1 }
0x19d6   :  { %v1483_v50 = vadd.f32 %v1477_v49, %v1323_v48  ;;  %v2693_v53 = vpop.f32.mrb[33].mxu1 }
0x19d7   :  { %v1480_v32 = vpop.f32.mrb[34].mxu1 }
0x19d8   :  { %2897 = vtanh.f32 %v1483_v50  ;;  %v2694_v40 = vpop.f32.mrb[35].mxu1  ;;  %v2493_v56 = vmul.f32 -1.442695, %v1483_v50 }
0x19da   :  { %2899 = vpow2.f32 %v2493_v56 }
0x19e2   :  { %v2898_v55 = vpop.eup %2897 }
0x19e3   :  { %1493 = vrot.lane.b32.xlu1 %v2898_v55, %s3060_s4 }
0x19e4   :  { %v2900_v58 = vpop.eup %2899 }
0x19e5   :  { %v1487_v59 = vadd.f32 1.0, %v2900_v58 }
0x19e7   :  { %2901 = vrcp.f32 %v1487_v59 }
0x19f1   :  { %v2902_v61 = vpop.eup %2901 }
0x19f2   :  { %v1491_v29 = vmul.f32 %v2902_v61, %v3492_v6  ;;  %v1328_v6 = vadd.f32 %v3461_v35, %v3470_v42 }
0x1a55   :  { %v1494_v63 = vpop.permute.xlu1 %1493 }
0x1a56   :  { %v1496_v0 = vmul.f32 %v2902_v61, %v1494_v63 }
0x1a58   :  { %1498 = vrot.lane.b32.xlu0 %v1496_v0, %s3060_s4 }
0x1aca   :  { %v1499_v3 = vpop.permute.xlu0 %1498 }
0x1acb   :  { %v1501_v4 = vadd.f32 %v1499_v3, %v1491_v29 }
0x1acd   :  { %2903 = vtanh.f32 %v1501_v4 }
0x1ad7   :  { %v2904_v5 = vpop.eup %2903 }
0x1ad8   :  { %1504 = vrot.lane.b32.xlu1 %v2904_v5, %s3060_s4  ;;  %v1336_v5 = vadd.f32 %v3470_v42, %v3533_v46 }
0x1b4a   :  { %v1505_v7 = vpop.permute.xlu1 %1504 }
0x1b4b   :  { %v3545_v9 = vmul.f32 %v2902_v61, %v1505_v7 }
0x1b4d   :  { %v1513_v11 = vpack.c.bf16 %v3545_v9, %v3545_v9 }
0x1b4f   :  { %1515 = vrot.lane.b32.xlu0 %v1513_v11, %s3061_s25 }
0x1bc1   :  { %v1516_v57 = vpop.permute.xlu0 %1515 }
0x1bc2   :  { %2700 = vmatmul.mubr.msk.bf16.vlgmr.msra.gmra.mrb[28].mxu0 %vm168_vm3, %v1516_v57 }
0x1bc3   :  { %2712 = vmatpush3.bf16.msra.mxu0 %v3403_v62  ;;  %2715 = vmatprep.mubr.msk.bf16.mxu0 %vm3058_vm2, %v3057_v10 }
0x1bc4   :  { %2713 = vmatprep.subr.bf16.mxu0 %v3057_v10 }
0x1bc7   :  { %2714 = vmatpush3.bf16.msra.mxu0 %v3412_v14 }
0x1bc8   :  { %2727 = vmatprep.subr.bf16.mxu0 %v3057_v10 }
0x1c95   :  { %v1554_v22 = vpop.f32.mrb[28].mxu0 }
0x1c96   :  { %v1560_v34 = vadd.f32 %v1554_v22, %v1328_v6  ;;  %v2701_v37 = vpop.f32.mrb[29].mxu0 }
0x1c97   :  { %v1557_v13 = vpop.f32.mrb[30].mxu0 }
0x1c98   :  { %2905 = vtanh.f32 %v1560_v34  ;;  %v2702_v12 = vpop.f32.mrb[31].mxu0  ;;  %v2495_v23 = vmul.f32 -1.442695, %v1560_v34 }
0x1c9a   :  { %2907 = vpow2.f32 %v2495_v23 }
0x1ca2   :  { %v2906_v21 = vpop.eup %2905 }
0x1ca3   :  { %1570 = vrot.lane.b32.xlu1 %v2906_v21, %s3060_s4 }
0x1ca4   :  { %v2908_v24 = vpop.eup %2907 }
0x1ca5   :  { %v1564_v27 = vadd.f32 1.0, %v2908_v24 }
0x1ca7   :  { %2909 = vrcp.f32 %v1564_v27 }
0x1cb1   :  { %v2910_v28 = vpop.eup %2909 }
0x1cb2   :  { %v1568_v35 = vmul.f32 %v2910_v28, %v1501_v4 }
0x1d15   :  { %v1571_v30 = vpop.permute.xlu1 %1570 }
0x1d16   :  { %v1573_v31 = vmul.f32 %v2910_v28, %v1571_v30 }
0x1d18   :  { %1575 = vrot.lane.b32.xlu0 %v1573_v31, %s3060_s4 }
0x1d8a   :  { %v1576_v8 = vpop.permute.xlu0 %1575 }
0x1d8b   :  { %v1578_v2 = vadd.f32 %v1576_v8, %v1568_v35 }
0x1d8d   :  { %2911 = vtanh.f32 %v1578_v2 }
0x1d97   :  { %v2912_v18 = vpop.eup %2911 }
0x1d98   :  { %1581 = vrot.lane.b32.xlu1 %v2912_v18, %s3060_s4  ;;  %v1339_v18 = vadd.f32 %v3470_v42, %v3537_v15 }
0x1e0a   :  { %v1582_v33 = vpop.permute.xlu1 %1581 }
0x1e0b   :  { %v3562_v16 = vmul.f32 %v2910_v28, %v1582_v33 }
0x1e0d   :  { %v1590_v38 = vpack.c.bf16 %v3562_v16, %v3562_v16 }
0x1e0f   :  { %1592 = vrot.lane.b32.xlu0 %v1590_v38, %s3061_s25 }
0x1e81   :  { %v1593_v17 = vpop.permute.xlu0 %1592 }
0x1e82   :  { %2708 = vmatmul.mubr.msk.bf16.vlgmr.msra.gmra.mrb[36].mxu1 %vm168_vm3, %v1593_v17 }
0x1e83   :  { %2720 = vmatpush3.bf16.msra.mxu1 %v3403_v62  ;;  %2723 = vmatprep.mubr.msk.bf16.mxu1 %vm3058_vm2, %v3057_v10 }
0x1e84   :  { %2721 = vmatprep.subr.bf16.mxu1 %v3057_v10 }
0x1e87   :  { %2722 = vmatpush3.bf16.msra.mxu1 %v3412_v14 }
0x1e88   :  { %2735 = vmatprep.subr.bf16.mxu1 %v3057_v10 }
0x1f55   :  { %v1631_v41 = vpop.f32.mrb[36].mxu1 }
0x1f56   :  { %v1637_v43 = vadd.f32 %v1631_v41, %v1331_v39  ;;  %v2709_v44 = vpop.f32.mrb[37].mxu1 }
0x1f57   :  { %v1634_v48 = vpop.f32.mrb[38].mxu1 }
0x1f58   :  { %2913 = vtanh.f32 %v1637_v43  ;;  %v2710_v49 = vpop.f32.mrb[39].mxu1  ;;  %v2497_v53 = vmul.f32 -1.442695, %v1637_v43 }
0x1f5a   :  { %2915 = vpow2.f32 %v2497_v53 }
0x1f62   :  { %v2914_v50 = vpop.eup %2913 }
0x1f63   :  { %1647 = vrot.lane.b32.xlu1 %v2914_v50, %s3060_s4 }
0x1f64   :  { %v2916_v32 = vpop.eup %2915 }
0x1f65   :  { %v1641_v40 = vadd.f32 1.0, %v2916_v32 }
0x1f67   :  { %2917 = vrcp.f32 %v1641_v40 }
0x1f71   :  { %v2918_v55 = vpop.eup %2917 }
0x1f72   :  { %v1645_v36 = vmul.f32 %v2918_v55, %v1578_v2 }
0x1fd5   :  { %v1648_v56 = vpop.permute.xlu1 %1647 }
0x1fd6   :  { %v1650_v58 = vmul.f32 %v2918_v55, %v1648_v56 }
0x1fd8   :  { %1652 = vrot.lane.b32.xlu0 %v1650_v58, %s3060_s4 }
0x204a   :  { %v1653_v59 = vpop.permute.xlu0 %1652 }
0x204b   :  { %v1655_v61 = vadd.f32 %v1653_v59, %v1645_v36  ;;  %v1344_v36 = vadd.f32 %v3531_v45, %v3470_v42 }
0x204d   :  { %2919 = vtanh.f32 %v1655_v61 }
0x2057   :  { %v2920_v63 = vpop.eup %2919 }
0x2058   :  { %1658 = vrot.lane.b32.xlu1 %v2920_v63, %s3060_s4 }
0x20ca   :  { %v1659_v0 = vpop.permute.xlu1 %1658 }
0x20cb   :  { %v3579_v29 = vmul.f32 %v2918_v55, %v1659_v0 }
0x20cd   :  { %v1667_v3 = vpack.c.bf16 %v3579_v29, %v3579_v29 }
0x20cf   :  { %1669 = vrot.lane.b32.xlu0 %v1667_v3, %s3061_s25 }
0x2141   :  { %v1670_v4 = vpop.permute.xlu0 %1669 }
0x2142   :  { %2716 = vmatmul.mubr.msk.bf16.vlgmr.msra.gmra.mrb[32].mxu0 %vm168_vm3, %v1670_v4 }
0x2143   :  { %2728 = vmatpush3.bf16.msra.mxu0 %v3403_v62  ;;  %2731 = vmatprep.mubr.msk.bf16.mxu0 %vm3058_vm2, %v3057_v10 }
0x2144   :  { %2729 = vmatprep.subr.bf16.mxu0 %v3057_v10 }
0x2147   :  { %2730 = vmatpush3.bf16.msra.mxu0 %v3412_v14 }
0x2215   :  { %v1708_v7 = vpop.f32.mrb[32].mxu0 }
0x2216   :  { %v1714_v11 = vadd.f32 %v1708_v7, %v1336_v5  ;;  %v2717_v57 = vpop.f32.mrb[33].mxu0 }
0x2217   :  { %v1711_v6 = vpop.f32.mrb[34].mxu0 }
0x2218   :  { %2921 = vtanh.f32 %v1714_v11  ;;  %v2718_v22 = vpop.f32.mrb[35].mxu0  ;;  %v2499_v37 = vmul.f32 -1.442695, %v1714_v11 }
0x221a   :  { %2923 = vpow2.f32 %v2499_v37 }
0x2222   :  { %v2922_v34 = vpop.eup %2921 }
0x2223   :  { %1724 = vrot.lane.b32.xlu1 %v2922_v34, %s3060_s4 }
0x2224   :  { %v2924_v13 = vpop.eup %2923 }
0x2225   :  { %v1718_v12 = vadd.f32 1.0, %v2924_v13 }
0x2227   :  { %2925 = vrcp.f32 %v1718_v12 }
0x2231   :  { %v2926_v21 = vpop.eup %2925 }
0x2232   :  { %v1722_v46 = vmul.f32 %v2926_v21, %v1655_v61 }
0x2295   :  { %v1725_v23 = vpop.permute.xlu1 %1724 }
0x2296   :  { %v1727_v24 = vmul.f32 %v2926_v21, %v1725_v23 }
0x2298   :  { %1729 = vrot.lane.b32.xlu0 %v1727_v24, %s3060_s4 }
0x230a   :  { %v1730_v27 = vpop.permute.xlu0 %1729 }
0x230b   :  { %v1732_v28 = vadd.f32 %v1730_v27, %v1722_v46  ;;  %v1347_v46 = vadd.f32 %v3535_v47, %v3470_v42  ;;  %v1141_v42 = vmul.f32 %v3363_v25, %v3363_v25  ;;  %v1143_v47 = vmul.f32 %v3366_v26, %v3366_v26 }
0x230d   :  { %2927 = vtanh.f32 %v1732_v28 }
0x2317   :  { %v2928_v30 = vpop.eup %2927 }
0x2318   :  { %1735 = vrot.lane.b32.xlu1 %v2928_v30, %s3060_s4 }
0x238a   :  { %v1736_v31 = vpop.permute.xlu1 %1735 }
0x238b   :  { %v3595_v35 = vmul.f32 %v2926_v21, %v1736_v31 }
0x238d   :  { %v1744_v8 = vpack.c.bf16 %v3595_v35, %v3595_v35 }
0x238f   :  { %1746 = vrot.lane.b32.xlu0 %v1744_v8, %s3061_s25 }
0x2401   :  { %v1747_v2 = vpop.permute.xlu0 %1746 }
0x2402   :  { %2724 = vmatmul.mubr.msk.bf16.vlgmr.msra.gmra.mrb[40].mxu1 %vm168_vm3, %v1747_v2 }
0x2403   :  { %2736 = vmatpush3.bf16.msra.mxu1 %v3403_v62  ;;  %2739 = vmatprep.mubr.msk.bf16.mxu1 %vm3058_vm2, %v3057_v10 }
0x2404   :  { %2737 = vmatprep.subr.bf16.mxu1 %v3057_v10 }
0x2407   :  { %2738 = vmatpush3.bf16.msra.mxu1 %v3412_v14 }
0x24d5   :  { %v1785_v33 = vpop.f32.mrb[40].mxu1 }
0x24d6   :  { %v1791_v38 = vadd.f32 %v1785_v33, %v1339_v18  ;;  %v2725_v17 = vpop.f32.mrb[41].mxu1 }
0x24d7   :  { %v1788_v39 = vpop.f32.mrb[42].mxu1 }
0x24d8   :  { %2929 = vtanh.f32 %v1791_v38  ;;  %v2726_v41 = vpop.f32.mrb[43].mxu1  ;;  %v2501_v62 = vmul.f32 -1.442695, %v1791_v38 }
0x24da   :  { %2931 = vpow2.f32 %v2501_v62 }
0x24e2   :  { %v2930_v43 = vpop.eup %2929 }
0x24e3   :  { %1801 = vrot.lane.b32.xlu1 %v2930_v43, %s3060_s4 }
0x24e4   :  { %v2932_v44 = vpop.eup %2931 }
0x24e5   :  { %v1795_v48 = vadd.f32 1.0, %v2932_v44 }
0x24e7   :  { %2933 = vrcp.f32 %v1795_v48 }
0x24f1   :  { %v2934_v10 = vpop.eup %2933 }
0x24f2   :  { %v1799_v15 = vmul.f32 %v2934_v10, %v1732_v28 }
0x2555   :  { %v1802_v49 = vpop.permute.xlu1 %1801 }
0x2556   :  { %v1804_v14 = vmul.f32 %v2934_v10, %v1802_v49 }
0x2558   :  { %1806 = vrot.lane.b32.xlu0 %v1804_v14, %s3060_s4 }
0x25ca   :  { %v1807_v50 = vpop.permute.xlu0 %1806 }
0x25cb   :  { %v1809_v53 = vadd.f32 %v1807_v50, %v1799_v15  ;;  %v2775_v15 = vld [vmem:[%s3968_s10] sm:$0xff]   ;;  %v2776_v50 = vld [vmem:[%s3968_s10 + $0x8] sm:$0xff]  }
0x25cc   :  { %2743 = vmatprep.subr.bf16.mxu0 %v2775_v15 }
0x25cd   :  { %2935 = vtanh.f32 %v1809_v53 }
0x25d7   :  { %v2936_v32 = vpop.eup %2935 }
0x25d8   :  { %1812 = vrot.lane.b32.xlu1 %v2936_v32, %s3060_s4 }
0x264a   :  { %v1813_v40 = vpop.permute.xlu1 %1812 }
0x264b   :  { %v3611_v55 = vmul.f32 %v2934_v10, %v1813_v40 }
0x264d   :  { %v1821_v56 = vpack.c.bf16 %v3611_v55, %v3611_v55 }
0x264f   :  { %1823 = vrot.lane.b32.xlu0 %v1821_v56, %s3061_s25 }
0x26c1   :  { %v1824_v58 = vpop.permute.xlu0 %1823 }
0x26c2   :  { %2732 = vmatmul.mubr.msk.bf16.vlgmr.msra.gmra.mrb[36].mxu0 %vm168_vm3, %v1824_v58 }
0x26c3   :  { %2744 = vmatpush3.bf16.msra.mxu0 %v2775_v15 }
0x26c4   :  { %2745 = vmatprep.subr.bf16.mxu0 %v2776_v50 }
0x26c7   :  { %2746 = vmatpush3.bf16.msra.mxu0 %v2776_v50 }
0x2795   :  { %v1862_v59 = vpop.f32.mrb[36].mxu0 }
0x2796   :  { %v1868_v61 = vadd.f32 %v1862_v59, %v1344_v36  ;;  %v2733_v63 = vpop.f32.mrb[37].mxu0 }
0x2797   :  { %v1865_v0 = vpop.f32.mrb[38].mxu0 }
0x2798   :  { %2937 = vtanh.f32 %v1868_v61  ;;  %v2734_v3 = vpop.f32.mrb[39].mxu0  ;;  %v2503_v5 = vmul.f32 -1.442695, %v1868_v61 }
0x2799   :  { %v1142_v3 = vmul.f32 %v3384_v60, %v3384_v60 }
0x279a   :  { %2939 = vpow2.f32 %v2503_v5 }
0x27a2   :  { %v2938_v4 = vpop.eup %2937 }
0x27a3   :  { %1878 = vrot.lane.b32.xlu1 %v2938_v4, %s3060_s4 }
0x27a4   :  { %v2940_v7 = vpop.eup %2939 }
0x27a5   :  { %v1872_v11 = vadd.f32 1.0, %v2940_v7  ;;  %v1144_v7 = vmul.f32 %v3387_v20, %v3387_v20 }
0x27a7   :  { %2941 = vrcp.f32 %v1872_v11 }
0x27b1   :  { %v2942_v57 = vpop.eup %2941 }
0x27b2   :  { %v1876_v45 = vmul.f32 %v2942_v57, %v1809_v53 }
0x2815   :  { %v1879_v6 = vpop.permute.xlu1 %1878 }
0x2816   :  { %v1881_v22 = vmul.f32 %v2942_v57, %v1879_v6 }
0x2818   :  { %1883 = vrot.lane.b32.xlu0 %v1881_v22, %s3060_s4  ;;  %v1146_v22 = vmul.f32 %v3486_v52, %v3486_v52 }
0x288a   :  { %v1884_v34 = vpop.permute.xlu0 %1883 }
0x288b   :  { %v1886_v37 = vadd.f32 %v1884_v34, %v1876_v45 }
0x288d   :  { %2943 = vtanh.f32 %v1886_v37 }
0x2897   :  { %v2944_v13 = vpop.eup %2943 }
0x2898   :  { %1889 = vrot.lane.b32.xlu1 %v2944_v13, %s3060_s4 }
0x290a   :  { %v1890_v12 = vpop.permute.xlu1 %1889 }
0x290b   :  { %v1892_v21 = vmul.f32 %v2942_v57, %v1890_v12  ;;  %v1148_v12 = vmul.f32 %v3489_v1, %v3489_v1 }
0x290d   :  { %v1898_v23 = vpack.c.bf16 %v1892_v21, %v1892_v21 }
0x290f   :  { %1900 = vrot.lane.b32.xlu0 %v1898_v23, %s3061_s25 }
0x2981   :  { %v1901_v24 = vpop.permute.xlu0 %1900 }
0x2982   :  { %2740 = vmatmul.mubr.msk.bf16.vlgmr.msra.gmra.mrb[44].mxu1 %vm168_vm3, %v1901_v24 }
0x2a55   :  { %v1939_v27 = vpop.f32.mrb[44].mxu1 }
0x2a56   :  { %v1945_v28 = vadd.f32 %v1939_v27, %v1347_v46  ;;  %v2741_v30 = vpop.f32.mrb[45].mxu1 }
0x2a57   :  { %v1942_v31 = vpop.f32.mrb[46].mxu1 }
0x2a58   :  { %2945 = vtanh.f32 %v1945_v28  ;;  %v2742_v8 = vpop.f32.mrb[47].mxu1  ;;  %v2505_v18 = vmul.f32 -1.442695, %v1945_v28 }
0x2a5a   :  { %2947 = vpow2.f32 %v2505_v18 }
0x2a62   :  { %v2946_v2 = vpop.eup %2945 }
0x2a63   :  { %1955 = vrot.lane.b32.xlu1 %v2946_v2, %s3060_s4 }
0x2a64   :  { %v2948_v33 = vpop.eup %2947 }
0x2a65   :  { %v1949_v38 = vadd.f32 1.0, %v2948_v33 }
0x2a67   :  { %2949 = vrcp.f32 %v1949_v38 }
0x2a71   :  { %v2950_v17 = vpop.eup %2949 }
0x2ad5   :  { %v1956_v39 = vpop.permute.xlu1 %1955 }
0x2ad6   :  { %v1958_v41 = vmul.f32 %v2950_v17, %v1956_v39 }
0x2ad8   :  { %1960 = vrot.lane.b32.xlu0 %v1958_v41, %s3060_s4 }
0x2adc   :  { %1432 = vrot.lane.b32.xlu0 %v3502_v19, %s3061_s25  ;;  %v1145_v19 = vmul.f32 %v3475_v51, %v3475_v51 }
0x2ae0   :  { %1586 = vrot.lane.b32.xlu0 %v3562_v16, %s3061_s25  ;;  %v1147_v16 = vmul.f32 %v3478_v54, %v3478_v54 }
0x2ae4   :  { %1740 = vrot.lane.b32.xlu0 %v3595_v35, %s3061_s25  ;;  %v1953_v35 = vmul.f32 %v2950_v17, %v1886_v37 }
0x2ae8   :  { %1894 = vrot.lane.b32.xlu0 %v1892_v21, %s3061_s25 }
0x2aec   :  { %1157 = vrot.lane.b32.xlu0 %v1141_v42, %s3063_s1 }
0x2af0   :  { %1161 = vrot.lane.b32.xlu0 %v1143_v47, %s3063_s1 }
0x2af4   :  { %1165 = vrot.lane.b32.xlu0 %v1145_v19, %s3063_s1 }
0x2af8   :  { %1169 = vrot.lane.b32.xlu0 %v1147_v16, %s3063_s1 }
0x2b4a   :  { %v1961_v43 = vpop.permute.xlu0 %1960 }
0x2b4b   :  { %v1963_v62 = vadd.f32 %v1961_v43, %v1953_v35 }
0x2b4d   :  { %2951 = vtanh.f32 %v1963_v62 }
0x2b4e   :  { %v1433_v44 = vpop.permute.xlu0 %1432 }
0x2b4f   :  { %1435 = vst.msk [vmem:[#allocation2] sm:$0xff] %vm168_vm3, %v1433_v44 }
0x2b52   :  { %v1587_v48 = vpop.permute.xlu0 %1586 }
0x2b53   :  { %1589 = vst.msk [vmem:[#allocation2 + $0x10] sm:$0xff] %vm168_vm3, %v1587_v48 }
0x2b56   :  { %v1741_v10 = vpop.permute.xlu0 %1740  ;;  %v3664_v53 = vld [vmem:[#allocation2] sm:$0xff] }
0x2b57   :  { %v2952_v49 = vpop.eup %2951  ;;  %1743 = vst.msk [vmem:[#allocation2 + $0x20] sm:$0xff] %vm168_vm3, %v1741_v10  ;;  %vm1991_vm10 = vcmp.ne.f32.partialorder %v3664_v53, %v3664_v53 }
0x2b58   :  { %1966 = vrot.lane.b32.xlu1 %v2952_v49, %s3060_s4 }
0x2b5a   :  { %v1895_v14 = vpop.permute.xlu0 %1894  ;;  %v3667_v32 = vld [vmem:[#allocation2 + $0x10] sm:$0xff] }
0x2b5b   :  { %1897 = vst.msk [vmem:[#allocation2 + $0x30] sm:$0xff] %vm168_vm3, %v1895_v14  ;;  %v2009_v40 = vand.u32 2147483647, %v3667_v32  ;;  %vm1993_vm14 = vcmp.ne.f32.partialorder %v3667_v32, %v3667_v32 }
0x2b5c   :  { %1509 = vrot.lane.b32.xlu1 %v3545_v9, %s3061_s25  ;;  %v2007_v9 = vand.u32 2147483647, %v3664_v53 }
0x2b5e   :  { %v2015_v56 = vsub.f32 0.0, %v2007_v9  ;;  %v3670_v58 = vld [vmem:[#allocation2 + $0x20] sm:$0xff] }
0x2b5f   :  { %v2011_v63 = vand.u32 2147483647, %v3670_v58  ;;  %vm1995_vm5 = vcmp.ne.f32.partialorder %v3670_v58, %v3670_v58 }
0x2b60   :  { %1663 = vrot.lane.b32.xlu1 %v3579_v29, %s3061_s25  ;;  %v2017_v29 = vsub.f32 0.0, %v2009_v40  ;;  %v2023_v61 = vmul.f32 1.442695, %v2015_v56 }
0x2b61   :  { %v2019_v4 = vsub.f32 0.0, %v2011_v63 }
0x2b62   :  { %v2027_v0 = vmul.f32 1.442695, %v2017_v29  ;;  %2953 = vpow2.f32 %v2023_v61 }
0x2b63   :  { %v2031_v11 = vmul.f32 1.442695, %v2019_v4 }
0x2b64   :  { %1817 = vrot.lane.b32.xlu1 %v3611_v55, %s3061_s25  ;;  %2955 = vpow2.f32 %v2027_v0 }
0x2b65   :  { %2957 = vpow2.f32 %v2031_v11 }
0x2b6c   :  { %v2954_v34 = vpop.eup %2953 }
0x2b6d   :  { %v2039_v46 = vadd.f32 1.0, %v2954_v34  ;;  %v2042_v39 = vmul.f32 -0.5, %v2954_v34  ;;  %v2045_v35 = vand.u32 2147483647, %v2954_v34 }
0x2b6e   :  { %v2956_v24 = vpop.eup %2955 }
0x2b6f   :  { %v2057_v31 = vadd.f32 1.0, %v2956_v24  ;;  %v2958_v18 = vpop.eup %2957  ;;  %v2060_v47 = vmul.f32 -0.5, %v2956_v24  ;;  %v2043_v16 = vadd.f32 1.0, %v2042_v39  ;;  %v2063_v15 = vand.u32 2147483647, %v2956_v24 }
0x2b70   :  { %v2075_v38 = vadd.f32 1.0, %v2958_v18  ;;  %vm2046_vm2 = vcmp.lt.f32.partialorder %v2045_v35, 0.0004427343  ;;  %v2078_v9 = vmul.f32 -0.5, %v2958_v18 }
0x2b71   :  { %v2061_v10 = vadd.f32 1.0, %v2060_v47  ;;  %v2044_v14 = vmul.f32 %v2954_v34, %v2043_v16  ;;  %vm3699_vm8 = vcmp.lt.f32.partialorder %v2063_v15, 0.0004427343 }
0x2b72   :  { %v2079_v11 = vadd.f32 1.0, %v2078_v9  ;;  %v1981_v9 = vld [vmem:[#allocation2 + $0x30] sm:$0xff] }
0x2b73   :  { %v2062_v63 = vmul.f32 %v2956_v24, %v2061_v10 }
0x2bca   :  { %v1967_v36 = vpop.permute.xlu1 %1966 }
0x2bcb   :  { %v1969_v59 = vmul.f32 %v2950_v17, %v1967_v36 }
0x2bcd   :  { %1971 = vrot.lane.b32.xlu1 %v1969_v59, %s3061_s25  ;;  %v1983_v59 = vmax.f32 %v3664_v53, 0.0 }
0x2bce   :  { %v1510_v55 = vpop.permute.xlu1 %1509 }
0x2bcf   :  { %1512 = vst.msk [vmem:[#allocation2 + $0x8] sm:$0xff] %vm168_vm3, %v1510_v55 }
0x2bd1   :  { %1159 = vrot.lane.b32.xlu1 %v1142_v3, %s3063_s1  ;;  %v2081_v3 = vand.u32 2147483647, %v2958_v18 }
0x2bd2   :  { %v1664_v5 = vpop.permute.xlu1 %1663 }
0x2bd3   :  { %1666 = vst.msk [vmem:[#allocation2 + $0x18] sm:$0xff] %vm168_vm3, %v1664_v5  ;;  %vm3709_vm11 = vcmp.lt.f32.partialorder %v2081_v3, 0.0004427343 }
0x2bd5   :  { %1163 = vrot.lane.b32.xlu1 %v1144_v7, %s3063_s1 }
0x2bd6   :  { %v1818_v57 = vpop.permute.xlu1 %1817  ;;  %v3682_v6 = vld [vmem:[#allocation2 + $0x8] sm:$0xff] }
0x2bd7   :  { %1820 = vst.msk [vmem:[#allocation2 + $0x28] sm:$0xff] %vm168_vm3, %v1818_v57  ;;  %v2008_v45 = vand.u32 2147483647, %v3682_v6  ;;  %vm1992_vm12 = vcmp.ne.f32.partialorder %v3682_v6, %v3682_v6 }
0x2bd9   :  { %1167 = vrot.lane.b32.xlu1 %v1146_v22, %s3063_s1  ;;  %v2016_v37 = vsub.f32 0.0, %v2008_v45 }
0x2bda   :  { %v3689_v13 = vld [vmem:[#allocation2 + $0x18] sm:$0xff] }
0x2bdb   :  { %v2025_v21 = vmul.f32 1.442695, %v2016_v37  ;;  %v2010_v23 = vand.u32 2147483647, %v3689_v13  ;;  %v1984_v37 = vmax.f32 %v3682_v6, 0.0  ;;  %vm1994_vm15 = vcmp.ne.f32.partialorder %v3689_v13, %v3689_v13 }
0x2bdd   :  { %1171 = vrot.lane.b32.xlu1 %v1148_v12, %s3063_s1  ;;  %2959 = vpow2.f32 %v2025_v21  ;;  %v2018_v27 = vsub.f32 0.0, %v2010_v23  ;;  %v1985_v12 = vmax.f32 %v3667_v32, 0.0 }
0x2bde   :  { %v3695_v28 = vld [vmem:[#allocation2 + $0x28] sm:$0xff]  ;;  %2961 = vlog2.f32 %v2039_v46 }
0x2bdf   :  { %v2029_v30 = vmul.f32 1.442695, %v2018_v27  ;;  %v2012_v8 = vand.u32 2147483647, %v3695_v28  ;;  %vm1996_vm6 = vcmp.ne.f32.partialorder %v3695_v28, %v3695_v28 }
0x2be1   :  { %2963 = vpow2.f32 %v2029_v30  ;;  %v2020_v2 = vsub.f32 0.0, %v2012_v8 }
0x2be2   :  { %2965 = vlog2.f32 %v2057_v31 }
0x2be3   :  { %v2033_v33 = vmul.f32 1.442695, %v2020_v2  ;;  %v2080_v2 = vmul.f32 %v2958_v18, %v2079_v11 }
0x2be5   :  { %2967 = vpow2.f32 %v2033_v33 }
0x2be6   :  { %2969 = vlog2.f32 %v2075_v38 }
0x2be7   :  { %v2960_v17 = vpop.eup %2959 }
0x2be8   :  { %v2048_v41 = vadd.f32 1.0, %v2960_v17  ;;  %v2962_v42 = vpop.eup %2961  ;;  %v2051_v48 = vmul.f32 -0.5, %v2960_v17  ;;  %v2054_v61 = vand.u32 2147483647, %v2960_v17 }
0x2be9   :  { %v2041_v44 = vmul.f32 0.6931472, %v2962_v42 }
0x2bea   :  { %2971 = vlog2.f32 %v2048_v41  ;;  %v2052_v36 = vadd.f32 1.0, %v2051_v48  ;;  %vm2055_vm9 = vcmp.lt.f32.partialorder %v2054_v61, 0.0004427343  ;;  %v1986_v41 = vmax.f32 %v3689_v13, 0.0 }
0x2beb   :  { %v2964_v19 = vpop.eup %2963  ;;  %v2047_v56 = vsel %vm2046_vm2, %v2044_v14, %v2041_v44  ;;  %v1988_v48 = vmax.f32 %v3695_v28, 0.0 }
0x2bec   :  { %v2066_v43 = vadd.f32 1.0, %v2964_v19  ;;  %v2966_v62 = vpop.eup %2965  ;;  %v2069_v29 = vmul.f32 -0.5, %v2964_v19  ;;  %v2111_v5 = vadd.f32 %v2047_v56, %v1983_v59  ;;  %v2053_v22 = vmul.f32 %v2960_v17, %v2052_v36 }
0x2bed   :  { %v2059_v50 = vmul.f32 0.6931472, %v2966_v62  ;;  %v2072_v21 = vand.u32 2147483647, %v2964_v19 }
0x2bee   :  { %2973 = vlog2.f32 %v2066_v43  ;;  %v2070_v45 = vadd.f32 1.0, %v2069_v29  ;;  %v2119_v31 = vsel %vm1991_vm10, %v3664_v53, %v2111_v5  ;;  %v1987_v43 = vmax.f32 %v3670_v58, 0.0 }
0x2bef   :  { %v2968_v49 = vpop.eup %2967  ;;  %v2065_v7 = vsel %vm3699_vm8, %v2062_v63, %v2059_v50  ;;  %vm2073_vm13 = vcmp.lt.f32.partialorder %v2072_v21, 0.0004427343  ;;  %vm1997_vm8 = vcmp.ne.f32.partialorder %v1981_v9, %v1981_v9 }
0x2bf0   :  { %v2084_v40 = vadd.f32 1.0, %v2968_v49  ;;  %v2970_v55 = vpop.eup %2969  ;;  %v2087_v34 = vmul.f32 -0.5, %v2968_v49  ;;  %v2113_v8 = vadd.f32 %v2065_v7, %v1985_v12  ;;  %v2071_v38 = vmul.f32 %v2964_v19, %v2070_v45 }
0x2bf1   :  { %v2077_v24 = vmul.f32 0.6931472, %v2970_v55  ;;  %v2090_v42 = vand.u32 2147483647, %v2968_v49 }
0x2bf2   :  { %2975 = vlog2.f32 %v2084_v40  ;;  %v2088_v17 = vadd.f32 1.0, %v2087_v34  ;;  %v2013_v40 = vand.u32 2147483647, %v1981_v9 }
0x2bf3   :  { %v2083_v35 = vsel %vm3709_vm11, %v2080_v2, %v2077_v24  ;;  %vm2091_vm4 = vcmp.lt.f32.partialorder %v2090_v42, 0.0004427343 }
0x2bf4   :  { %v2972_v4 = vpop.eup %2971  ;;  %v2089_v62 = vmul.f32 %v2968_v49, %v2088_v17  ;;  %v2115_v10 = vadd.f32 %v2083_v35, %v1987_v43  ;;  %v2021_v56 = vsub.f32 0.0, %v2013_v40  ;;  %v3742_v17 = vld [vmem:[%s3969_s11] ss:$0 sm:$0xff]  ;;  %v1129_v40 = vmul.f32 1.442695, %v3478_v54  ;;  %s3064_s11 = smov 124  }
0x2bf5   :  { %v2050_v57 = vmul.f32 0.6931472, %v2972_v4 }
0x2bf6   :  { %v2035_v36 = vmul.f32 1.442695, %v2021_v56 }
0x2bf7   :  { %v2056_v23 = vsel %vm2055_vm9, %v2053_v22, %v2050_v57 }
0x2bf8   :  { %v2974_v27 = vpop.eup %2973  ;;  %v2112_v30 = vadd.f32 %v2056_v23, %v1984_v37  ;;  %2977 = vpow2.f32 %v2035_v36  ;;  %v1989_v23 = vmax.f32 %v1981_v9, 0.0 }
0x2bf9   :  { %v2068_v33 = vmul.f32 0.6931472, %v2974_v27 }
0x2bfa   :  { %v2120_v39 = vsel %vm1992_vm12, %v3682_v6, %v2112_v30  ;;  %v2121_v6 = vsel %vm1993_vm14, %v3667_v32, %v2113_v8  ;;  %v2123_v32 = vsel %vm1995_vm5, %v3670_v58, %v2115_v10 }
0x2bfb   :  { %v2127_v47 = vpack.c.bf16 %v2120_v39, %v2119_v31  ;;  %v2074_v16 = vsel %vm2073_vm13, %v2071_v38, %v2068_v33 }
0x2bfc   :  { %v2976_v53 = vpop.eup %2975  ;;  %v2114_v18 = vadd.f32 %v2074_v16, %v1986_v41 }
0x2bfd   :  { %2747 = vmatprep.mubr.msk.bf16.mxu0 %vm168_vm3, %v2127_v47  ;;  %v2086_v19 = vmul.f32 0.6931472, %v2976_v53 }
0x2bfe   :  { %v2122_v44 = vsel %vm1994_vm15, %v3689_v13, %v2114_v18  ;;  %v1117_v18 = vmul.f32 1.442695, %v3363_v25 }
0x2bff   :  { %v2128_v14 = vpack.c.bf16 %v2122_v44, %v2121_v6  ;;  %v2092_v15 = vsel %vm2091_vm4, %v2089_v62, %v2086_v19  ;;  %v1119_v6 = vmul.f32 1.442695, %v3384_v60  ;;  %v1121_v19 = vmul.f32 1.442695, %v3366_v26 }
0x2c00   :  { %v2116_v50 = vadd.f32 %v2092_v15, %v1988_v48  ;;  %v1123_v62 = vmul.f32 1.442695, %v3387_v20  ;;  %v1125_v44 = vmul.f32 1.442695, %v3475_v51  ;;  %v1158_v15 = vpop.permute.xlu0 %1157 }
0x2c01   :  { %2748 = vmatmul.mubr.msk.bf16.vlgmr.msra.gmra.mrb[40].mxu0 %vm168_vm3, %v2128_v14  ;;  %v1127_v14 = vmul.f32 1.442695, %v3486_v52 }
0x2c02   :  { %v2124_v49 = vsel %vm1996_vm6, %v3695_v28, %v2116_v50  ;;  %v2978_v55 = vpop.eup %2977 }
0x2c03   :  { %v2129_v13 = vpack.c.bf16 %v2124_v49, %v2123_v32  ;;  %v2093_v58 = vadd.f32 1.0, %v2978_v55  ;;  %v2096_v4 = vmul.f32 -0.5, %v2978_v55  ;;  %v2099_v57 = vand.u32 2147483647, %v2978_v55 }
0x2c05   :  { %2751 = vmatprep.mubr.msk.bf16.mxu0 %vm168_vm3, %v2129_v13  ;;  %v2097_v7 = vadd.f32 1.0, %v2096_v4  ;;  %vm2100_vm7 = vcmp.lt.f32.partialorder %v2099_v57, 0.0004427343  ;;  %v1110_v4 = vadd.f32 1.0, %v3384_v60 }
0x2c07   :  { %v2098_v45 = vmul.f32 %v2978_v55, %v2097_v7  ;;  %v1109_v55 = vadd.f32 1.0, %v3363_v25 }
0x2c3f   :  { %v1972_v29 = vpop.permute.xlu1 %1971 }
0x2c40   :  { %1974 = vst.msk [vmem:[#allocation2 + $0x38] sm:$0xff] %vm168_vm3, %v1972_v29 }
0x2c43   :  { %v1160_v56 = vpop.permute.xlu1 %1159 }
0x2c47   :  { %v1982_v59 = vld [vmem:[#allocation2 + $0x38] sm:$0xff] }
0x2c48   :  { %v2014_v61 = vand.u32 2147483647, %v1982_v59  ;;  %v1990_v27 = vmax.f32 %v1982_v59, 0.0  ;;  %vm1998_vm9 = vcmp.ne.f32.partialorder %v1982_v59, %v1982_v59 }
0x2c4a   :  { %v2022_v63 = vsub.f32 0.0, %v2014_v61 }
0x2c4c   :  { %v2037_v0 = vmul.f32 1.442695, %v2022_v63  ;;  %v1131_v63 = vmul.f32 1.442695, %v3489_v1 }
0x2c4e   :  { %2979 = vpow2.f32 %v2037_v0 }
0x2c4f   :  { %2981 = vlog2.f32 %v2093_v58 }
0x2c58   :  { %v2980_v28 = vpop.eup %2979 }
0x2c59   :  { %v2102_v3 = vadd.f32 1.0, %v2980_v28  ;;  %v2982_v5 = vpop.eup %2981  ;;  %v2105_v11 = vmul.f32 -0.5, %v2980_v28  ;;  %v2108_v37 = vand.u32 2147483647, %v2980_v28 }
0x2c5a   :  { %v2095_v22 = vmul.f32 0.6931472, %v2982_v5 }
0x2c5b   :  { %2983 = vlog2.f32 %v2102_v3  ;;  %v2106_v34 = vadd.f32 1.0, %v2105_v11  ;;  %vm2109_vm2 = vcmp.lt.f32.partialorder %v2108_v37, 0.0004427343  ;;  %v1164_v11 = vpop.permute.xlu1 %1163 }
0x2c5c   :  { %v2101_v12 = vsel %vm2100_vm7, %v2098_v45, %v2095_v22  ;;  %v1111_v22 = vadd.f32 1.0, %v3366_v26 }
0x2c5d   :  { %v2107_v46 = vmul.f32 %v2980_v28, %v2106_v34  ;;  %v2117_v30 = vadd.f32 %v2101_v12, %v1989_v23  ;;  %v1162_v28 = vpop.permute.xlu0 %1161  ;;  %v1112_v12 = vadd.f32 1.0, %v3387_v20 }
0x2c5f   :  { %v2125_v2 = vsel %vm1997_vm8, %v1981_v9, %v2117_v30 }
0x2c65   :  { %v2984_v21 = vpop.eup %2983 }
0x2c66   :  { %v2104_v24 = vmul.f32 0.6931472, %v2984_v21  ;;  %v1166_v21 = vpop.permute.xlu0 %1165 }
0x2c68   :  { %v2110_v31 = vsel %vm2109_vm2, %v2107_v46, %v2104_v24  ;;  %v1113_v24 = vadd.f32 1.0, %v3475_v51 }
0x2c69   :  { %v2118_v8 = vadd.f32 %v2110_v31, %v1990_v27  ;;  %v1168_v27 = vpop.permute.xlu1 %1167 }
0x2c6b   :  { %v2126_v33 = vsel %vm1998_vm9, %v1982_v59, %v2118_v8  ;;  %v1114_v8 = vadd.f32 1.0, %v3486_v52 }
0x2c6c   :  { %v2130_v38 = vpack.c.bf16 %v2126_v33, %v2125_v2  ;;  %v1115_v33 = vadd.f32 1.0, %v3478_v54 }
0x2c6d   :  { %v1172_v52 = vpop.permute.xlu1 %1171 }
0x2c6e   :  { %2752 = vmatmul.mubr.msk.bf16.gmra.mrb[44].mxu0 %vm168_vm3, %v2130_v38  ;;  %vm2432_vm3 = vcmask 97280  }
0x2cd4   :  { %v2749_v39 = vpop.f32.mrb[40].mxu0 }
0x2cd5   :  { %v3745_v41 = vadd.f32 %v2749_v39, %v3742_v17  ;;  %v2200_v42 = vpop.f32.mrb[41].mxu0  ;;  %v1170_v39 = vpop.permute.xlu0 %1169 }
0x2cd6   :  { %v3748_v47 = vadd.f32 %v3742_v17, %v2200_v42  ;;  %v2750_v16 = vpop.f32.mrb[42].mxu0 }
0x2cd7   :  { %2985 = vtanh.f32 %v3745_v41  ;;  %v3752_v35 = vadd.f32 %v2750_v16, %v3742_v17  ;;  %v2203_v53 = vpop.f32.mrb[43].mxu0 }
0x2cd8   :  { %2987 = vtanh.f32 %v3748_v47  ;;  %v3757_v43 = vadd.f32 %v3742_v17, %v2203_v53  ;;  %v1116_v53 = vadd.f32 1.0, %v3489_v1 }
0x2cd9   :  { %2989 = vtanh.f32 %v3752_v35 }
0x2cda   :  { %2991 = vtanh.f32 %v3757_v43 }
0x2cdb   :  { %2993 = vpow2.f32 %v1117_v18 }
0x2cdc   :  { %2995 = vpow2.f32 %v1119_v6 }
0x2cdd   :  { %2997 = vpow2.f32 %v1121_v19 }
0x2cde   :  { %2999 = vpow2.f32 %v1123_v62 }
0x2cdf   :  { %3001 = vpow2.f32 %v1125_v44 }
0x2ce0   :  { %3003 = vpow2.f32 %v1127_v14 }
0x2ce1   :  { %v2986_v48 = vpop.eup %2985  ;;  %3005 = vpow2.f32 %v1129_v40 }
0x2ce2   :  { %v2988_v10 = vpop.eup %2987  ;;  %v3768_v50 = vsel %vm70_vm1, %v3745_v41, %v2986_v48  ;;  %v2241_v0 = vand.u32 2147483647, %v2986_v48  ;;  %3007 = vpow2.f32 %v1131_v63 }
0x2ce3   :  { %v2990_v32 = vpop.eup %2989  ;;  %v2239_v49 = vand.u32 2147483647, %v2988_v10  ;;  %v3772_v13 = vsel %vm70_vm1, %v3748_v47, %v2988_v10 }
0x2ce4   :  { %v2992_v9 = vpop.eup %2991  ;;  %v3777_v36 = vsel %vm70_vm1, %v3752_v35, %v2990_v32  ;;  %v2242_v5 = vand.u32 2147483647, %v2990_v32 }
0x2ce5   :  { %2263 = vrot.lane.b32.xlu0 %v2239_v49, %s3064_s11  ;;  %v2240_v29 = vand.u32 2147483647, %v2992_v9  ;;  %v3782_v59 = vsel %vm70_vm1, %v3757_v43, %v2992_v9  ;;  %v2994_v61 = vpop.eup %2993  ;;  %3009 = vlog2.f32 %v2239_v49 }
0x2ce6   :  { %v2996_v58 = vpop.eup %2995  ;;  %v1133_v3 = vsub.f32 %v1109_v55, %v2994_v61 }
0x2ce7   :  { %2265 = vrot.lane.b32.xlu1 %v2240_v29, %s3064_s11  ;;  %v2998_v7 = vpop.eup %2997  ;;  %v1134_v45 = vsub.f32 %v1110_v4, %v2996_v58  ;;  %3011 = vlog2.f32 %v2240_v29 }
0x2ce8   :  { %v1181_v57 = vsub.f32 %v1133_v3, %v1158_v15  ;;  %v3000_v25 = vpop.eup %2999  ;;  %v1135_v34 = vsub.f32 %v1111_v22, %v2998_v7  ;;  %3013 = vlog2.f32 %v2241_v0 }
0x2ce9   :  { %2267 = vrot.lane.b32.xlu0 %v2241_v0, %s3064_s11  ;;  %v1182_v37 = vsub.f32 %v1134_v45, %v1160_v56  ;;  %v3002_v60 = vpop.eup %3001  ;;  %v1136_v46 = vsub.f32 %v1112_v12, %v3000_v25  ;;  %3015 = vlog2.f32 %v2242_v5 }
0x2cea   :  { %v1183_v23 = vsub.f32 %v1135_v34, %v1162_v28  ;;  %v3004_v26 = vpop.eup %3003  ;;  %v1137_v30 = vsub.f32 %v1113_v24, %v3002_v60  ;;  %v3049_v34 = vld [vmem:[%s3959_s0] sm:$0xff] }
0x2ceb   :  { %2269 = vrot.lane.b32.xlu1 %v2242_v5, %s3064_s11  ;;  %v1184_v31 = vsub.f32 %v1136_v46, %v1164_v11  ;;  %v3006_v20 = vpop.eup %3005  ;;  %v1138_v38 = vsub.f32 %v1114_v8, %v3004_v26 }
0x2cec   :  { %v1185_v2 = vsub.f32 %v1137_v30, %v1166_v21  ;;  %v3008_v51 = vpop.eup %3007  ;;  %v1139_v42 = vsub.f32 %v1115_v33, %v3006_v20 }
0x2ced   :  { %1197 = vrot.lane.b32.xlu0 %v1181_v57, %s3062_s6  ;;  %v1186_v16 = vsub.f32 %v1138_v38, %v1168_v27  ;;  %v1140_v6 = vsub.f32 %v1116_v53, %v3008_v51 }
0x2cee   :  { %v1187_v18 = vsub.f32 %v1139_v42, %v1170_v39 }
0x2cef   :  { %1199 = vrot.lane.b32.xlu1 %v1182_v37, %s3062_s6  ;;  %v3010_v19 = vpop.eup %3009  ;;  %v1188_v62 = vsub.f32 %v1140_v6, %v1172_v52  ;;  %v2247_v37 = vsub.f32 %v3049_v34, %v3748_v47  ;;  %v3051_v47 = vld [vmem:[%s3959_s0 + $0x10] sm:$0xff] }
0x2cf0   :  { %v2320_v44 = vmul.f32 0.6931472, %v3010_v19 }
0x2cf1   :  { %1201 = vrot.lane.b32.xlu0 %v1183_v23, %s3062_s6  ;;  %v3012_v54 = vpop.eup %3011  ;;  %v3050_v23 = vld [vmem:[%s3959_s0 + $0x8] sm:$0xff] }
0x2cf2   :  { %v3014_v48 = vpop.eup %3013  ;;  %v2322_v10 = vmul.f32 0.6931472, %v3012_v54  ;;  %v2248_v24 = vsub.f32 %v3050_v23, %v3757_v43 }
0x2cf3   :  { %1203 = vrot.lane.b32.xlu1 %v1184_v31, %s3062_s6  ;;  %v3016_v1 = vpop.eup %3015  ;;  %v2324_v14 = vmul.f32 0.6931472, %v3014_v48  ;;  %v2249_v31 = vsub.f32 %v3051_v47, %v3745_v41 }
0x2cf4   :  { %v2326_v15 = vmul.f32 0.6931472, %v3016_v1 }
0x2cf5   :  { %1205 = vrot.lane.b32.xlu0 %v1185_v2, %s3062_s6  ;;  %v3052_v2 = vld [vmem:[%s3959_s0 + $0x18] sm:$0xff] }
0x2cf6   :  { %v2250_v43 = vsub.f32 %v3052_v2, %v3752_v35 }
0x2cf7   :  { %1207 = vrot.lane.b32.xlu1 %v1186_v16, %s3062_s6 }
0x2cf9   :  { %1209 = vrot.lane.b32.xlu0 %v1187_v18, %s3062_s6 }
0x2cfb   :  { %1211 = vrot.lane.b32.xlu1 %v1188_v62, %s3062_s6 }
0x2cfd   :  { %2343 = vrot.lane.b32.xlu0 %v2320_v44, %s3064_s11 }
0x2cff   :  { %2345 = vrot.lane.b32.xlu1 %v2322_v10, %s3064_s11 }
0x2d01   :  { %2347 = vrot.lane.b32.xlu0 %v2324_v14, %s3064_s11 }
0x2d03   :  { %2349 = vrot.lane.b32.xlu1 %v2326_v15, %s3064_s11 }
0x2d41   :  { %v2753_v32 = vpop.f32.mrb[44].mxu0 }
0x2d42   :  { %v3809_v49 = vadd.f32 %v2753_v32, %v3742_v17  ;;  %v2216_v9 = vpop.f32.mrb[45].mxu0 }
0x2d43   :  { %v3812_v40 = vadd.f32 %v3742_v17, %v2216_v9  ;;  %v2754_v56 = vpop.f32.mrb[46].mxu0 }
0x2d44   :  { %3017 = vtanh.f32 %v3809_v49  ;;  %v3816_v29 = vadd.f32 %v2754_v56, %v3742_v17  ;;  %v2219_v61 = vpop.f32.mrb[47].mxu0 }
0x2d45   :  { %3019 = vtanh.f32 %v3812_v40  ;;  %v3820_v63 = vadd.f32 %v3742_v17, %v2219_v61 }
0x2d46   :  { %3021 = vtanh.f32 %v3816_v29 }
0x2d47   :  { %3023 = vtanh.f32 %v3820_v63 }
0x2d4e   :  { %v3018_v55 = vpop.eup %3017 }
0x2d4f   :  { %v3020_v0 = vpop.eup %3019  ;;  %v3826_v58 = vsel %vm70_vm1, %v3809_v49, %v3018_v55  ;;  %v2245_v16 = vand.u32 2147483647, %v3018_v55 }
0x2d50   :  { %v3022_v28 = vpop.eup %3021  ;;  %v3830_v3 = vsel %vm70_vm1, %v3812_v40, %v3020_v0  ;;  %v2243_v41 = vand.u32 2147483647, %v3020_v0 }
0x2d51   :  { %v3024_v4 = vpop.eup %3023  ;;  %v3834_v17 = vsel %vm70_vm1, %v3816_v29, %v3022_v28  ;;  %v2246_v39 = vand.u32 2147483647, %v3022_v28 }
0x2d52   :  { %v3838_v5 = vsel %vm70_vm1, %v3820_v63, %v3024_v4  ;;  %v2244_v42 = vand.u32 2147483647, %v3024_v4  ;;  %vm2423_vm1 = vcmask 64512  }
0x2d57   :  { %v2264_v7 = vpop.permute.xlu0 %2263 }
0x2d58   :  { %3025 = vrcp.f32 %v2264_v7 }
0x2d59   :  { %v2266_v11 = vpop.permute.xlu1 %2265 }
0x2d5a   :  { %3027 = vrcp.f32 %v2266_v11 }
0x2d5b   :  { %v2268_v57 = vpop.permute.xlu0 %2267 }
0x2d5c   :  { %3029 = vrcp.f32 %v2268_v57 }
0x2d5d   :  { %v2270_v22 = vpop.permute.xlu1 %2269 }
0x2d5e   :  { %3031 = vrcp.f32 %v2270_v22 }
0x2d5f   :  { %v1198_v45 = vpop.permute.xlu0 %1197  ;;  %3033 = vlog2.f32 %v2246_v39 }
0x2d60   :  { %v1222_v25 = vsel %vm1221_vm0, %v1198_v45, 0.0  ;;  %3035 = vlog2.f32 %v2244_v42 }
0x2d61   :  { %1223 = vadd.xlane.f32.xlu0 %v1222_v25  ;;  %v1200_v12 = vpop.permute.xlu1 %1199  ;;  %3037 = vlog2.f32 %v2245_v16 }
0x2d62   :  { %v3026_v60 = vpop.eup %3025  ;;  %v1225_v21 = vsel %vm1221_vm0, %v1200_v12, 0.0  ;;  %3039 = vlog2.f32 %v2243_v41 }
0x2d63   :  { %v1202_v46 = vpop.permute.xlu0 %1201  ;;  %1226 = vadd.xlane.f32.xlu1 %v1225_v21  ;;  %v2288_v26 = vmul.f32 %v3026_v60, %v2247_v37 }
0x2d64   :  { %v3028_v27 = vpop.eup %3027  ;;  %v1228_v30 = vsel %vm1221_vm0, %v1202_v46, 0.0 }
0x2d65   :  { %1229 = vadd.xlane.f32.xlu0 %v1228_v30  ;;  %v2290_v8 = vmul.f32 %v3028_v27, %v2248_v24  ;;  %v1204_v52 = vpop.permute.xlu1 %1203  ;;  %v2303_v55 = vmul.f32 %v2288_v26, %v2288_v26 }
0x2d66   :  { %v3030_v20 = vpop.eup %3029  ;;  %v1231_v35 = vsel %vm1221_vm0, %v1204_v52, 0.0 }
0x2d67   :  { %v2292_v33 = vmul.f32 %v3030_v20, %v2249_v31  ;;  %v1206_v53 = vpop.permute.xlu0 %1205  ;;  %v2311_v28 = vmul.f32 0.5, %v2303_v55  ;;  %v2304_v37 = vmul.f32 %v2290_v8, %v2290_v8 }
0x2d68   :  { %v3032_v38 = vpop.eup %3031  ;;  %v1234_v18 = vsel %vm1221_vm0, %v1206_v53, 0.0  ;;  %v3055_v53 = vld [vmem:[%s3959_s0 + $0x38] sm:$0xff] }
0x2d69   :  { %v2294_v51 = vmul.f32 %v3032_v38, %v2250_v43  ;;  %v3034_v6 = vpop.eup %3033  ;;  %v1208_v14 = vpop.permute.xlu1 %1207  ;;  %v2305_v4 = vmul.f32 %v2292_v33, %v2292_v33  ;;  %v2312_v24 = vmul.f32 0.5, %v2304_v37  ;;  %v2254_v52 = vsub.f32 %v3055_v53, %v3816_v29 }
0x2d6a   :  { %v2334_v19 = vmul.f32 0.6931472, %v3034_v6  ;;  %v3036_v62 = vpop.eup %3035  ;;  %v1237_v9 = vsel %vm1221_vm0, %v1208_v14, 0.0 }
0x2d6b   :  { %v3038_v54 = vpop.eup %3037  ;;  %v2330_v44 = vmul.f32 0.6931472, %v3036_v62  ;;  %v1210_v15 = vpop.permute.xlu0 %1209  ;;  %v2313_v22 = vmul.f32 0.5, %v2305_v4  ;;  %v2306_v45 = vmul.f32 %v2294_v51, %v2294_v51  ;;  %v3053_v51 = vld [vmem:[%s3959_s0 + $0x28] sm:$0xff] }
0x2d6c   :  { %v2332_v48 = vmul.f32 0.6931472, %v3038_v54  ;;  %v3040_v10 = vpop.eup %3039  ;;  %v1240_v32 = vsel %vm1221_vm0, %v1210_v15, 0.0 }
0x2d6d   :  { %v2328_v1 = vmul.f32 0.6931472, %v3040_v10  ;;  %v1212_v56 = vpop.permute.xlu1 %1211  ;;  %v2314_v60 = vmul.f32 0.5, %v2306_v45 }
0x2d6e   :  { %v1243_v61 = vsel %vm1221_vm0, %v1212_v56, 0.0  ;;  %vm2441_vm0 = vcmask 105472  }
0x2d6f   :  { %v2344_v0 = vpop.permute.xlu0 %2343 }
0x2d70   :  { %v2367_v11 = vadd.f32 %v2344_v0, %v2311_v28 }
0x2d71   :  { %v2346_v7 = vpop.permute.xlu1 %2345 }
0x2d72   :  { %v2375_v25 = vadd.f32 0.9189385, %v2367_v11  ;;  %v2368_v46 = vadd.f32 %v2346_v7, %v2312_v24 }
0x2d73   :  { %v2348_v57 = vpop.permute.xlu0 %2347 }
0x2d74   :  { %2277 = vrot.lane.b32.xlu1 %v2246_v39, %s3064_s11  ;;  %v2369_v34 = vadd.f32 %v2348_v57, %v2313_v22  ;;  %v2376_v27 = vadd.f32 0.9189385, %v2368_v46  ;;  %v2252_v39 = vsub.f32 %v3053_v51, %v3820_v63  ;;  %v3056_v63 = vld [vmem:[%s3959_s0 + $0x30] sm:$0xff] }
0x2d75   :  { %v2350_v12 = vpop.permute.xlu1 %2349 }
0x2d76   :  { %v2377_v21 = vadd.f32 0.9189385, %v2369_v34  ;;  %v2370_v23 = vadd.f32 %v2350_v12, %v2314_v60 }
0x2d78   :  { %2273 = vrot.lane.b32.xlu1 %v2244_v42, %s3064_s11  ;;  %v2378_v26 = vadd.f32 0.9189385, %v2370_v23 }
0x2d7b   :  { %2275 = vrot.lane.b32.xlu0 %v2245_v16, %s3064_s11  ;;  %v3054_v16 = vld [vmem:[%s3959_s0 + $0x20] sm:$0xff] }
0x2d7f   :  { %2271 = vrot.lane.b32.xlu0 %v2243_v41, %s3064_s11  ;;  %v2251_v41 = vsub.f32 %v3054_v16, %v3812_v40 }
0x2d9c   :  { %1235 = vadd.xlane.f32.xlu1 %v1234_v18 }
0x2d9e   :  { %1232 = vadd.xlane.f32.xlu0 %v1231_v35 }
0x2dad   :  { %2357 = vrot.lane.b32.xlu1 %v2334_v19, %s3064_s11  ;;  %v2253_v19 = vsub.f32 %v3056_v63, %v3809_v49 }
0x2db1   :  { %2353 = vrot.lane.b32.xlu1 %v2330_v44, %s3064_s11 }
0x2db4   :  { %2355 = vrot.lane.b32.xlu0 %v2332_v48, %s3064_s11 }
0x2db8   :  { %2351 = vrot.lane.b32.xlu0 %v2328_v1, %s3064_s11 }
0x2dd5   :  { %1241 = vadd.xlane.f32.xlu1 %v1240_v32 }
0x2dd7   :  { %1238 = vadd.xlane.f32.xlu0 %v1237_v9 }
0x2ddb   :  { %1244 = vadd.xlane.f32.xlu0 %v1243_v61 }
0x2de6   :  { %2391 = vrot.lane.b32.xlu1 %v2375_v25, %s3065_s21 }
0x2dea   :  { %2395 = vrot.lane.b32.xlu1 %v2377_v21, %s3065_s21 }
0x2dee   :  { %2397 = vrot.lane.b32.xlu1 %v2378_v26, %s3065_s21  ;;  %v1224_v30 = vpop.xlane.xlu0 %1223 }
0x2def   :  { %v1246_v37 = vmul.f32 -0.5, %v1224_v30 }
0x2df0   :  { %v3876_v47 = vpop.xlane.xlu1 %1226 }
0x2df1   :  { %2393 = vrot.lane.b32.xlu0 %v2376_v27, %s3065_s21  ;;  %v1247_v27 = vmul.f32 -0.5, %v3876_v47 }
0x2df2   :  { %v3878_v31 = vpop.xlane.xlu0 %1229 }
0x2df3   :  { %v1248_v24 = vmul.f32 -0.5, %v3878_v31 }
0x2df4   :  { %v2278_v8 = vpop.permute.xlu1 %2277 }
0x2df6   :  { %v2276_v20 = vpop.permute.xlu0 %2275 }
0x2df8   :  { %v2274_v2 = vpop.permute.xlu1 %2273 }
0x2df9   :  { %3041 = vrcp.f32 %v2274_v2 }
0x2dfa   :  { %v2272_v43 = vpop.permute.xlu0 %2271  ;;  %3043 = vrcp.f32 %v2278_v8 }
0x2dfb   :  { %3045 = vrcp.f32 %v2272_v43 }
0x2dfc   :  { %3047 = vrcp.f32 %v2276_v20 }
0x2e03   :  { %v3042_v33 = vpop.eup %3041 }
0x2e04   :  { %v3044_v38 = vpop.eup %3043  ;;  %v2298_v18 = vmul.f32 %v3042_v33, %v2252_v39 }
0x2e05   :  { %v3046_v42 = vpop.eup %3045  ;;  %v2302_v62 = vmul.f32 %v3044_v38, %v2254_v52 }
0x2e06   :  { %v3048_v35 = vpop.eup %3047  ;;  %v2296_v54 = vmul.f32 %v3046_v42, %v2251_v41  ;;  %v2308_v40 = vmul.f32 %v2298_v18, %v2298_v18 }
0x2e07   :  { %v2300_v48 = vmul.f32 %v3048_v35, %v2253_v19  ;;  %v2310_v1 = vmul.f32 %v2302_v62, %v2302_v62 }
0x2e08   :  { %v2307_v14 = vmul.f32 %v2296_v54, %v2296_v54  ;;  %v2316_v29 = vmul.f32 0.5, %v2308_v40 }
0x2e09   :  { %v2309_v32 = vmul.f32 %v2300_v48, %v2300_v48  ;;  %v2318_v56 = vmul.f32 0.5, %v2310_v1 }
0x2e0a   :  { %v2315_v55 = vmul.f32 0.5, %v2307_v14 }
0x2e0b   :  { %v2317_v4 = vmul.f32 0.5, %v2309_v32 }
0x2e29   :  { %v1236_v6 = vpop.xlane.xlu1 %1235 }
0x2e2a   :  { %v1250_v38 = vmul.f32 -0.5, %v1236_v6 }
0x2e2b   :  { %v1233_v44 = vpop.xlane.xlu0 %1232 }
0x2e2c   :  { %v1249_v20 = vmul.f32 -0.5, %v1233_v44 }
0x2e2d   :  { %v2358_v10 = vpop.permute.xlu1 %2357 }
0x2e2e   :  { %v2374_v28 = vadd.f32 %v2358_v10, %v2318_v56 }
0x2e2f   :  { %v2356_v15 = vpop.permute.xlu0 %2355 }
0x2e30   :  { %v2373_v11 = vadd.f32 %v2356_v15, %v2317_v4  ;;  %v2382_v22 = vadd.f32 0.9189385, %v2374_v28 }
0x2e31   :  { %v2354_v9 = vpop.permute.xlu1 %2353 }
0x2e32   :  { %v2372_v61 = vadd.f32 %v2354_v9, %v2316_v29  ;;  %v2381_v45 = vadd.f32 0.9189385, %v2373_v11 }
0x2e33   :  { %v2352_v0 = vpop.permute.xlu0 %2351 }
0x2e34   :  { %v2380_v7 = vadd.f32 0.9189385, %v2372_v61  ;;  %v2371_v49 = vadd.f32 %v2352_v0, %v2315_v55 }
0x2e36   :  { %v2379_v57 = vadd.f32 0.9189385, %v2371_v49  ;;  %2401 = vrot.lane.b32.xlu1 %v2380_v7, %s3065_s21 }
0x2e38   :  { %2399 = vrot.lane.b32.xlu0 %v2379_v57, %s3065_s21 }
0x2e3a   :  { %2405 = vrot.lane.b32.xlu1 %v2382_v22, %s3065_s21 }
0x2e3c   :  { %2403 = vrot.lane.b32.xlu0 %v2381_v45, %s3065_s21 }
0x2e62   :  { %v1242_v25 = vpop.xlane.xlu1 %1241 }
0x2e63   :  { %v1252_v53 = vmul.f32 -0.5, %v1242_v25 }
0x2e64   :  { %v1239_v34 = vpop.xlane.xlu0 %1238 }
0x2e66   :  { %v2392_v12 = vpop.permute.xlu1 %2391 }
0x2e67   :  { %v2424_v60 = vsel %vm2423_vm1, %v3772_v13, %v2392_v12 }
0x2e68   :  { %v2433_v21 = vsel %vm2432_vm3, %v2424_v60, %v1246_v37  ;;  %v1245_v23 = vpop.xlane.xlu0 %1244 }
0x2e69   :  { %2442 = vst.msk [vmem:[%s3970_s12] sm:$0xff] %vm2441_vm0, %v2433_v21  ;;  %v1253_v42 = vmul.f32 -0.5, %v1245_v23 }
0x2e6a   :  { %v2396_v46 = vpop.permute.xlu1 %2395 }
0x2e6b   :  { %v2426_v26 = vsel %vm2423_vm1, %v3768_v50, %v2396_v46 }
0x2e6c   :  { %v2435_v30 = vsel %vm2432_vm3, %v2426_v26, %v1248_v24  ;;  %v2394_v8 = vpop.permute.xlu0 %2393 }
0x2e6d   :  { %2444 = vst.msk [vmem:[%s3970_s12 + $0x10] sm:$0xff] %vm2441_vm0, %v2435_v30  ;;  %v2425_v13 = vsel %vm2423_vm1, %v3782_v59, %v2394_v8  ;;  %v1251_v59 = vmul.f32 -0.5, %v1239_v34 }
0x2e6e   :  { %v2434_v31 = vsel %vm2432_vm3, %v2425_v13, %v1247_v27  ;;  %v2398_v2 = vpop.permute.xlu1 %2397 }
0x2e6f   :  { %2443 = vst.msk [vmem:[%s3970_s12 + $0x8] sm:$0xff] %vm2441_vm0, %v2434_v31  ;;  %v2427_v50 = vsel %vm2423_vm1, %v3777_v36, %v2398_v2 }
0x2e70   :  { %v2436_v47 = vsel %vm2432_vm3, %v2427_v50, %v1249_v20 }
0x2e71   :  { %2445 = vst.msk [vmem:[%s3970_s12 + $0x18] sm:$0xff] %vm2441_vm0, %v2436_v47 }
0x2ea8   :  { %v2402_v43 = vpop.permute.xlu1 %2401 }
0x2ea9   :  { %v2429_v33 = vsel %vm2423_vm1, %v3838_v5, %v2402_v43 }
0x2eaa   :  { %v2438_v51 = vsel %vm2432_vm3, %v2429_v33, %v1251_v59  ;;  %v2400_v39 = vpop.permute.xlu0 %2399 }
0x2eab   :  { %2447 = vst.msk [vmem:[%s3970_s12 + $0x28] sm:$0xff] %vm2441_vm0, %v2438_v51  ;;  %v2428_v36 = vsel %vm2423_vm1, %v3830_v3, %v2400_v39 }
0x2eac   :  { %v2437_v16 = vsel %vm2432_vm3, %v2428_v36, %v1250_v38  ;;  %v2406_v41 = vpop.permute.xlu1 %2405 }
0x2ead   :  { %2446 = vst.msk [vmem:[%s3970_s12 + $0x20] sm:$0xff] %vm2441_vm0, %v2437_v16  ;;  %v2431_v5 = vsel %vm2423_vm1, %v3834_v17, %v2406_v41 }
0x2eae   :  { %v2440_v52 = vsel %vm2432_vm3, %v2431_v5, %v1253_v42  ;;  %v2404_v18 = vpop.permute.xlu0 %2403 }
0x2eaf   :  { %2449 = vst.msk [vmem:[%s3970_s12 + $0x38] sm:$0xff] %vm2441_vm0, %v2440_v52  ;;  %v2430_v3 = vsel %vm2423_vm1, %v3826_v58, %v2404_v18 }
0x2eb0   :  { %v2439_v35 = vsel %vm2432_vm3, %v2430_v3, %v1252_v53 }
0x2eb1   :  { %2448 = vst.msk [vmem:[%s3970_s12 + $0x30] sm:$0xff] %vm2441_vm0, %v2439_v35 }

</bundles_post_ra>
